<compile_context>
chip_gen: v7x
topology: tpu7x:2x2x1
jax: 0.10.0
libtpu: 0.0.40
codegen_flags: <defaults>
</compile_context>

<pallas_src>
import functools

import jax
import jax.numpy as jnp
import numpy as np
from jax.experimental import pallas as pl
from jax.experimental.pallas import tpu as pltpu

DTYPE = jnp.float32          # JacobiMachine.__init__ default datatype=torch.float32
PALLAS_MIN_DIM = 128         # levels smaller than this stay in plain JAX
_JACOBI_UNROLL = 4           # sweepable (4 vs 8)


# ---------------------------------------------------------------------------
# Generation-aware VMEM limit (feedback: no hard 64 MiB clamp).
# ---------------------------------------------------------------------------
@functools.lru_cache(maxsize=None)
def _vmem_limit_bytes():
    try:
        info = pltpu.get_tpu_info()
        cap = int(getattr(info, "vmem_capacity_bytes", 0))
        if cap > 0:
            return int(cap * 0.9)
    except Exception:
        pass
    return 64 * 1024 * 1024   # conservative fallback (works on every generation)


def _cparams():
    return pltpu.CompilerParams(vmem_limit_bytes=_vmem_limit_bytes())


# ---------------------------------------------------------------------------
# In-kernel helpers (one-shot V-cycle kernels only; the Jacobi hot loop uses
# the zero-halo formulation and needs none of these).
# ---------------------------------------------------------------------------
def _edge_masks(H, W, dtype=DTYPE):
    """Boundary masks that zero the circular wrap of pltpu.roll (== zero padding)."""
    row = jax.lax.broadcasted_iota(jnp.int32, (H, W), 0)
    col = jax.lax.broadcasted_iota(jnp.int32, (H, W), 1)
    m_up = (row != 0).astype(dtype)
    m_down = (row != H - 1).astype(dtype)
    m_left = (col != 0).astype(dtype)
    m_right = (col != W - 1).astype(dtype)
    return m_up, m_down, m_left, m_right


def _stencil(x):
    """5-point 0.25-cross conv with zero padding == F.conv2d(kernel, padding=1)."""
    H, W = x.shape
    mu, md, ml, mr = _edge_masks(H, W, x.dtype)
    return 0.25 * (pltpu.roll(x, shift=1, axis=0) * mu
                   + pltpu.roll(x, shift=H - 1, axis=0) * md
                   + pltpu.roll(x, shift=1, axis=1) * ml
                   + pltpu.roll(x, shift=W - 1, axis=1) * mr)


def _pool_matrix_left(H, dtype):
    """(H//2, H): 0.5 at [i, 2i] and [i, 2i+1]  (row pooling via MXU, exact in bf16)."""
    r = jax.lax.broadcasted_iota(jnp.int32, (H // 2, H), 0)
    c = jax.lax.broadcasted_iota(jnp.int32, (H // 2, H), 1)
    sel = jnp.logical_or(c == 2 * r, c == 2 * r + 1)
    return jnp.where(sel, 0.5, 0.0).astype(dtype)


def _pool_matrix_right(W, dtype):
    """(W, W//2): 0.5 at [2j, j] and [2j+1, j]  (column pooling via MXU)."""
    r = jax.lax.broadcasted_iota(jnp.int32, (W, W // 2), 0)
    c = jax.lax.broadcasted_iota(jnp.int32, (W, W // 2), 1)
    sel = jnp.logical_or(r == 2 * c, r == 2 * c + 1)
    return jnp.where(sel, 0.5, 0.0).astype(dtype)


def _upsample_matrix_left(H, dtype):
    """(H, H//2) bilinear 2x row-upsample, align_corners=False (0.75/0.25, edge clamp)."""
    Hc = H // 2
    r = jax.lax.broadcasted_iota(jnp.int32, (H, Hc), 0)   # output row
    c = jax.lax.broadcasted_iota(jnp.int32, (H, Hc), 1)   # input row
    k = r // 2
    even = (r % 2) == 0
    w = jnp.where(c == k, 0.75, 0.0)
    w = w + jnp.where(jnp.logical_and(even, c == k - 1), 0.25, 0.0)
    w = w + jnp.where(jnp.logical_and(jnp.logical_not(even), c == k + 1), 0.25, 0.0)
    # source-index clamp at the borders folds the out-of-range 0.25 into 0.75 -> 1.0
    w = jnp.where(jnp.logical_and(r == 0, c == 0), 1.0, w)
    w = jnp.where(jnp.logical_and(r == H - 1, c == Hc - 1), 1.0, w)
    return w.astype(dtype)


def _upsample_matrix_right(W, dtype):
    """(W//2, W) bilinear 2x column-upsample (transpose pattern of the left matrix)."""
    Wc = W // 2
    r = jax.lax.broadcasted_iota(jnp.int32, (Wc, W), 0)   # input col
    c = jax.lax.broadcasted_iota(jnp.int32, (Wc, W), 1)   # output col
    k = c // 2
    even = (c % 2) == 0
    w = jnp.where(r == k, 0.75, 0.0)
    w = w + jnp.where(jnp.logical_and(even, r == k - 1), 0.25, 0.0)
    w = w + jnp.where(jnp.logical_and(jnp.logical_not(even), r == k + 1), 0.25, 0.0)
    w = jnp.where(jnp.logical_and(c == 0, r == 0), 1.0, w)
    w = jnp.where(jnp.logical_and(c == W - 1, r == Wc - 1), 1.0, w)
    return w.astype(dtype)


# ---------------------------------------------------------------------------
# Kernel 1: masked Jacobi iterations (hot path) — zero-halo formulation.
# The wrapper pads x and mask with trailing zero halo rows/cols (sublane/lane
# aligned).  mask == 0 on the halo keeps the halo exactly zero every step, so
# the circular pltpu.roll wrap is harmless and no edge masks are needed.
# ---------------------------------------------------------------------------
def _jacobi_kernel(x_ref, m_ref, o_ref, *, nt, unroll):
    HP, WP = x_ref.shape
    x = x_ref[...]
    m = m_ref[...]

    # loop-invariant hoisting: only two full-size weight arrays survive.
    qm = 0.25 * m          # folded 0.25 * mask (0 on halo)
    om = 1.0 - m           # 1 on halo -> x*om keeps halo at 0
    # TODO(synk): if the bundle dump shows vld binding, regen om = 1 - 4*qm on the fly.

    def step(xc):
        nb = (pltpu.roll(xc, shift=1, axis=0)
              + pltpu.roll(xc, shift=HP - 1, axis=0)
              + pltpu.roll(xc, shift=1, axis=1)
              + pltpu.roll(xc, shift=WP - 1, axis=1))
        return xc * om + nb * qm

    main, rem = divmod(nt, unroll)
    if main > 0:
        def body(_, xc):
            for _ in range(unroll):     # manual unroll (static) for LLO scheduling
                xc = step(xc)
            return xc
        x = jax.lax.fori_loop(0, main, body, x)
    for _ in range(rem):                # static remainder
        x = step(x)

    o_ref[...] = x


def jacobi(x, mask, nt, *, unroll=_JACOBI_UNROLL):
    H, W = x.shape
    if min(H, W) < PALLAS_MIN_DIM:
        # Tiny coarse grids: sub-128 lane widths waste most of every vreg and
        # the long serial loop is latency-bound -> plain JAX is faster.
        return _jacobi_jax(x.astype(DTYPE), mask.astype(DTYPE), nt)
    # Trailing zero halo: >=1 row/col, rounded to sublane (8) / lane (128) granules.
    ph = (-H) % 8 + 8
    pw = (-W) % 128 + 128
    xp = jnp.pad(x.astype(DTYPE), ((0, ph), (0, pw)))
    mp = jnp.pad(mask.astype(DTYPE), ((0, ph), (0, pw)))
    out = pl.pallas_call(
        functools.partial(_jacobi_kernel, nt=int(nt), unroll=unroll),
        out_shape=jax.ShapeDtypeStruct(xp.shape, DTYPE),
        input_output_aliases={0: 0},          # xp is a fresh temp -> safe to donate
        compiler_params=_cparams(),
    )(xp, mp)
    return out[:H, :W]


# ---------------------------------------------------------------------------
# Kernel 2 (down-sweep): fused residual (single stencil by linearity) + 2x2
# average-pool restriction via bf16 MXU matmuls (0.5 weights exact in bf16).
# ---------------------------------------------------------------------------
def _residual_restrict_kernel(g_ref, m_ref, o_ref):
    H, W = g_ref.shape
    g = g_ref[...]
    m = m_ref[...]
    # conv(g*(m>0)) + conv(g*(1-m)) == conv(g*w)  (linearity)
    w = (m > 0).astype(DTYPE) + (1.0 - m)
    r = _stencil(g * w)
    Ph = _pool_matrix_left(H, jnp.bfloat16)
    PwT = _pool_matrix_right(W, jnp.bfloat16)
    rp = jnp.dot(Ph, r.astype(jnp.bfloat16), preferred_element_type=jnp.float32)
    o_ref[...] = jnp.dot(rp.astype(jnp.bfloat16), PwT,
                         preferred_element_type=jnp.float32).astype(DTYPE)


# ---------------------------------------------------------------------------
# Kernel 3 (up-sweep): fused bilinear 2x upsample (MXU) + prolongation add +
# single-stencil dual conv.  No full-resolution `up` input any more.
# ---------------------------------------------------------------------------
def _prolong_correct_kernel(c_ref, g_ref, m_ref, o_ref):
    H, W = g_ref.shape
    Uh = _upsample_matrix_left(H, jnp.bfloat16)
    UwT = _upsample_matrix_right(W, jnp.bfloat16)
    c = c_ref[...].astype(jnp.bfloat16)
    up_rows = jnp.dot(Uh, c, preferred_element_type=jnp.float32)
    up = jnp.dot(up_rows.astype(jnp.bfloat16), UwT, preferred_element_type=jnp.float32)
    m = m_ref[...]
    w = (m > 0).astype(DTYPE) + (1.0 - m)
    f = up + g_ref[...]
    o_ref[...] = _stencil(f * w)


# ---------------------------------------------------------------------------
# Plain-JAX fallbacks for tiny levels (launch overhead dominates) and glue.
# ---------------------------------------------------------------------------
def _stencil_jax(x):
    p = jnp.pad(x, 1)
    return 0.25 * (p[:-2, 1:-1] + p[2:, 1:-1] + p[1:-1, :-2] + p[1:-1, 2:])


def _jacobi_jax(x, mask, nt):
    def step(_, xc):
        return _stencil_jax(xc) * mask + xc * (1.0 - mask)
    return jax.lax.fori_loop(0, int(nt), step, x)


def _interpolate(f, target_hw):
    # matches F.interpolate(mode='bilinear', align_corners=False) for 2x upsampling
    return jax.image.resize(f, target_hw, method="bilinear")


def _residual_restrict_jax(g, m):
    w = (m > 0).astype(DTYPE) + (1.0 - m)
    r = _stencil_jax(g * w)
    H, W = r.shape
    return r.reshape(H // 2, 2, W // 2, 2).mean(axis=(1, 3))


def _prolong_correct_jax(coarse, g, m):
    up = _interpolate(coarse, g.shape)
    w = (m > 0).astype(DTYPE) + (1.0 - m)
    return _stencil_jax((up + g) * w)


def residual_restrict(g, mask):
    H, W = g.shape
    if min(H, W) < PALLAS_MIN_DIM:
        return _residual_restrict_jax(g, mask)
    return pl.pallas_call(
        _residual_restrict_kernel,
        out_shape=jax.ShapeDtypeStruct((H // 2, W // 2), DTYPE),
        compiler_params=_cparams(),
    )(g.astype(DTYPE), mask.astype(DTYPE))


def prolong_correct(coarse, g, mask):
    H, W = g.shape
    if min(H, W) < PALLAS_MIN_DIM:
        return _prolong_correct_jax(coarse, g, mask)
    return pl.pallas_call(
        _prolong_correct_kernel,
        out_shape=jax.ShapeDtypeStruct((H, W), DTYPE),
        compiler_params=_cparams(),
    )(coarse.astype(DTYPE), g.astype(DTYPE), mask.astype(DTYPE))


# ---------------------------------------------------------------------------
# Full forward (mirrors JacobiMachine.forward).
# ---------------------------------------------------------------------------
def jacobi_machine_forward(X, masks, *, nt, num_levels):
    x2d = X[0, 0].astype(DTYPE)
    m2d = [m[0, 0].astype(DTYPE) for m in masks]

    grids = [x2d]
    snapshots = []
    # Down-sweep: residual + restriction (fused in one kernel per level).
    for level in range(1, num_levels):
        coarse = residual_restrict(grids[level - 1], m2d[level - 1])
        grids.append(coarse)
        snapshots.append(coarse)

    # Coarse solve (reference hardcodes Mask9 == Masks[num_levels-1] when num_levels==9).
    coarse_solution = jacobi(grids[-1], m2d[num_levels - 1], nt)
    grids[-1] = coarse_solution
    snapshots.append(coarse_solution)

    # Up-sweep: fused (MXU upsample + add + dual conv).
    for level in range(num_levels - 2, -1, -1):
        fine = prolong_correct(grids[level + 1], grids[level], m2d[level])
        snapshots.append(fine)

    # The reference never writes the up-sweep back into `grids`,
    # so the returned tensor is jacobi(X, Mask1).
    final = jacobi(grids[0], m2d[0], nt)
    snapshots.append(final)
    return final[None, None], [s[None, None] for s in snapshots]


# ---------------------------------------------------------------------------
# Pure-JAX reference of the FULL forward (correctness check for every stage).
# ---------------------------------------------------------------------------
def _dual_conv_ref(g, m):
    return _stencil_jax(g * (m > 0).astype(DTYPE)) + _stencil_jax(g * (1.0 - m))


def _forward_ref(X, masks, *, nt, num_levels):
    x2d = X[0, 0].astype(DTYPE)
    m2d = [m[0, 0].astype(DTYPE) for m in masks]
    grids = [x2d]
    snapshots = []
    for level in range(1, num_levels):
        r = _dual_conv_ref(grids[level - 1], m2d[level - 1])
        H, W = r.shape
        coarse = r.reshape(H // 2, 2, W // 2, 2).mean(axis=(1, 3))
        grids.append(coarse)
        snapshots.append(coarse)
    cs = _jacobi_jax(grids[-1], m2d[num_levels - 1], nt)
    grids[-1] = cs
    snapshots.append(cs)
    for level in range(num_levels - 2, -1, -1):
        up = _interpolate(grids[level + 1], grids[level].shape)
        fine = _dual_conv_ref(up + grids[level], m2d[level])
        snapshots.append(fine)
    final = _jacobi_jax(grids[0], m2d[0], nt)
    snapshots.append(final)
    return final[None, None], [s[None, None] for s in snapshots]


if __name__ == "__main__":
    # Small analogue of the original problem (num_levels=9, nt=1000) that still
    # exercises both the Pallas path (levels >= 128) and the JAX fallback path.
    H = W = 256
    num_levels = 5
    nt = 20

    key = jax.random.PRNGKey(0)
    kx, km = jax.random.split(key)
    X = jax.random.normal(kx, (1, 1, H, W), dtype=DTYPE)

    mkeys = jax.random.split(km, num_levels)
    masks = []
    for l in range(num_levels):
        s = H >> l
        masks.append(jax.random.bernoulli(mkeys[l], 0.7, (1, 1, s, s)).astype(DTYPE))

    out, snaps = jacobi_machine_forward(X, masks, nt=nt, num_levels=num_levels)
    out = jax.block_until_ready(out)

    ref_out, ref_snaps = _forward_ref(X, masks, nt=nt, num_levels=num_levels)
    ref_out = jax.block_until_ready(ref_out)

    # Final output (what the PyTorch module returns): tight check (f32 everywhere).
    np.testing.assert_allclose(np.asarray(out), np.asarray(ref_out), rtol=1e-4, atol=1e-4)
    # Snapshots (full V-cycle path): looser check — bf16 MXU pooling / upsample
    # operands and algebraic rearrangements introduce small float differences.
    assert len(snaps) == len(ref_snaps)
    for s, r in zip(snaps, ref_snaps):
        np.testing.assert_allclose(np.asarray(s), np.asarray(r), rtol=5e-2, atol=2e-2)

    print("KERNEL_OK")
</pallas_src>

<mosaic_0001>
module attributes {stable_mosaic.version = 11 : i64} {
  func.func @_residual_restrict_kernel(%arg0: memref<256x256xf32, #tpu.memory_space<vmem>>, %arg1: memref<256x256xf32, #tpu.memory_space<vmem>>, %arg2: memref<128x128xf32, #tpu.memory_space<vmem>>) attributes {dimension_semantics = [], scalar_prefetch = 0 : i64, scratch_operands = 0 : i64, tpu.core_type = #tpu.core_type<tc>} {
    %c0 = arith.constant 0 : index
    %c0_0 = arith.constant 0 : index
    %0 = vector.load %arg0[%c0, %c0_0] : memref<256x256xf32, #tpu.memory_space<vmem>>, vector<256x256xf32>
    %c0_1 = arith.constant 0 : index
    %c0_2 = arith.constant 0 : index
    %1 = vector.load %arg1[%c0_1, %c0_2] : memref<256x256xf32, #tpu.memory_space<vmem>>, vector<256x256xf32>
    %cst = arith.constant 0.000000e+00 : f32
    %2 = vector.broadcast %cst : f32 to vector<256x256xf32>
    %3 = arith.cmpf ogt, %1, %2 : vector<256x256xf32>
    %4 = arith.extui %3 : vector<256x256xi1> to vector<256x256xi32>
    %5 = arith.sitofp %4 : vector<256x256xi32> to vector<256x256xf32>
    %cst_3 = arith.constant 1.000000e+00 : f32
    %6 = vector.broadcast %cst_3 : f32 to vector<256x256xf32>
    %7 = arith.subf %6, %1 : vector<256x256xf32>
    %8 = arith.addf %5, %7 : vector<256x256xf32>
    %9 = arith.mulf %0, %8 : vector<256x256xf32>
    %10 = tpu.iota {dimensions = array<i32: 0>} : vector<256x256xi32>
    %11 = tpu.iota {dimensions = array<i32: 1>} : vector<256x256xi32>
    %c0_i32 = arith.constant 0 : i32
    %12 = vector.broadcast %c0_i32 : i32 to vector<256x256xi32>
    %13 = arith.cmpi ne, %10, %12 : vector<256x256xi32>
    %14 = arith.extui %13 : vector<256x256xi1> to vector<256x256xi32>
    %15 = arith.sitofp %14 : vector<256x256xi32> to vector<256x256xf32>
    %c255_i32 = arith.constant 255 : i32
    %16 = vector.broadcast %c255_i32 : i32 to vector<256x256xi32>
    %17 = arith.cmpi ne, %10, %16 : vector<256x256xi32>
    %18 = arith.extui %17 : vector<256x256xi1> to vector<256x256xi32>
    %19 = arith.sitofp %18 : vector<256x256xi32> to vector<256x256xf32>
    %c0_i32_4 = arith.constant 0 : i32
    %20 = vector.broadcast %c0_i32_4 : i32 to vector<256x256xi32>
    %21 = arith.cmpi ne, %11, %20 : vector<256x256xi32>
    %22 = arith.extui %21 : vector<256x256xi1> to vector<256x256xi32>
    %23 = arith.sitofp %22 : vector<256x256xi32> to vector<256x256xf32>
    %c255_i32_5 = arith.constant 255 : i32
    %24 = vector.broadcast %c255_i32_5 : i32 to vector<256x256xi32>
    %25 = arith.cmpi ne, %11, %24 : vector<256x256xi32>
    %26 = arith.extui %25 : vector<256x256xi1> to vector<256x256xi32>
    %27 = arith.sitofp %26 : vector<256x256xi32> to vector<256x256xf32>
    %c1_i32 = arith.constant 1 : i32
    %28 = tpu.dynamic_rotate %9 by %c1_i32 dim 0 : vector<256x256xf32>, i32 -> vector<256x256xf32>
    %29 = arith.mulf %28, %15 : vector<256x256xf32>
    %c255_i32_6 = arith.constant 255 : i32
    %30 = tpu.dynamic_rotate %9 by %c255_i32_6 dim 0 : vector<256x256xf32>, i32 -> vector<256x256xf32>
    %31 = arith.mulf %30, %19 : vector<256x256xf32>
    %32 = arith.addf %29, %31 : vector<256x256xf32>
    %c1_i32_7 = arith.constant 1 : i32
    %33 = tpu.dynamic_rotate %9 by %c1_i32_7 dim 1 : vector<256x256xf32>, i32 -> vector<256x256xf32>
    %34 = arith.mulf %33, %23 : vector<256x256xf32>
    %35 = arith.addf %32, %34 : vector<256x256xf32>
    %c255_i32_8 = arith.constant 255 : i32
    %36 = tpu.dynamic_rotate %9 by %c255_i32_8 dim 1 : vector<256x256xf32>, i32 -> vector<256x256xf32>
    %37 = arith.mulf %36, %27 : vector<256x256xf32>
    %38 = arith.addf %35, %37 : vector<256x256xf32>
    %cst_9 = arith.constant 2.500000e-01 : f32
    %39 = vector.broadcast %cst_9 : f32 to vector<256x256xf32>
    %40 = arith.mulf %39, %38 : vector<256x256xf32>
    %41 = tpu.iota {dimensions = array<i32: 0>} : vector<128x256xi32>
    %42 = tpu.iota {dimensions = array<i32: 1>} : vector<128x256xi32>
    %c2_i32 = arith.constant 2 : i32
    %43 = vector.broadcast %c2_i32 : i32 to vector<128x256xi32>
    %44 = arith.muli %43, %41 : vector<128x256xi32>
    %45 = arith.cmpi eq, %42, %44 : vector<128x256xi32>
    %c2_i32_10 = arith.constant 2 : i32
    %46 = vector.broadcast %c2_i32_10 : i32 to vector<128x256xi32>
    %47 = arith.muli %46, %41 : vector<128x256xi32>
    %c1_i32_11 = arith.constant 1 : i32
    %48 = vector.broadcast %c1_i32_11 : i32 to vector<128x256xi32>
    %49 = arith.addi %47, %48 : vector<128x256xi32>
    %50 = arith.cmpi eq, %42, %49 : vector<128x256xi32>
    %51 = arith.ori %45, %50 : vector<128x256xi1>
    %cst_12 = arith.constant 5.000000e-01 : f32
    %cst_13 = arith.constant 0.000000e+00 : f32
    %52 = vector.broadcast %cst_12 : f32 to vector<128x256xf32>
    %53 = vector.broadcast %cst_13 : f32 to vector<128x256xf32>
    %54 = arith.select %51, %52, %53 : vector<128x256xi1>, vector<128x256xf32>
    %55 = arith.truncf %54 : vector<128x256xf32> to vector<128x256xbf16>
    %56 = tpu.iota {dimensions = array<i32: 0>} : vector<256x128xi32>
    %57 = tpu.iota {dimensions = array<i32: 1>} : vector<256x128xi32>
    %c2_i32_14 = arith.constant 2 : i32
    %58 = vector.broadcast %c2_i32_14 : i32 to vector<256x128xi32>
    %59 = arith.muli %58, %57 : vector<256x128xi32>
    %60 = arith.cmpi eq, %56, %59 : vector<256x128xi32>
    %c2_i32_15 = arith.constant 2 : i32
    %61 = vector.broadcast %c2_i32_15 : i32 to vector<256x128xi32>
    %62 = arith.muli %61, %57 : vector<256x128xi32>
    %c1_i32_16 = arith.constant 1 : i32
    %63 = vector.broadcast %c1_i32_16 : i32 to vector<256x128xi32>
    %64 = arith.addi %62, %63 : vector<256x128xi32>
    %65 = arith.cmpi eq, %56, %64 : vector<256x128xi32>
    %66 = arith.ori %60, %65 : vector<256x128xi1>
    %cst_17 = arith.constant 5.000000e-01 : f32
    %cst_18 = arith.constant 0.000000e+00 : f32
    %67 = vector.broadcast %cst_17 : f32 to vector<256x128xf32>
    %68 = vector.broadcast %cst_18 : f32 to vector<256x128xf32>
    %69 = arith.select %66, %67, %68 : vector<256x128xi1>, vector<256x128xf32>
    %70 = arith.truncf %69 : vector<256x128xf32> to vector<256x128xbf16>
    %71 = arith.truncf %40 : vector<256x256xf32> to vector<256x256xbf16>
    %cst_19 = arith.constant dense<0.000000e+00> : vector<128x256xf32>
    %72 = tpu.matmul %55, %71, %cst_19 {dimension_numbers = #tpu.dot_dimension_numbers<[1], [0], [0], [1], [0, 0, 1, 1], [], []>} : vector<128x256xbf16>, vector<256x256xbf16>, vector<128x256xf32> -> vector<128x256xf32>
    %73 = arith.truncf %72 : vector<128x256xf32> to vector<128x256xbf16>
    %cst_20 = arith.constant dense<0.000000e+00> : vector<128x128xf32>
    %74 = tpu.matmul %73, %70, %cst_20 {dimension_numbers = #tpu.dot_dimension_numbers<[1], [0], [0], [1], [0, 0, 1, 1], [], []>} : vector<128x256xbf16>, vector<256x128xbf16>, vector<128x128xf32> -> vector<128x128xf32>
    %c0_21 = arith.constant 0 : index
    %c0_22 = arith.constant 0 : index
    %75 = vector.load %arg2[%c0_21, %c0_22] : memref<128x128xf32, #tpu.memory_space<vmem>>, vector<128x128xf32>
    tpu.vector_store %arg2[%c0_21, %c0_22], %74 {strides = array<i32>} : memref<128x128xf32, #tpu.memory_space<vmem>>, vector<128x128xf32>,
    return
  }
}

</mosaic_0001>

<bundles_post_ra>
// kernel: tpu_custom_call.1
= control target key start
LH: loop header
LB: loop body
LE: loop exit
PB: predicated region body
PF: predicated region fallthrough
CT: control target
= control target key end

     0   :  { %7 = vsyncpa [#allocation3], 0  ;;  %s5180_s0 = inlined_call_operand.hbm [shape: f32[256,256], index: 0, kind: input, shape index: {}]   ;;  %s5181_s1 = inlined_call_operand.hbm [shape: f32[256,256], index: 1, kind: input, shape index: {}]   ;;  %s5182_s2 = inlined_call_operand.hbm [shape: f32[128,128], index: 2, kind: output, shape index: {}]  }
   0x1   :  { %8 = vsyncpa [#allocation6], 0 }
   0x2   :  { %9 = vsyncpa [#allocation4], 0  ;;  %s2842_s9 = smov [#allocation2]   ;;  %s2770_s13 = scalar_lea.hbm %s5180_s0, 8192 }
   0x3   :  { %s15_s10 = sshll.u32 %s2842_s9, 4  ;;  %p2771_p0 = scmp.ne.s32.totalorder %s5180_s0, %s2770_s13  ;;  %s16_s10 = int_to_ptr.vmem [resolvable:$true] %s15_s10 }
   0x4   :  { %p2774_p1 = scmp.lt.u32.totalorder %s2770_s13, %s5180_s0 }
   0x6   :  { %p2776_p2 = pnand %p2774_p1, %p2771_p0 }
   0x8   :  { %2779 = shalt.err (!%p2776_p2)
}
   0x9   :  { %s2780_s18 = scalar_lea.vmem %s16_s10, 8192  ;;  %p2785_p4 = scmp.lt.s32.totalorder %s16_s10, %s16_s10 }
   0xa   :  { %p2781_p3 = scmp.ne.s32.totalorder %s16_s10, %s2780_s18  ;;  %p2786_p5 = scmp.lt.s32.totalorder %s2780_s18, %s2780_s18 }
   0xc   :  { %p2787_p6 = por %p2786_p5, %p2785_p4 }
   0xe   :  { %p2788_p7 = pnand %p2787_p6, %p2781_p3 }
  0x10   :  { %2791 = shalt.err (!%p2788_p7)
}
  0x11   :  { %s2843_s19 = smov 256   ;;  %s2844_s20 = smov 16  }
  0x12   :  { %21 = dma.hbm_to_vmem [thread:$0]  %s5180_s0, 8192, %s16_s10, [#allocation3], %s2843_s19, %s2843_s19, %s2844_s20  }
  0x13   :  { %s2845_s23 = smov [#allocation5]   ;;  %s2792_s27 = scalar_lea.hbm %s5181_s1, 8192 }
  0x14   :  { %s27_s24 = sshll.u32 %s2845_s23, 4  ;;  %p2793_p8 = scmp.ne.s32.totalorder %s5181_s1, %s2792_s27  ;;  %s28_s24 = int_to_ptr.vmem [resolvable:$true] %s27_s24 }
  0x15   :  { %p2796_p9 = scmp.lt.u32.totalorder %s2792_s27, %s5181_s1 }
  0x17   :  { %p2798_p10 = pnand %p2796_p9, %p2793_p8 }
  0x19   :  { %2801 = shalt.err (!%p2798_p10)
}
  0x1a   :  { %s2802_s4 = scalar_lea.vmem %s28_s24, 8192  ;;  %p2807_p12 = scmp.lt.s32.totalorder %s28_s24, %s28_s24 }
  0x1b   :  { %p2803_p11 = scmp.ne.s32.totalorder %s28_s24, %s2802_s4  ;;  %p2808_p13 = scmp.lt.s32.totalorder %s2802_s4, %s2802_s4 }
  0x1d   :  { %p2809_p0 = por %p2808_p13, %p2807_p12 }
  0x1f   :  { %p2810_p1 = pnand %p2809_p0, %p2803_p11 }
  0x21   :  { %2813 = shalt.err (!%p2810_p1)
}
  0x22   :  { %33 = dma.hbm_to_vmem [thread:$0]  %s5181_s1, 8192, %s28_s24, [#allocation6], %s2843_s19, %s2843_s19, %s2844_s20  }
  0x23   :  { %2836 = dma.done.wait [#allocation3], 8192  }
  0x24   :  { %2837 = vsyncadd [#allocation3], 4294959104 }
  0x25   :  { %2838 = dma.done.wait [#allocation6], 8192  }
  0x26   :  { %2839 = vsyncadd [#allocation6], 4294959104  ;;  %v106_v0 = vld [vmem:[#allocation5 + $0x8] sm:$0xff]  ;;  %v105_v2 = vld [vmem:[#allocation5] sm:$0xff]  ;;  %v5189_v5 = vmov 0.0   ;;  %s2847_s1 = smov 1  }
  0x27   :  { %vm170_vm0 = vcmp.gt.f32.partialorder %v106_v0, 0.0  ;;  %v362_v1 = vsub.f32 1.0, %v106_v0  ;;  %v108_v3 = vld [vmem:[#allocation5 + $0x18] sm:$0xff]  ;;  %v42_v4 = vld [vmem:[#allocation2 + $0x8] sm:$0xff]  ;;  %vm169_vm1 = vcmp.gt.f32.partialorder %v105_v2, 0.0  ;;  %v361_v7 = vsub.f32 1.0, %v105_v2 }
  0x28   :  { %v2564_v6 = vsel %vm170_vm0, 1.0, %v5189_v5  ;;  %vm172_vm2 = vcmp.gt.f32.partialorder %v108_v3, 0.0  ;;  %v107_v8 = vld [vmem:[#allocation5 + $0x10] sm:$0xff]  ;;  %v41_v10 = vld [vmem:[#allocation2] sm:$0xff]  ;;  %v2563_v11 = vsel %vm169_vm1, 1.0, %v5189_v5  ;;  %v364_v13 = vsub.f32 1.0, %v108_v3 }
  0x29   :  { %v426_v9 = vadd.f32 %v2564_v6, %v362_v1  ;;  %v2566_v12 = vsel %vm172_vm2, 1.0, %v5189_v5  ;;  %v425_v14 = vadd.f32 %v2563_v11, %v361_v7  ;;  %v44_v15 = vld [vmem:[#allocation2 + $0x18] sm:$0xff]  ;;  %vm171_vm3 = vcmp.gt.f32.partialorder %v107_v8, 0.0  ;;  %v43_v19 = vld [vmem:[#allocation2 + $0x10] sm:$0xff]  ;;  %v109_v25 = vld [vmem:[#allocation5 + $0x20] sm:$0xff]  ;;  %s2848_s6 = smov 127  }
  0x2a   :  { %v363_v16 = vsub.f32 1.0, %v107_v8  ;;  %v428_v18 = vadd.f32 %v2566_v12, %v364_v13  ;;  %v2565_v20 = vsel %vm171_vm3, 1.0, %v5189_v5  ;;  %v111_v23 = vld [vmem:[#allocation5 + $0x30] sm:$0xff]  ;;  %vm173_vm5 = vcmp.gt.f32.partialorder %v109_v25, 0.0  ;;  %v112_v27 = vld [vmem:[#allocation5 + $0x38] sm:$0xff]  ;;  %v110_v29 = vld [vmem:[#allocation5 + $0x28] sm:$0xff] }
  0x2b   :  { %v2895_v17 = vmul.f32 %v426_v9, %v42_v4  ;;  %v2898_v21 = vmul.f32 %v425_v14, %v41_v10  ;;  %vm175_vm4 = vcmp.gt.f32.partialorder %v111_v23, 0.0  ;;  %v367_v28 = vsub.f32 1.0, %v111_v23  ;;  %v47_v35 = vld [vmem:[#allocation2 + $0x30] sm:$0xff]  ;;  %v45_v39 = vld [vmem:[#allocation2 + $0x20] sm:$0xff]  ;;  %v48_v44 = vld [vmem:[#allocation2 + $0x38] sm:$0xff]  ;;  %s2850_s7 = smov [#allocation7]  }
  0x2c   :  { %v427_v22 = vadd.f32 %v2565_v20, %v363_v16  ;;  %v2902_v24 = vmul.f32 %v428_v18, %v44_v15  ;;  %v2569_v30 = vsel %vm175_vm4, 1.0, %v5189_v5  ;;  %v365_v31 = vsub.f32 1.0, %v109_v25  ;;  %v46_v46 = vld [vmem:[#allocation2 + $0x28] sm:$0xff]  ;;  %v115_v47 = vld [vmem:[#allocation5 + $0x50] sm:$0xff]  ;;  %v113_v49 = vld [vmem:[#allocation5 + $0x40] sm:$0xff]  ;;  %s2550_s8 = sshll.u32 %s2850_s7, 4  ;;  %s2551_s8 = int_to_ptr.vmem [resolvable:$true] %s2550_s8 }
  0x2d   :  { %5226 = vst [vmem:[#allocation11_spill] sm:$0xff] %v2895_v17  ;;  %5227 = vst [vmem:[#allocation12_spill] sm:$0xff] %v2898_v21  ;;  %1307 = vrot.lane.b32.xlu1 %v2895_v17, %s2847_s1  ;;  %1243 = vrot.lane.b32.xlu0 %v2898_v21, %s2847_s1  ;;  %v2567_v32 = vsel %vm173_vm5, 1.0, %v5189_v5  ;;  %vm176_vm6 = vcmp.gt.f32.partialorder %v112_v27, 0.0  ;;  %vm174_vm7 = vcmp.gt.f32.partialorder %v110_v29, 0.0  ;;  %v431_v33 = vadd.f32 %v2569_v30, %v367_v28  ;;  %v116_v51 = vld [vmem:[#allocation5 + $0x58] sm:$0xff]  ;;  %p2819_p3 = scmp.lt.s32.totalorder %s2551_s8, %s2551_s8 }
  0x2e   :  { %v2906_v26 = vmul.f32 %v427_v22, %v43_v19  ;;  %v368_v34 = vsub.f32 1.0, %v112_v27  ;;  %v429_v36 = vadd.f32 %v2567_v32, %v365_v31  ;;  %v2570_v37 = vsel %vm176_vm6, 1.0, %v5189_v5  ;;  %v114_v53 = vld [vmem:[#allocation5 + $0x48] sm:$0xff]  ;;  %v51_v59 = vld [vmem:[#allocation2 + $0x50] sm:$0xff]  ;;  %v49_v0 = vld [vmem:[#allocation2 + $0x40] sm:$0xff]  ;;  %s2814_s9 = scalar_lea.vmem %s2551_s8, 2048 }
  0x2f   :  { %v366_v38 = vsub.f32 1.0, %v110_v29  ;;  %v2568_v40 = vsel %vm174_vm7, 1.0, %v5189_v5  ;;  %v2922_v41 = vmul.f32 %v431_v33, %v47_v35  ;;  %vm179_vm8 = vcmp.gt.f32.partialorder %v115_v47, 0.0  ;;  %v119_v63 = vld [vmem:[#allocation5 + $0x70] sm:$0xff]  ;;  %v117_v2 = vld [vmem:[#allocation5 + $0x60] sm:$0xff]  ;;  %v120_v7 = vld [vmem:[#allocation5 + $0x78] sm:$0xff]  ;;  %p2815_p2 = scmp.ne.s32.totalorder %s2551_s8, %s2814_s9  ;;  %p2820_p4 = scmp.lt.s32.totalorder %s2814_s9, %s2814_s9 }
  0x30   :  { %v432_v42 = vadd.f32 %v2570_v37, %v368_v34  ;;  %v2926_v43 = vmul.f32 %v429_v36, %v45_v39  ;;  %vm177_vm9 = vcmp.gt.f32.partialorder %v113_v49, 0.0  ;;  %v371_v52 = vsub.f32 1.0, %v115_v47  ;;  %v52_v9 = vld [vmem:[#allocation2 + $0x58] sm:$0xff]  ;;  %v50_v11 = vld [vmem:[#allocation2 + $0x48] sm:$0xff]  ;;  %v2965_v20 = vld [vmem:[#allocation5 + $0x90] sm:$0xff] }
  0x31   :  { %1309 = vrot.lane.b32.xlu1 %v2902_v24, %s2847_s1  ;;  %1245 = vrot.lane.b32.xlu0 %v2906_v26, %s2847_s1  ;;  %v430_v45 = vadd.f32 %v2568_v40, %v366_v38  ;;  %v2573_v54 = vsel %vm179_vm8, 1.0, %v5189_v5  ;;  %v369_v55 = vsub.f32 1.0, %v113_v49  ;;  %v2571_v56 = vsel %vm177_vm9, 1.0, %v5189_v5  ;;  %v118_v13 = vld [vmem:[#allocation5 + $0x68] sm:$0xff]  ;;  %v55_v28 = vld [vmem:[#allocation2 + $0x70] sm:$0xff]  ;;  %v53_v31 = vld [vmem:[#allocation2 + $0x60] sm:$0xff]  ;;  %p2821_p5 = por %p2820_p4, %p2819_p3 }
  0x32   :  { %v2930_v48 = vmul.f32 %v432_v42, %v48_v44  ;;  %vm180_vm10 = vcmp.gt.f32.partialorder %v116_v51, 0.0  ;;  %vm178_vm11 = vcmp.gt.f32.partialorder %v114_v53, 0.0  ;;  %v435_v57 = vadd.f32 %v2573_v54, %v371_v52  ;;  %v2977_v33 = vld [vmem:[#allocation5 + $0x80] sm:$0xff]  ;;  %v56_v37 = vld [vmem:[#allocation2 + $0x78] sm:$0xff] }
  0x33   :  { %v2934_v50 = vmul.f32 %v430_v45, %v46_v46  ;;  %v372_v58 = vsub.f32 1.0, %v116_v51  ;;  %v433_v60 = vadd.f32 %v2571_v56, %v369_v55  ;;  %v2574_v61 = vsel %vm180_vm10, 1.0, %v5189_v5  ;;  %v168_v42 = vld [vmem:[#allocation5 + $0x1f8] sm:$0xff]  ;;  %v167_v56 = vld [vmem:[#allocation5 + $0x1f0] sm:$0xff]  ;;  %p2822_p6 = pnand %p2821_p5, %p2815_p2 }
  0x34   :  { %v370_v62 = vsub.f32 1.0, %v114_v53  ;;  %v2572_v1 = vsel %vm178_vm11, 1.0, %v5189_v5  ;;  %v553_v3 = vlaneseq  ;;  %v2950_v4 = vmul.f32 %v435_v57, %v51_v59  ;;  %v104_v59 = vld [vmem:[#allocation2 + $0x1f8] sm:$0xff] }
  0x35   :  { %1566 = vrot.lane.b32.xlu1 %v2906_v26, %s2848_s6  ;;  %1564 = vrot.lane.b32.xlu0 %v2898_v21, %s2848_s6  ;;  %v436_v6 = vadd.f32 %v2574_v61, %v372_v58  ;;  %vm183_vm12 = vcmp.gt.f32.partialorder %v119_v63, 0.0  ;;  %v2954_v8 = vmul.f32 %v433_v60, %v49_v0  ;;  %vm181_vm13 = vcmp.gt.f32.partialorder %v117_v2, 0.0  ;;  %v54_v61 = vld [vmem:[#allocation2 + $0x68] sm:$0xff] }
  0x36   :  { %v434_v10 = vadd.f32 %v2572_v1, %v370_v62  ;;  %v375_v12 = vsub.f32 1.0, %v119_v63  ;;  %v2957_v14 = vshrl.u32 %v553_v3, 7  ;;  %v2577_v15 = vsel %vm183_vm12, 1.0, %v5189_v5 }
  0x37   :  { %v373_v16 = vsub.f32 1.0, %v117_v2  ;;  %vm184_vm14 = vcmp.gt.f32.partialorder %v120_v7, 0.0  ;;  %v2962_v18 = vmul.f32 %v436_v6, %v52_v9  ;;  %v2575_v19 = vsel %vm181_vm13, 1.0, %v5189_v5 }
  0x38   :  { %v2969_v22 = vmul.f32 %v434_v10, %v50_v11  ;;  %v376_v23 = vsub.f32 1.0, %v120_v7  ;;  %vm182_vm15 = vcmp.gt.f32.partialorder %v118_v13, 0.0  ;;  %v439_v25 = vadd.f32 %v2577_v15, %v375_v12 }
  0x39   :  { %1630 = vrot.lane.b32.xlu1 %v2902_v24, %s2848_s6  ;;  %1628 = vrot.lane.b32.xlu0 %v2895_v17, %s2848_s6  ;;  %v2578_v27 = vsel %vm184_vm14, 1.0, %v5189_v5  ;;  %vm589_vm0 = vcmp.ne.s32.totalorder %v2957_v14, 0  ;;  %v437_v29 = vadd.f32 %v2575_v19, %v373_v16  ;;  %v374_v30 = vsub.f32 1.0, %v118_v13  ;;  %v103_v19 = vld [vmem:[#allocation2 + $0x1f0] sm:$0xff] }
  0x3a   :  { %vm187_vm1 = vcmp.gt.f32.partialorder %v2965_v20, 0.0  ;;  %v2576_v32 = vsel %vm182_vm15, 1.0, %v5189_v5  ;;  %v440_v34 = vadd.f32 %v2578_v27, %v376_v23  ;;  %vm5224_vm2 = vcmp.lt.s32.totalorder %v2957_v14, 1 }
  0x3b   :  { %vm5225_vm3 = vcmp.lt.s32.totalorder %v2957_v14, 7  ;;  %v2984_v35 = vsel %vm589_vm0, 1.0, %v5189_v5  ;;  %v2986_v36 = vmul.f32 %v439_v25, %v55_v28  ;;  %v2989_v38 = vsel %vm187_vm1, 1.0, %v5189_v5 }
  0x3c   :  { %v798_v39 = vrot.slane %v2934_v50, 7  ;;  %v800_v40 = vrot.slane %v2930_v48, 7  ;;  %v2993_v44 = vmul.f32 %v437_v29, %v53_v31  ;;  %v438_v45 = vadd.f32 %v2576_v32, %v374_v30 }
  0x3d   :  { %1249 = vrot.lane.b32.xlu1 %v2922_v41, %s2847_s1  ;;  %1247 = vrot.lane.b32.xlu0 %v2926_v43, %s2847_s1  ;;  %vm185_vm4 = vcmp.gt.f32.partialorder %v2977_v33, 0.0  ;;  %v993_v46 = vrot.slane %v2930_v48, 1  ;;  %v995_v49 = vrot.slane %v2969_v22, 1  ;;  %v796_v51 = vrot.slane %v2902_v24, 7 }
  0x3e   :  { %v915_v47 = vsel %vm5224_vm2, %v798_v39, %v800_v40  ;;  %v991_v52 = vrot.slane %v2934_v50, 1  ;;  %v3008_v53 = vmul.f32 %v440_v34, %v56_v37  ;;  %v379_v54 = vsub.f32 1.0, %v2965_v20  ;;  %v124_v20 = vld [vmem:[#allocation5 + $0x98] sm:$0xff] }
  0x3f   :  { %vm232_vm5 = vcmp.gt.f32.partialorder %v168_v42, 0.0  ;;  %v424_v55 = vsub.f32 1.0, %v168_v42  ;;  %v1106_v57 = vsel %vm5225_vm3, %v993_v46, %v995_v49  ;;  %v917_v58 = vsel %vm5224_vm2, %v796_v51, %v798_v39 }
  0x40   :  { %v2626_v60 = vsel %vm232_vm5, 1.0, %v5189_v5  ;;  %v2579_v62 = vsel %vm185_vm4, 1.0, %v5189_v5  ;;  %v3023_v63 = vadd.f32 %v1106_v57, %v915_v47  ;;  %v794_v2 = vrot.slane %v2895_v17, 7 }
  0x41   :  { %1313 = vrot.lane.b32.xlu1 %v2930_v48, %s2847_s1  ;;  %1311 = vrot.lane.b32.xlu0 %v2934_v50, %s2847_s1  ;;  %v488_v1 = vadd.f32 %v2626_v60, %v424_v55  ;;  %v5185_v6 = vrot.slane %v2895_v17, 1  ;;  %v989_v7 = vrot.slane %v2902_v24, 1  ;;  %vm231_vm6 = vcmp.gt.f32.partialorder %v167_v56, 0.0  ;;  %v73_v17 = vld [vmem:[#allocation2 + $0x100] sm:$0xff] }
  0x42   :  { %v377_v9 = vsub.f32 1.0, %v2977_v33  ;;  %v2625_v11 = vsel %vm231_vm6, 1.0, %v5189_v5  ;;  %v423_v12 = vsub.f32 1.0, %v167_v56  ;;  %v3038_v13 = vmul.f32 %v438_v45, %v54_v61  ;;  %v3084_v56 = vld [vmem:[#allocation5 + $0xb0] sm:$0xff] }
  0x43   :  { %v3035_v10 = vmul.f32 %v488_v1, %v104_v59  ;;  %v919_v15 = vsel %vm5224_vm2, %v794_v2, %v796_v51  ;;  %v1110_v16 = vsel %vm5225_vm3, %v989_v7, %v991_v52  ;;  %v1112_v24 = vsel %vm5225_vm3, %v5185_v6, %v989_v7  ;;  %v59_v61 = vld [vmem:[#allocation2 + $0x90] sm:$0xff] }
  0x44   :  { %v3049_v25 = vadd.f32 %v1110_v16, %v919_v15  ;;  %v487_v27 = vadd.f32 %v2625_v11, %v423_v12  ;;  %v793_v28 = vrot.slane %v2898_v21, 7  ;;  %v795_v29 = vrot.slane %v2906_v26, 7  ;;  %v57_v16 = vld [vmem:[#allocation2 + $0x80] sm:$0xff] }
  0x45   :  { %1570 = vrot.lane.b32.xlu1 %v2922_v41, %s2848_s6  ;;  %1568 = vrot.lane.b32.xlu0 %v2926_v43, %s2848_s6  ;;  %5228 = vst [vmem:[#allocation13_spill] sm:$0xff] %v3035_v10  ;;  %v5183_v23 = vrot.slane %v3035_v10, 7  ;;  %v5186_v30 = vrot.slane %v2898_v21, 1  ;;  %v988_v31 = vrot.slane %v2906_v26, 1  ;;  %v990_v32 = vrot.slane %v2926_v43, 1 }
  0x46   :  { %v3064_v34 = vmul.f32 %v487_v27, %v103_v19  ;;  %v797_v37 = vrot.slane %v2926_v43, 7  ;;  %v799_v39 = vrot.slane %v2922_v41, 7  ;;  %vm188_vm7 = vcmp.gt.f32.partialorder %v124_v20, 0.0 }
  0x47   :  { %v921_v33 = vsel %vm5224_vm2, %v5183_v23, %v794_v2  ;;  %v918_v26 = vsel %vm5224_vm2, %v793_v28, %v795_v29  ;;  %v1109_v45 = vsel %vm5225_vm3, %v988_v31, %v990_v32  ;;  %v443_v55 = vadd.f32 %v2989_v38, %v379_v54 }
  0x48   :  { %5229 = vst [vmem:[#allocation14_spill] sm:$0xff] %v3064_v34  ;;  %v923_v42 = vmul.f32 %v2984_v35, %v921_v33  ;;  %v5184_v47 = vrot.slane %v3064_v34, 7  ;;  %v3074_v51 = vadd.f32 %v1109_v45, %v918_v26  ;;  %v914_v43 = vsel %vm5224_vm2, %v797_v37, %v799_v39  ;;  %v128_v45 = vld [vmem:[#allocation5 + $0xb8] sm:$0xff] }
  0x49   :  { %1634 = vrot.lane.b32.xlu1 %v2930_v48, %s2848_s6  ;;  %1632 = vrot.lane.b32.xlu0 %v2934_v50, %s2848_s6  ;;  %v1108_v50 = vsel %vm5225_vm3, %v991_v52, %v993_v46  ;;  %v122_v46 = vld [vmem:[#allocation5 + $0x88] sm:$0xff]  ;;  %v992_v52 = vrot.slane %v2922_v41, 1  ;;  %v380_v59 = vsub.f32 1.0, %v124_v20  ;;  %v1111_v38 = vsel %vm5225_vm3, %v5186_v30, %v988_v31  ;;  %v125_v31 = vld [vmem:[#allocation5 + $0xa0] sm:$0xff] }
  0x4a   :  { %v3025_v0 = vadd.f32 %v1108_v50, %v917_v58  ;;  %v3086_v57 = vadd.f32 %v1112_v24, %v923_v42  ;;  %v994_v58 = vrot.slane %v2954_v8, 1  ;;  %v916_v50 = vsel %vm5224_vm2, %v795_v29, %v797_v37  ;;  %v58_v48 = vld [vmem:[#allocation2 + $0x88] sm:$0xff] }
  0x4b   :  { %v920_v60 = vsel %vm5224_vm2, %v5184_v47, %v793_v28  ;;  %v1107_v54 = vsel %vm5225_vm3, %v990_v32, %v992_v52  ;;  %vm186_vm8 = vcmp.gt.f32.partialorder %v122_v46, 0.0  ;;  %v441_v11 = vadd.f32 %v2579_v62, %v377_v9 }
  0x4c   :  { %v922_v1 = vmul.f32 %v2984_v35, %v920_v60  ;;  %v1105_v2 = vsel %vm5225_vm3, %v992_v52, %v994_v58  ;;  %v3106_v7 = vadd.f32 %v1107_v54, %v916_v50  ;;  %v2582_v12 = vsel %vm188_vm7, 1.0, %v5189_v5  ;;  %v126_v60 = vld [vmem:[#allocation5 + $0xa8] sm:$0xff] }
  0x4d   :  { %1253 = vrot.lane.b32.xlu1 %v2950_v4, %s2847_s1  ;;  %1251 = vrot.lane.b32.xlu0 %v2954_v8, %s2847_s1  ;;  %vm191_vm9 = vcmp.gt.f32.partialorder %v3084_v56, 0.0  ;;  %v3111_v15 = vadd.f32 %v1105_v2, %v914_v43  ;;  %v378_v24 = vsub.f32 1.0, %v122_v46  ;;  %v3119_v35 = vmul.f32 %v443_v55, %v59_v61  ;;  %v131_v61 = vld [vmem:[#allocation5 + $0xd0] sm:$0xff] }
  0x4e   :  { %v3115_v19 = vadd.f32 %v1111_v38, %v922_v1  ;;  %v2580_v62 = vsel %vm186_vm8, 1.0, %v5189_v5  ;;  %v444_v9 = vadd.f32 %v2582_v12, %v380_v59  ;;  %v2585_v20 = vsel %vm191_vm9, 1.0, %v5189_v5 }
  0x4f   :  { %v802_v27 = vrot.slane %v2969_v22, 7  ;;  %v804_v28 = vrot.slane %v2962_v18, 7  ;;  %v3125_v29 = vmul.f32 %v441_v11, %v57_v16  ;;  %v997_v32 = vrot.slane %v2962_v18, 1 }
  0x50   :  { %v999_v33 = vrot.slane %v3038_v13, 1  ;;  %v801_v37 = vrot.slane %v2954_v8, 7  ;;  %v442_v42 = vadd.f32 %v2580_v62, %v378_v24  ;;  %v383_v26 = vsub.f32 1.0, %v3084_v56 }
  0x51   :  { %1317 = vrot.lane.b32.xlu1 %v2962_v18, %s2847_s1  ;;  %1315 = vrot.lane.b32.xlu0 %v2969_v22, %s2847_s1  ;;  %v911_v46 = vsel %vm5224_vm2, %v802_v27, %v804_v28  ;;  %v913_v43 = vsel %vm5224_vm2, %v800_v40, %v802_v27  ;;  %v1104_v52 = vsel %vm5225_vm3, %v995_v49, %v997_v32  ;;  %v803_v55 = vrot.slane %v2950_v4, 7  ;;  %v129_v27 = vld [vmem:[#allocation5 + $0xc0] sm:$0xff] }
  0x52   :  { %v996_v56 = vrot.slane %v2950_v4, 1  ;;  %vm189_vm10 = vcmp.gt.f32.partialorder %v125_v31, 0.0  ;;  %v3151_v40 = vadd.f32 %v1104_v52, %v913_v43  ;;  %v998_v59 = vrot.slane %v2993_v44, 1  ;;  %v3195_v43 = vld [vmem:[#allocation5 + $0xd8] sm:$0xff] }
  0x53   :  { %vm192_vm11 = vcmp.gt.f32.partialorder %v128_v45, 0.0  ;;  %v912_v49 = vsel %vm5224_vm2, %v799_v39, %v801_v37  ;;  %v381_v54 = vsub.f32 1.0, %v125_v31  ;;  %v3172_v41 = vmul.f32 %v442_v42, %v58_v48  ;;  %v63_v48 = vld [vmem:[#allocation2 + $0xb0] sm:$0xff] }
  0x54   :  { %v1101_v1 = vsel %vm5225_vm3, %v996_v56, %v998_v59  ;;  %v2583_v39 = vsel %vm189_vm10, 1.0, %v5189_v5  ;;  %v2586_v12 = vsel %vm192_vm11, 1.0, %v5189_v5  ;;  %vm190_vm12 = vcmp.gt.f32.partialorder %v126_v60, 0.0 }
  0x55   :  { %1574 = vrot.lane.b32.xlu1 %v2950_v4, %s2848_s6  ;;  %1572 = vrot.lane.b32.xlu0 %v2954_v8, %s2848_s6  ;;  %v1102_v8 = vsel %vm5225_vm3, %v997_v32, %v999_v33  ;;  %v1103_v4 = vsel %vm5225_vm3, %v994_v58, %v996_v56  ;;  %v384_v58 = vsub.f32 1.0, %v128_v45  ;;  %vm195_vm13 = vcmp.gt.f32.partialorder %v131_v61, 0.0 }
  0x56   :  { %v3149_v50 = vadd.f32 %v1102_v8, %v911_v46  ;;  %v3168_v2 = vadd.f32 %v1103_v4, %v912_v49  ;;  %v806_v16 = vrot.slane %v3038_v13, 7  ;;  %v447_v24 = vadd.f32 %v2585_v20, %v383_v26 }
  0x57   :  { %v445_v62 = vadd.f32 %v2583_v39, %v381_v54  ;;  %v808_v31 = vrot.slane %v3008_v53, 7  ;;  %v448_v32 = vadd.f32 %v2586_v12, %v384_v58  ;;  %v1001_v42 = vrot.slane %v3008_v53, 1  ;;  %v130_v58 = vld [vmem:[#allocation5 + $0xc8] sm:$0xff] }
  0x58   :  { %v1003_v45 = vrot.slane %v3172_v41, 1  ;;  %v909_v26 = vsel %vm5224_vm2, %v804_v28, %v806_v16  ;;  %v805_v46 = vrot.slane %v2993_v44, 7  ;;  %vm193_vm14 = vcmp.gt.f32.partialorder %v129_v27, 0.0 }
  0x59   :  { %1638 = vrot.lane.b32.xlu1 %v2962_v18, %s2848_s6  ;;  %1636 = vrot.lane.b32.xlu0 %v2969_v22, %s2848_s6  ;;  %v60_v18 = vld [vmem:[#allocation2 + $0x98] sm:$0xff]  ;;  %v910_v22 = vsel %vm5224_vm2, %v801_v37, %v803_v55  ;;  %v2584_v37 = vsel %vm190_vm12, 1.0, %v5189_v5  ;;  %v907_v20 = vsel %vm5224_vm2, %v806_v16, %v808_v31  ;;  %v807_v8 = vrot.slane %v2986_v36, 7 }
  0x5a   :  { %v3164_v38 = vmul.f32 %v444_v9, %v60_v18  ;;  %v3176_v11 = vadd.f32 %v1101_v1, %v910_v22  ;;  %v382_v9 = vsub.f32 1.0, %v126_v60  ;;  %v1098_v18 = vsel %vm5225_vm3, %v1001_v42, %v1003_v45  ;;  %v61_v60 = vld [vmem:[#allocation2 + $0xa0] sm:$0xff]  ;;  %v64_v22 = vld [vmem:[#allocation2 + $0xb8] sm:$0xff]  ;;  %v62_v1 = vld [vmem:[#allocation2 + $0xa8] sm:$0xff] }
  0x5b   :  { %v3204_v52 = vadd.f32 %v1098_v18, %v907_v20  ;;  %v1002_v28 = vrot.slane %v3125_v29, 1  ;;  %v387_v49 = vsub.f32 1.0, %v131_v61  ;;  %v906_v4 = vsel %vm5224_vm2, %v805_v46, %v807_v8  ;;  %v135_v18 = vld [vmem:[#allocation5 + $0xf0] sm:$0xff] }
  0x5c   :  { %v908_v54 = vsel %vm5224_vm2, %v803_v55, %v805_v46  ;;  %v385_v39 = vsub.f32 1.0, %v129_v27  ;;  %vm196_vm15 = vcmp.gt.f32.partialorder %v3195_v43, 0.0  ;;  %v2587_v16 = vsel %vm193_vm14, 1.0, %v5189_v5 }
  0x5d   :  { %1257 = vrot.lane.b32.xlu1 %v2986_v36, %s2847_s1  ;;  %1255 = vrot.lane.b32.xlu0 %v2993_v44, %s2847_s1  ;;  %v3233_v55 = vmul.f32 %v447_v24, %v63_v48  ;;  %v3237_v20 = vmul.f32 %v448_v32, %v64_v22  ;;  %v2590_v46 = vsel %vm196_vm15, 1.0, %v5189_v5  ;;  %vm194_vm0 = vcmp.gt.f32.partialorder %v130_v58, 0.0 }
  0x5e   :  { %v388_v24 = vsub.f32 1.0, %v3195_v43  ;;  %v810_v32 = vrot.slane %v3172_v41, 7  ;;  %v1005_v48 = vrot.slane %v3164_v38, 1  ;;  %v809_v22 = vrot.slane %v3125_v29, 7 }
  0x5f   :  { %vm199_vm1 = vcmp.gt.f32.partialorder %v135_v18, 0.0 }
  0x60   :  { %v452_v23 = vadd.f32 %v2590_v46, %v388_v24  ;;  %v816_v46 = vrot.slane %v3237_v20, 7  ;;  %v1009_v24 = vrot.slane %v3237_v20, 1 }
  0x61   :  { %1321 = vrot.lane.b32.xlu1 %v3008_v53, %s2847_s1  ;;  %1319 = vrot.lane.b32.xlu0 %v3038_v13, %s2847_s1 }
  0x65   :  { %1578 = vrot.lane.b32.xlu1 %v2986_v36, %s2848_s6  ;;  %1576 = vrot.lane.b32.xlu0 %v2993_v44, %s2848_s6  ;;  %v1000_v44 = vrot.slane %v2986_v36, 1 }
  0x67   :  { %v1097_v12 = vsel %vm5225_vm3, %v1000_v44, %v1002_v28  ;;  %v1099_v61 = vsel %vm5225_vm3, %v998_v59, %v1000_v44  ;;  %v812_v44 = vrot.slane %v3164_v38, 7 }
  0x69   :  { %1642 = vrot.lane.b32.xlu1 %v3008_v53, %s2848_s6  ;;  %1640 = vrot.lane.b32.xlu0 %v3038_v13, %s2848_s6  ;;  %v2589_v13 = vsel %vm195_vm13, 1.0, %v5189_v5  ;;  %v1100_v53 = vsel %vm5225_vm3, %v999_v33, %v1001_v42  ;;  %v446_v33 = vadd.f32 %v2584_v37, %v382_v9  ;;  %v3227_v9 = vadd.f32 %v1097_v12, %v906_v4 }
  0x6a   :  { %v3206_v56 = vadd.f32 %v1100_v53, %v909_v26  ;;  %v3229_v37 = vadd.f32 %v1099_v61, %v908_v54  ;;  %v3235_v42 = vmul.f32 %v445_v62, %v61_v60  ;;  %v3240_v26 = vand.u32 127, %v553_v3  ;;  %v133_v62 = vld [vmem:[#allocation5 + $0xe0] sm:$0xff] }
  0x6b   :  { %v3244_v59 = vmul.f32 %v446_v33, %v62_v1  ;;  %v451_v27 = vadd.f32 %v2589_v13, %v387_v49  ;;  %v449_v53 = vadd.f32 %v2587_v16, %v385_v39  ;;  %v386_v3 = vsub.f32 1.0, %v130_v58  ;;  %v67_v58 = vld [vmem:[#allocation2 + $0xd0] sm:$0xff] }
  0x6c   :  { %v2588_v13 = vsel %vm194_vm0, 1.0, %v5189_v5  ;;  %v903_v43 = vsel %vm5224_vm2, %v810_v32, %v812_v44  ;;  %vm197_vm4 = vcmp.gt.f32.partialorder %v133_v62, 0.0  ;;  %v1096_v49 = vsel %vm5225_vm3, %v1003_v45, %v1005_v48 }
  0x6d   :  { %1261 = vrot.lane.b32.xlu1 %v3119_v35, %s2847_s1  ;;  %1259 = vrot.lane.b32.xlu0 %v3125_v29, %s2847_s1  ;;  %v1007_v60 = vrot.slane %v3244_v59, 1  ;;  %v811_v4 = vrot.slane %v3119_v35, 7  ;;  %v1004_v39 = vrot.slane %v3119_v35, 1  ;;  %v450_v12 = vadd.f32 %v2588_v13, %v386_v3 }
  0x6e   :  { %v391_v61 = vsub.f32 1.0, %v135_v18  ;;  %v904_v45 = vsel %vm5224_vm2, %v807_v8, %v809_v22  ;;  %v2593_v8 = vsel %vm199_vm1, 1.0, %v5189_v5  ;;  %vm781_vm6 = vcmp.ne.s32.totalorder %v3240_v26, 0 }
  0x6f   :  { %v1094_v33 = vsel %vm5225_vm3, %v1005_v48, %v1007_v60  ;;  %v902_v16 = vsel %vm5224_vm2, %v809_v22, %v811_v4  ;;  %v66_v48 = vld [vmem:[#allocation2 + $0xc8] sm:$0xff]  ;;  %v1095_v36 = vsel %vm5225_vm3, %v1002_v28, %v1004_v39  ;;  %v2591_v22 = vsel %vm197_vm4, 1.0, %v5189_v5 }
  0x70   :  { %v3267_v54 = vadd.f32 %v1094_v33, %v903_v43  ;;  %v389_v43 = vsub.f32 1.0, %v133_v62  ;;  %v3299_v33 = vadd.f32 %v1095_v36, %v904_v45  ;;  %v455_v62 = vadd.f32 %v2593_v8, %v391_v61  ;;  %v137_v45 = vld [vmem:[#allocation5 + $0x100] sm:$0xff]  ;;  %v3319_v61 = vld [vmem:[#allocation5 + $0x110] sm:$0xff]  ;;  %v3336_v8 = vld [vmem:[#allocation5 + $0x118] sm:$0xff] }
  0x71   :  { %1325 = vrot.lane.b32.xlu1 %v3164_v38, %s2847_s1  ;;  %1323 = vrot.lane.b32.xlu0 %v3172_v41, %s2847_s1  ;;  %vm201_vm8 = vcmp.gt.f32.partialorder %v137_v45, 0.0  ;;  %v5187_v36 = vrot.slane %v3233_v55, 7  ;;  %vm203_vm9 = vcmp.gt.f32.partialorder %v3319_v61, 0.0  ;;  %vm204_vm10 = vcmp.gt.f32.partialorder %v3336_v8, 0.0 }
  0x72   :  { %vm1371_vm0 = vcmp.lt.s32.totalorder %v3240_v26, 1 }
  0x75   :  { %1582 = vrot.lane.b32.xlu1 %v3119_v35, %s2848_s6  ;;  %1580 = vrot.lane.b32.xlu0 %v3125_v29, %s2848_s6 }
  0x79   :  { %1646 = vrot.lane.b32.xlu1 %v3164_v38, %s2848_s6  ;;  %1644 = vrot.lane.b32.xlu0 %v3172_v41, %s2848_s6  ;;  %v905_v41 = vsel %vm5224_vm2, %v808_v31, %v810_v32  ;;  %v136_v38 = vld [vmem:[#allocation5 + $0xf8] sm:$0xff]  ;;  %v1006_v31 = vrot.slane %v3235_v42, 1  ;;  %v65_v32 = vld [vmem:[#allocation2 + $0xc0] sm:$0xff] }
  0x7a   :  { %v3269_v1 = vadd.f32 %v1096_v49, %v905_v41  ;;  %vm200_vm5 = vcmp.gt.f32.partialorder %v136_v38, 0.0  ;;  %v134_v41 = vld [vmem:[#allocation5 + $0xe8] sm:$0xff]  ;;  %v3301_v49 = vmul.f32 %v451_v27, %v67_v58  ;;  %v392_v29 = vsub.f32 1.0, %v136_v38 }
  0x7b   :  { %v1093_v3 = vsel %vm5225_vm3, %v1004_v39, %v1006_v31  ;;  %v3304_v28 = vmul.f32 %v449_v53, %v65_v32  ;;  %v3306_v39 = vmul.f32 %v450_v12, %v66_v48  ;;  %v2594_v18 = vsel %vm200_vm5, 1.0, %v5189_v5 }
  0x7c   :  { %v3297_v13 = vadd.f32 %v1093_v3, %v902_v16  ;;  %vm198_vm7 = vcmp.gt.f32.partialorder %v134_v41, 0.0  ;;  %v453_v16 = vadd.f32 %v2591_v22, %v389_v43  ;;  %v814_v27 = vrot.slane %v3244_v59, 7 }
  0x7d   :  { %1265 = vrot.lane.b32.xlu1 %v3233_v55, %s2847_s1  ;;  %1263 = vrot.lane.b32.xlu0 %v3235_v42, %s2847_s1  ;;  %v390_v53 = vsub.f32 1.0, %v134_v41  ;;  %v1011_v38 = vrot.slane %v3306_v39, 1  ;;  %v813_v58 = vrot.slane %v3235_v42, 7  ;;  %v456_v12 = vadd.f32 %v2594_v18, %v392_v29 }
  0x7e   :  { %v2592_v32 = vsel %vm198_vm7, 1.0, %v5189_v5  ;;  %v899_v48 = vsel %vm5224_vm2, %v814_v27, %v816_v46  ;;  %v901_v43 = vsel %vm5224_vm2, %v812_v44, %v814_v27  ;;  %v1092_v3 = vsel %vm5225_vm3, %v1007_v60, %v1009_v24  ;;  %v68_v27 = vld [vmem:[#allocation2 + $0xd8] sm:$0xff]  ;;  %v71_v60 = vld [vmem:[#allocation2 + $0xf0] sm:$0xff] }
  0x7f   :  { %v1090_v41 = vsel %vm5225_vm3, %v1009_v24, %v1011_v38  ;;  %v3340_v29 = vadd.f32 %v1092_v3, %v901_v43  ;;  %v1008_v44 = vrot.slane %v3233_v55, 1  ;;  %v5188_v18 = vrot.slane %v3304_v28, 1  ;;  %v69_v24 = vld [vmem:[#allocation2 + $0xe0] sm:$0xff]  ;;  %v70_v3 = vld [vmem:[#allocation2 + $0xe8] sm:$0xff] }
  0x80   :  { %v3338_v22 = vadd.f32 %v1090_v41, %v899_v48  ;;  %v454_v47 = vadd.f32 %v2592_v32, %v390_v53  ;;  %v898_v48 = vsel %vm5224_vm2, %v813_v58, %v5187_v36  ;;  %v900_v43 = vsel %vm5224_vm2, %v811_v4, %v813_v58  ;;  %v72_v41 = vld [vmem:[#allocation2 + $0xf8] sm:$0xff]  ;;  %v138_v32 = vld [vmem:[#allocation5 + $0x108] sm:$0xff] }
  0x81   :  { %1329 = vrot.lane.b32.xlu1 %v3237_v20, %s2847_s1  ;;  %1327 = vrot.lane.b32.xlu0 %v3244_v59, %s2847_s1  ;;  %5231 = vst [vmem:[#allocation16_spill] sm:$0xff] %v3340_v29  ;;  %v393_v53 = vsub.f32 1.0, %v137_v45  ;;  %v1089_v6 = vsel %vm5225_vm3, %v1008_v44, %v5188_v18  ;;  %v1091_v35 = vsel %vm5225_vm3, %v1006_v31, %v1008_v44  ;;  %v2595_v4 = vsel %vm201_vm8, 1.0, %v5189_v5 }
  0x82   :  { %5230 = vst [vmem:[#allocation15_spill] sm:$0xff] %v3338_v22  ;;  %v3371_v58 = vadd.f32 %v1089_v6, %v898_v48  ;;  %v3373_v30 = vadd.f32 %v1091_v35, %v900_v43  ;;  %v3377_v36 = vmul.f32 %v452_v23, %v68_v27  ;;  %v3379_v18 = vmul.f32 %v455_v62, %v71_v60  ;;  %v143_v27 = vld [vmem:[#allocation5 + $0x130] sm:$0xff]  ;;  %v142_v35 = vld [vmem:[#allocation5 + $0x128] sm:$0xff] }
  0x83   :  { %v2597_v31 = vsel %vm203_vm9, 1.0, %v5189_v5  ;;  %v3388_v6 = vmul.f32 %v456_v12, %v72_v41  ;;  %v3390_v45 = vmul.f32 %v454_v47, %v70_v3  ;;  %v395_v44 = vsub.f32 1.0, %v3319_v61 }
  0x84   :  { %5232 = vst [vmem:[#allocation17_spill] sm:$0xff] %v3373_v30  ;;  %vm202_vm11 = vcmp.gt.f32.partialorder %v138_v32, 0.0  ;;  %v457_v23 = vadd.f32 %v2595_v4, %v393_v53  ;;  %v2598_v62 = vsel %vm204_vm10, 1.0, %v5189_v5  ;;  %v820_v60 = vrot.slane %v3377_v36, 7  ;;  %v141_v53 = vld [vmem:[#allocation5 + $0x120] sm:$0xff] }
  0x85   :  { %1586 = vrot.lane.b32.xlu1 %v3233_v55, %s2848_s6  ;;  %1584 = vrot.lane.b32.xlu0 %v3235_v42, %s2848_s6  ;;  %v3381_v42 = vmul.f32 %v453_v16, %v69_v24  ;;  %v818_v16 = vrot.slane %v3306_v39, 7  ;;  %v394_v24 = vsub.f32 1.0, %v138_v32  ;;  %v1013_v48 = vrot.slane %v3377_v36, 1 }
  0x86   :  { %v5193_v43 = vrot.slane %v3390_v45, 1  ;;  %v817_v12 = vrot.slane %v3304_v28, 7  ;;  %v396_v47 = vsub.f32 1.0, %v3336_v8  ;;  %v2596_v61 = vsel %vm202_vm11, 1.0, %v5189_v5 }
  0x87   :  { %v895_v41 = vsel %vm5224_vm2, %v818_v16, %v820_v60  ;;  %v897_v3 = vsel %vm5224_vm2, %v816_v46, %v818_v16  ;;  %vm207_vm12 = vcmp.gt.f32.partialorder %v143_v27, 0.0  ;;  %v1088_v32 = vsel %vm5225_vm3, %v1011_v38, %v1013_v48 }
  0x88   :  { %v1086_v8 = vsel %vm5225_vm3, %v1013_v48, %v5193_v43  ;;  %v3422_v46 = vadd.f32 %v1088_v32, %v897_v3  ;;  %v1012_v16 = vrot.slane %v3301_v49, 1  ;;  %v458_v21 = vadd.f32 %v2596_v61, %v394_v24  ;;  %v74_v3 = vld [vmem:[#allocation2 + $0x108] sm:$0xff] }
  0x89   :  { %1650 = vrot.lane.b32.xlu1 %v3237_v20, %s2848_s6  ;;  %1648 = vrot.lane.b32.xlu0 %v3244_v59, %s2848_s6  ;;  %v3358_v59 = vsel %vm781_vm6, 1.0, %v5189_v5  ;;  %v5194_v20 = vrot.slane %v3301_v49, 7  ;;  %v3420_v4 = vadd.f32 %v1086_v8, %v895_v41  ;;  %v5199_v5 = vrot.slane %v3381_v42, 1 }
  0x8a   :  { %5234 = vst [vmem:[#allocation19_spill] sm:$0xff] %v3422_v46  ;;  %v3427_v43 = vadd.s32 128, %v3240_v26  ;;  %v5236_v48 = vrot.slane %v3233_v55, 7  ;;  %v399_v8 = vsub.f32 1.0, %v143_v27  ;;  %vm205_vm13 = vcmp.gt.f32.partialorder %v141_v53, 0.0 }
  0x8b   :  { %5233 = vst [vmem:[#allocation18_spill] sm:$0xff] %v3420_v4  ;;  %v894_v38 = vsel %vm5224_vm2, %v817_v12, %v5194_v20  ;;  %v1085_v24 = vsel %vm5225_vm3, %v1012_v16, %v5199_v5  ;;  %v5237_v61 = vrot.slane %v3304_v28, 1  ;;  %v5238_v55 = vmov 0.0   ;;  %v144_v4 = vld [vmem:[#allocation5 + $0x138] sm:$0xff] }
  0x8c   :  { %5235 = vst [vmem:[#allocation20_spill] sm:$0xff] %v3427_v43  ;;  %v896_v41 = vsel %vm5224_vm2, %v5236_v48, %v817_v12  ;;  %v2601_v12 = vsel %vm207_vm12, 1.0, %v5238_v55  ;;  %vm206_vm14 = vcmp.gt.f32.partialorder %v142_v35, 0.0  ;;  %v3451_v48 = vadd.f32 %v1085_v24, %v894_v38 }
  0x8d   :  { %1269 = vrot.lane.b32.xlu1 %v3301_v49, %s2847_s1  ;;  %1267 = vrot.lane.b32.xlu0 %v3304_v28, %s2847_s1  ;;  %v1087_v32 = vsel %vm5225_vm3, %v5237_v61, %v1012_v16  ;;  %v459_v34 = vadd.f32 %v2597_v31, %v395_v44  ;;  %v3455_v10 = vmul.f32 %v457_v23, %v73_v17  ;;  %v397_v46 = vsub.f32 1.0, %v141_v53 }
  0x8e   :  { %5239 = vst [vmem:[#allocation21_spill] sm:$0xff] %v3451_v48  ;;  %v3453_v20 = vadd.f32 %v1087_v32, %v896_v41  ;;  %v460_v5 = vadd.f32 %v2598_v62, %v396_v47  ;;  %v3457_v29 = vmul.f32 %v458_v21, %v74_v3  ;;  %vm788_vm15 = vcmp.ne.s32.totalorder %v3427_v43, 255  ;;  %v76_v41 = vld [vmem:[#allocation2 + $0x118] sm:$0xff]  ;;  %v3476_v3 = vld [vmem:[#allocation5 + $0x150] sm:$0xff] }
  0x8f   :  { %v398_v16 = vsub.f32 1.0, %v142_v35  ;;  %v463_v27 = vadd.f32 %v2601_v12, %v399_v8  ;;  %v2600_v38 = vsel %vm206_vm14, 1.0, %v5238_v55  ;;  %v822_v31 = vrot.slane %v3390_v45, 7  ;;  %v3544_v43 = vld [vmem:[#allocation5 + $0x158] sm:$0xff] }
  0x90   :  { %5240 = vst [vmem:[#allocation22_spill] sm:$0xff] %v3453_v20  ;;  %v824_v17 = vrot.slane %v3388_v6, 7  ;;  %vm208_vm1 = vcmp.gt.f32.partialorder %v144_v4, 0.0  ;;  %v1017_v21 = vrot.slane %v3388_v6, 1  ;;  %v5200_v44 = vrot.slane %v3457_v29, 1 }
  0x91   :  { %1333 = vrot.lane.b32.xlu1 %v3377_v36, %s2847_s1  ;;  %1331 = vrot.lane.b32.xlu0 %v3306_v39, %s2847_s1  ;;  %v821_v23 = vrot.slane %v3381_v42, 7  ;;  %v400_v47 = vsub.f32 1.0, %v144_v4  ;;  %v893_v35 = vsel %vm5224_vm2, %v820_v60, %v822_v31  ;;  %v5241_v24 = vrot.slane %v3390_v45, 1  ;;  %v79_v60 = vld [vmem:[#allocation2 + $0x130] sm:$0xff] }
  0x92   :  { %v891_v53 = vsel %vm5224_vm2, %v822_v31, %v824_v17  ;;  %v1082_v8 = vsel %vm5225_vm3, %v1017_v21, %v5200_v44  ;;  %v5201_v61 = vrot.slane %v3379_v18, 7  ;;  %v77_v31 = vld [vmem:[#allocation2 + $0x120] sm:$0xff]  ;;  %v3511_v44 = vmul.f32 %v460_v5, %v76_v41 }
  0x93   :  { %v3489_v32 = vadd.f32 %v1082_v8, %v891_v53  ;;  %vm211_vm4 = vcmp.gt.f32.partialorder %v3476_v3, 0.0  ;;  %v3527_v5 = vsel %vm788_vm15, 1.0, %v5238_v55  ;;  %vm1692_vm5 = vcmp.lt.s32.totalorder %v3240_v26, 127 }
  0x94   :  { %v890_v53 = vsel %vm5224_vm2, %v821_v23, %v5201_v61  ;;  %vm212_vm7 = vcmp.gt.f32.partialorder %v3544_v43, 0.0 }
  0x95   :  { %1590 = vrot.lane.b32.xlu1 %v3301_v49, %s2848_s6  ;;  %1588 = vrot.lane.b32.xlu0 %v3304_v28, %s2848_s6  ;;  %v2599_v28 = vsel %vm205_vm13, 1.0, %v5238_v55  ;;  %5242 = vst [vmem:[#allocation23_spill] sm:$0xff] %v3489_v32 }
  0x96   :  { %v461_v62 = vadd.f32 %v2599_v28, %v397_v46  ;;  %v1084_v46 = vsel %vm5225_vm3, %v5241_v24, %v1017_v21  ;;  %v1016_v28 = vrot.slane %v3379_v18, 1  ;;  %v2602_v21 = vsel %vm208_vm1, 1.0, %v5238_v55  ;;  %v78_v24 = vld [vmem:[#allocation2 + $0x128] sm:$0xff] }
  0x97   :  { %v3491_v12 = vadd.f32 %v1084_v46, %v893_v35  ;;  %v5244_v35 = vrot.slane %v3301_v49, 7 }
  0x99   :  { %1654 = vrot.lane.b32.xlu1 %v3377_v36, %s2848_s6  ;;  %1652 = vrot.lane.b32.xlu0 %v3306_v39, %s2848_s6  ;;  %v75_v36 = vld [vmem:[#allocation2 + $0x110] sm:$0xff]  ;;  %v462_v39 = vadd.f32 %v2600_v38, %v398_v16  ;;  %5243 = vst [vmem:[#allocation24_spill] sm:$0xff] %v3491_v12  ;;  %v5202_v16 = vrot.slane %v3455_v10, 1  ;;  %v892_v8 = vsel %vm5224_vm2, %v5244_v35, %v821_v23 }
  0x9a   :  { %v3497_v38 = vmul.f32 %v459_v34, %v75_v36  ;;  %v3514_v34 = vld [vmem:[#allocation5 + $0x140] sm:$0xff]  ;;  %v5245_v36 = vrot.slane %v3381_v42, 1  ;;  %v3529_v23 = vmul.f32 %v463_v27, %v79_v60  ;;  %v826_v27 = vrot.slane %v3457_v29, 7 }
  0x9b   :  { %v1081_v4 = vsel %vm5225_vm3, %v1016_v28, %v5202_v16  ;;  %v3538_v16 = vmul.f32 %v461_v62, %v77_v31  ;;  %v2605_v60 = vsel %vm211_vm4, 1.0, %v5238_v55  ;;  %vm209_vm6 = vcmp.gt.f32.partialorder %v3514_v34, 0.0  ;;  %v146_v62 = vld [vmem:[#allocation5 + $0x148] sm:$0xff] }
  0x9c   :  { %v1083_v49 = vsel %vm5225_vm3, %v5245_v36, %v1016_v28  ;;  %v3531_v41 = vadd.f32 %v1081_v4, %v890_v53  ;;  %v3540_v28 = vadd.f32 %v2602_v21, %v400_v47  ;;  %v3542_v36 = vmul.f32 %v462_v39, %v78_v24 }
  0x9d   :  { %1273 = vrot.lane.b32.xlu1 %v3379_v18, %s2847_s1  ;;  %1271 = vrot.lane.b32.xlu0 %v3381_v42, %s2847_s1  ;;  %v3533_v35 = vadd.f32 %v1083_v49, %v892_v8  ;;  %v403_v53 = vsub.f32 1.0, %v3476_v3  ;;  %v5205_v47 = vrot.slane %v3511_v44, 7  ;;  %v401_v31 = vsub.f32 1.0, %v3514_v34 }
  0x9e   :  { %5246 = vst [vmem:[#allocation25_spill] sm:$0xff] %v3531_v41  ;;  %v1021_v21 = vrot.slane %v3511_v44, 1  ;;  %v889_v8 = vsel %vm5224_vm2, %v824_v17, %v826_v27  ;;  %v825_v49 = vrot.slane %v3455_v10, 7  ;;  %vm210_vm8 = vcmp.gt.f32.partialorder %v146_v62, 0.0 }
  0x9f   :  { %v3509_v46 = vpop.permute.xlu1 %1307  ;;  %v1244_v61 = vpop.permute.xlu0 %1243  ;;  %5247 = vst [vmem:[#allocation26_spill] sm:$0xff] %v3533_v35  ;;  %v887_v3 = vsel %vm5224_vm2, %v826_v27, %v5205_v47  ;;  %v5248_v17 = vrot.slane %v3542_v36, 1  ;;  %v402_v12 = vsub.f32 1.0, %v146_v62  ;;  %v5249_v41 = vrot.slane %v3457_v29, 1 }
  0xa0   :  { %v1404_v35 = vsel %vm1371_vm0, %v3509_v46, %v1244_v61  ;;  %v5251_v22 = vrot.slane %v3497_v38, 7 }
  0xa1   :  { %1337 = vrot.lane.b32.xlu1 %v3388_v6, %s2847_s1  ;;  %1335 = vrot.lane.b32.xlu0 %v3390_v45, %s2847_s1  ;;  %v1078_v27 = vsel %vm5225_vm3, %v1021_v21, %v5248_v17  ;;  %v1080_v20 = vsel %vm5225_vm3, %v5249_v41, %v1021_v21  ;;  %v1436_v62 = vmul.f32 %v3358_v59, %v1404_v35  ;;  %v2604_v41 = vsel %vm210_vm8, 1.0, %v5238_v55 }
  0xa2   :  { %v3581_v32 = vadd.f32 %v1078_v27, %v887_v3  ;;  %v3587_v30 = vadd.f32 %v1080_v20, %v889_v8  ;;  %v886_v17 = vsel %vm5224_vm2, %v825_v49, %v5251_v22  ;;  %v2603_v27 = vsel %vm209_vm6, 1.0, %v5238_v55 }
  0xa3   :  { %v1310_v39 = vpop.permute.xlu1 %1309  ;;  %v1246_v4 = vpop.permute.xlu0 %1245  ;;  %v5252_v20 = vrot.slane %v3379_v18, 7  ;;  %v467_v8 = vadd.f32 %v2605_v60, %v403_v53  ;;  %v5253_v35 = vrot.slane %v3455_v10, 1 }
  0xa4   :  { %v1405_v24 = vsel %vm1371_vm0, %v1310_v39, %v1246_v4  ;;  %5250 = vst [vmem:[#allocation27_spill] sm:$0xff] %v3587_v30  ;;  %v1373_v22 = vsel %vm1371_vm0, %v1246_v4, %v1310_v39  ;;  %v2606_v39 = vsel %vm212_vm7, 1.0, %v5238_v55  ;;  %v1372_v4 = vsel %vm1371_vm0, %v1244_v61, %v3509_v46 }
  0xa5   :  { %1594 = vrot.lane.b32.xlu1 %v3379_v18, %s2848_s6  ;;  %v1438_v47 = vmul.f32 %v3358_v59, %v1405_v24  ;;  %1592 = vrot.lane.b32.xlu0 %v3381_v42, %s2848_s6  ;;  %v1020_v24 = vrot.slane %v3497_v38, 1  ;;  %v5206_v42 = vrot.slane %v3538_v16, 1  ;;  %v888_v21 = vsel %vm5224_vm2, %v5252_v20, %v825_v49  ;;  %v80_v20 = vld [vmem:[#allocation2 + $0x138] sm:$0xff] }
  0xa7   :  { %v1567_v48 = vpop.permute.xlu1 %1566  ;;  %v1565_v3 = vpop.permute.xlu0 %1564  ;;  %v1077_v34 = vsel %vm5225_vm3, %v1020_v24, %v5206_v42  ;;  %v1079_v18 = vsel %vm5225_vm3, %v5253_v35, %v1020_v24  ;;  %v1502_v24 = vadd.f32 %v1438_v47, %v3074_v51  ;;  %v465_v35 = vadd.f32 %v2603_v27, %v401_v31  ;;  %v81_v47 = vld [vmem:[#allocation2 + $0x140] sm:$0xff] }
  0xa8   :  { %v3622_v60 = vadd.f32 %v1077_v34, %v886_v17  ;;  %v3624_v53 = vadd.f32 %v1079_v18, %v888_v21  ;;  %v1503_v21 = vadd.f32 %v1373_v22, %v3049_v25  ;;  %v1500_v34 = vadd.f32 %v1436_v62, %v3115_v19  ;;  %v83_v18 = vld [vmem:[#allocation2 + $0x150] sm:$0xff] }
  0xa9   :  { %1658 = vrot.lane.b32.xlu1 %v3388_v6, %s2848_s6  ;;  %1656 = vrot.lane.b32.xlu0 %v3390_v45, %s2848_s6  ;;  %v404_v6 = vsub.f32 1.0, %v3544_v43  ;;  %v466_v45 = vadd.f32 %v2604_v41, %v402_v12  ;;  %v1501_v25 = vadd.f32 %v1372_v4, %v3086_v57  ;;  %v3648_v62 = vmul.f32 %v3540_v28, %v80_v20 }
  0xaa   :  { %v3650_v22 = vmul.f32 %v467_v8, %v83_v18  ;;  %v3656_v30 = vmul.f32 %v465_v35, %v81_v47  ;;  %v830_v4 = vrot.slane %v3542_v36, 7  ;;  %v3668_v35 = vld [vmem:[#allocation5 + $0x160] sm:$0xff]  ;;  %v5255_v47 = vrot.slane %v3542_v36, 1 }
  0xab   :  { %v1631_v49 = vpop.permute.xlu1 %1630  ;;  %v1629_v17 = vpop.permute.xlu0 %1628  ;;  %v5208_v8 = vrot.slane %v3648_v62, 7  ;;  %vm213_vm10 = vcmp.gt.f32.partialorder %v3668_v35, 0.0 }
  0xac   :  { %v1694_v42 = vsel %vm1692_vm5, %v1567_v48, %v1631_v49  ;;  %v1726_v43 = vsel %vm1692_vm5, %v1631_v49, %v1567_v48  ;;  %v1693_v61 = vsel %vm1692_vm5, %v1565_v3, %v1629_v17  ;;  %v1725_v51 = vsel %vm1692_vm5, %v1629_v17, %v1565_v3  ;;  %v82_v48 = vld [vmem:[#allocation2 + $0x148] sm:$0xff] }
  0xad   :  { %1277 = vrot.lane.b32.xlu1 %v3497_v38, %s2847_s1  ;;  %v1760_v12 = vmul.f32 %v3527_v5, %v1726_v43  ;;  %v1823_v46 = vadd.f32 %v1694_v42, %v1502_v24  ;;  %1275 = vrot.lane.b32.xlu0 %v3455_v10, %s2847_s1  ;;  %v1758_v19 = vmul.f32 %v3527_v5, %v1725_v51  ;;  %v3654_v42 = vld [vmem:[#allocation5 + $0x170] sm:$0xff] }
  0xae   :  { %v1821_v31 = vadd.f32 %v1693_v61, %v1500_v34  ;;  %v3652_v49 = vadd.f32 %v2606_v39, %v404_v6  ;;  %v3658_v57 = vmul.f32 %v466_v45, %v82_v48  ;;  %v1025_v39 = vrot.slane %v3648_v62, 1  ;;  %v150_v45 = vld [vmem:[#allocation5 + $0x168] sm:$0xff]  ;;  %v3672_v61 = vld [vmem:[#allocation5 + $0x178] sm:$0xff] }
  0xaf   :  { %v1250_v3 = vpop.permute.xlu1 %1249  ;;  %v1824_v27 = vadd.f32 %v1760_v12, %v1503_v21  ;;  %v1887_v41 = vmul.f32 0.25, %v1823_v46  ;;  %v1248_v24 = vpop.permute.xlu0 %1247  ;;  %v1822_v43 = vadd.f32 %v1758_v19, %v1501_v25  ;;  %vm215_vm9 = vcmp.gt.f32.partialorder %v3654_v42, 0.0 }
  0xb0   :  { %v1885_v17 = vmul.f32 0.25, %v1821_v31  ;;  %v5207_v21 = vrot.slane %v3658_v57, 1  ;;  %v883_v51 = vsel %vm5224_vm2, %v830_v4, %v5208_v8  ;;  %v5254_v12 = vrot.slane %v3511_v44, 7 }
  0xb1   :  { %1341 = vrot.lane.b32.xlu1 %v3511_v44, %s2847_s1  ;;  %v1888_v28 = vmul.f32 0.25, %v1824_v27  ;;  %1339 = vrot.lane.b32.xlu0 %v3457_v29, %s2847_s1  ;;  %v1886_v6 = vmul.f32 0.25, %v1822_v43  ;;  %v1076_v48 = vsel %vm5225_vm3, %v5255_v47, %v1025_v39  ;;  %vm214_vm11 = vcmp.gt.f32.partialorder %v150_v45, 0.0 }
  0xb2   :  { %v2271_v20 = vpack.c.bf16 %v1887_v41, %v1885_v17  ;;  %v885_v46 = vsel %vm5224_vm2, %v5254_v12, %v830_v4  ;;  %v1074_v27 = vsel %vm5225_vm3, %v1025_v39, %v5207_v21  ;;  %v829_v41 = vrot.slane %v3538_v16, 7 }
  0xb3   :  { %v1314_v34 = vpop.permute.xlu1 %1313  ;;  %v1312_v19 = vpop.permute.xlu0 %1311  ;;  %v2272_v31 = vpack.c.bf16 %v1888_v28, %v1886_v6  ;;  %v2609_v17 = vsel %vm215_vm9, 1.0, %v5238_v55  ;;  %vm216_vm12 = vcmp.gt.f32.partialorder %v3672_v61, 0.0  ;;  %v406_v28 = vsub.f32 1.0, %v150_v45 }
  0xb4   :  { %v1407_v25 = vsel %vm1371_vm0, %v1314_v34, %v1250_v3  ;;  %v1406_v43 = vsel %vm1371_vm0, %v1312_v19, %v1248_v24  ;;  %v3704_v4 = vadd.f32 %v1074_v27, %v883_v51  ;;  %v831_v39 = vrot.slane %v3529_v23, 7 }
  0xb5   :  { %1598 = vrot.lane.b32.xlu1 %v3497_v38, %s2848_s6  ;;  %1596 = vrot.lane.b32.xlu0 %v3455_v10, %s2848_s6  ;;  %v1442_v6 = vmul.f32 %v3358_v59, %v1407_v25  ;;  %v3708_v47 = vadd.f32 %v1076_v48, %v885_v46  ;;  %v1024_v21 = vrot.slane %v3529_v23, 1  ;;  %v5209_v8 = vrot.slane %v3656_v30, 1 }
  0xb6   :  { %2303 = vmatprep.subr.bf16.mxu0 %v2272_v31  ;;  %v1440_v10 = vmul.f32 %v3358_v59, %v1406_v43  ;;  %v2608_v18 = vsel %vm214_vm11, 1.0, %v5238_v55  ;;  %v882_v45 = vsel %vm5224_vm2, %v829_v41, %v831_v39  ;;  %v5256_v51 = vrot.slane %v3497_v38, 7 }
  0xb7   :  { %2304 = vmatpush1.bf16.msra.mxu0 %v2271_v20  ;;  %v1571_v12 = vpop.permute.xlu1 %1570  ;;  %v1569_v31 = vpop.permute.xlu0 %1568  ;;  %v1375_v46 = vsel %vm1371_vm0, %v1250_v3, %v1314_v34  ;;  %v2607_v48 = vsel %vm213_vm10, 1.0, %v5238_v55  ;;  %v1073_v25 = vsel %vm5225_vm3, %v1024_v21, %v5209_v8  ;;  %v5257_v38 = vrot.slane %v3538_v16, 1 }
  0xb8   :  { %v884_v20 = vsel %vm5224_vm2, %v5256_v51, %v829_v41  ;;  %v405_v3 = vsub.f32 1.0, %v3668_v35  ;;  %v3741_v34 = vadd.f32 %v1073_v25, %v882_v45  ;;  %v1374_v43 = vsel %vm1371_vm0, %v1248_v24, %v1312_v19  ;;  %v84_v24 = vld [vmem:[#allocation2 + $0x158] sm:$0xff] }
  0xb9   :  { %1662 = vrot.lane.b32.xlu1 %v3511_v44, %s2848_s6  ;;  %v1075_v27 = vsel %vm5225_vm3, %v5257_v38, %v1024_v21  ;;  %1660 = vrot.lane.b32.xlu0 %v3457_v29, %s2848_s6  ;;  %v408_v44 = vsub.f32 1.0, %v3672_v61  ;;  %v1506_v51 = vadd.f32 %v1442_v6, %v3111_v15  ;;  %v2610_v21 = vsel %vm216_vm12, 1.0, %v5238_v55 }
  0xba   :  { %v3743_v41 = vadd.f32 %v1075_v27, %v884_v20  ;;  %v470_v38 = vadd.f32 %v2608_v18, %v406_v28  ;;  %v1507_v29 = vadd.f32 %v1375_v46, %v3023_v63  ;;  %v1504_v20 = vadd.f32 %v1440_v10, %v3106_v7  ;;  %v86_v63 = vld [vmem:[#allocation2 + $0x168] sm:$0xff] }
  0xbb   :  { %v1635_v8 = vpop.permute.xlu1 %1634  ;;  %v1633_v25 = vpop.permute.xlu0 %1632  ;;  %v1505_v28 = vadd.f32 %v1374_v43, %v3025_v0  ;;  %v5258_v6 = vsub.f32 1.0, %v3654_v42  ;;  %v85_v43 = vld [vmem:[#allocation2 + $0x160] sm:$0xff] }
  0xbc   :  { %v1696_v35 = vsel %vm1692_vm5, %v1571_v12, %v1635_v8  ;;  %v1728_v45 = vsel %vm1692_vm5, %v1635_v8, %v1571_v12  ;;  %v1695_v61 = vsel %vm1692_vm5, %v1569_v31, %v1633_v25  ;;  %v1727_v18 = vsel %vm1692_vm5, %v1633_v25, %v1569_v31 }
  0xbd   :  { %v1764_v15 = vmul.f32 %v3527_v5, %v1728_v45  ;;  %v1827_v19 = vadd.f32 %v1696_v35, %v1506_v51  ;;  %1281 = vrot.lane.b32.xlu1 %v3529_v23, %s2847_s1  ;;  %v1762_v8 = vmul.f32 %v3527_v5, %v1727_v18  ;;  %v1825_v7 = vadd.f32 %v1695_v61, %v1504_v20  ;;  %v87_v51 = vld [vmem:[#allocation2 + $0x170] sm:$0xff] }
  0xbe   :  { %1279 = vrot.lane.b32.xlu0 %v3538_v16, %s2847_s1  ;;  %v471_v12 = vadd.f32 %v2609_v17, %v5258_v6  ;;  %v3771_v31 = vmul.f32 %v3652_v49, %v84_v24  ;;  %v469_v35 = vadd.f32 %v2607_v48, %v405_v3  ;;  %v472_v20 = vadd.f32 %v2610_v21, %v408_v44  ;;  %v88_v44 = vld [vmem:[#allocation2 + $0x178] sm:$0xff]  ;;  %v3786_v21 = vld [vmem:[#allocation5 + $0x190] sm:$0xff] }
  0xbf   :  { %v1891_v10 = vmul.f32 0.25, %v1827_v19  ;;  %v1254_v46 = vpop.permute.xlu1 %1253  ;;  %v1828_v27 = vadd.f32 %v1764_v15, %v1507_v29  ;;  %v1889_v45 = vmul.f32 0.25, %v1825_v7  ;;  %v3773_v25 = vpop.permute.xlu0 %1251  ;;  %v1826_v0 = vadd.f32 %v1762_v8, %v1505_v28 }
  0xc0   :  { %v3775_v61 = vmul.f32 %v470_v38, %v86_v63  ;;  %v834_v17 = vrot.slane %v3658_v57, 7  ;;  %v836_v29 = vrot.slane %v3771_v31, 7  ;;  %v1029_v49 = vrot.slane %v3771_v31, 1  ;;  %v154_v38 = vld [vmem:[#allocation5 + $0x188] sm:$0xff]  ;;  %v3791_v63 = vld [vmem:[#allocation5 + $0x180] sm:$0xff] }
  0xc1   :  { %1345 = vrot.lane.b32.xlu1 %v3648_v62, %s2847_s1  ;;  %v1892_v42 = vmul.f32 0.25, %v1828_v27  ;;  %v1890_v48 = vmul.f32 0.25, %v1826_v0  ;;  %v2273_v3 = vpack.c.bf16 %v1891_v10, %v1889_v45  ;;  %v3784_v24 = vmul.f32 %v471_v12, %v87_v51 }
  0xc2   :  { %1343 = vrot.lane.b32.xlu0 %v3542_v36, %s2847_s1  ;;  %v5210_v15 = vrot.slane %v3775_v61, 1  ;;  %v3789_v18 = vmul.f32 %v469_v35, %v85_v43  ;;  %v879_v28 = vsel %vm5224_vm2, %v834_v17, %v836_v29  ;;  %v5259_v8 = vrot.slane %v3648_v62, 7 }
  0xc3   :  { %v1318_v19 = vpop.permute.xlu1 %1317  ;;  %v5260_v6 = vrot.slane %v3658_v57, 1  ;;  %v1316_v27 = vpop.permute.xlu0 %1315  ;;  %v2274_v51 = vpack.c.bf16 %v1892_v42, %v1890_v48  ;;  %v833_v45 = vrot.slane %v3656_v30, 7  ;;  %v3817_v43 = vmul.f32 %v472_v20, %v88_v44 }
  0xc4   :  { %v881_v7 = vsel %vm5224_vm2, %v5259_v8, %v834_v17  ;;  %v1409_v10 = vsel %vm1371_vm0, %v1318_v19, %v1254_v46  ;;  %v1070_v35 = vsel %vm5225_vm3, %v1029_v49, %v5210_v15  ;;  %v1408_v0 = vsel %vm1371_vm0, %v1316_v27, %v3773_v25  ;;  %v156_v15 = vld [vmem:[#allocation5 + $0x198] sm:$0xff] }
  0xc5   :  { %v1072_v12 = vsel %vm5225_vm3, %v5260_v6, %v1029_v49  ;;  %1602 = vrot.lane.b32.xlu1 %v3529_v23, %s2848_s6  ;;  %vm219_vm13 = vcmp.gt.f32.partialorder %v3786_v21, 0.0  ;;  %vm218_vm14 = vcmp.gt.f32.partialorder %v154_v38, 0.0  ;;  %2305 = vmatprep.subr.bf16.mxu0 %v2274_v51  ;;  %vm217_vm15 = vcmp.gt.f32.partialorder %v3791_v63, 0.0 }
  0xc6   :  { %1600 = vrot.lane.b32.xlu0 %v3538_v16, %s2848_s6  ;;  %v410_v42 = vsub.f32 1.0, %v154_v38  ;;  %v3823_v17 = vadd.f32 %v1070_v35, %v879_v28  ;;  %v835_v49 = vrot.slane %v3650_v22, 7  ;;  %v1446_v48 = vmul.f32 %v3358_v59, %v1409_v10  ;;  %2306 = vmatpush1.bf16.msra.mxu0 %v2273_v3 }
  0xc7   :  { %v1575_v8 = vpop.permute.xlu1 %1574  ;;  %v3827_v20 = vadd.f32 %v1072_v12, %v881_v7  ;;  %v1028_v44 = vrot.slane %v3650_v22, 1  ;;  %v5211_v6 = vrot.slane %v3789_v18, 1  ;;  %v1444_v16 = vmul.f32 %v3358_v59, %v1408_v0  ;;  %v1573_v51 = vpop.permute.xlu0 %1572 }
  0xc8   :  { %v2612_v28 = vsel %vm218_vm14, 1.0, %v5238_v55  ;;  %v878_v10 = vsel %vm5224_vm2, %v833_v45, %v835_v49  ;;  %v880_v3 = vsel %vm5224_vm2, %v831_v39, %v833_v45  ;;  %v1377_v7 = vsel %vm1371_vm0, %v1254_v46, %v1318_v19 }
  0xc9   :  { %1666 = vrot.lane.b32.xlu1 %v3648_v62, %s2848_s6  ;;  %v411_v12 = vsub.f32 1.0, %v3786_v21  ;;  %v1069_v38 = vsel %vm5225_vm3, %v1028_v44, %v5211_v6  ;;  %v5261_v35 = vrot.slane %v3656_v30, 1  ;;  %v2611_v39 = vsel %vm217_vm15, 1.0, %v5238_v55 }
  0xca   :  { %1664 = vrot.lane.b32.xlu0 %v3542_v36, %s2848_s6  ;;  %v409_v62 = vsub.f32 1.0, %v3791_v63  ;;  %v3861_v46 = vadd.f32 %v1069_v38, %v878_v10  ;;  %v1376_v45 = vsel %vm1371_vm0, %v3773_v25, %v1316_v27  ;;  %v1510_v0 = vadd.f32 %v1446_v48, %v3176_v11 }
  0xcb   :  { %v1071_v23 = vsel %vm5225_vm3, %v5261_v35, %v1028_v44  ;;  %v1639_v44 = vpop.permute.xlu1 %1638  ;;  %vm220_vm1 = vcmp.gt.f32.partialorder %v156_v15, 0.0  ;;  %v474_v35 = vadd.f32 %v2612_v28, %v410_v42  ;;  %v1511_v36 = vadd.f32 %v1377_v7, %v3149_v50  ;;  %v90_v50 = vld [vmem:[#allocation2 + $0x188] sm:$0xff] }
  0xcc   :  { %v3863_v19 = vadd.f32 %v1071_v23, %v880_v3  ;;  %v1698_v6 = vsel %vm1692_vm5, %v1575_v8, %v1639_v44  ;;  %v1730_v63 = vsel %vm1692_vm5, %v1639_v44, %v1575_v8  ;;  %v1508_v10 = vadd.f32 %v1444_v16, %v3168_v2  ;;  %v1637_v3 = vpop.permute.xlu0 %1636 }
  0xcd   :  { %v1768_v38 = vmul.f32 %v3527_v5, %v1730_v63  ;;  %v1831_v23 = vadd.f32 %v1698_v6, %v1510_v0  ;;  %v1697_v11 = vsel %vm1692_vm5, %v1573_v51, %v1637_v3  ;;  %v1729_v25 = vsel %vm1692_vm5, %v1637_v3, %v1573_v51  ;;  %1285 = vrot.lane.b32.xlu1 %v3650_v22, %s2847_s1 }
  0xce   :  { %v1509_v27 = vadd.f32 %v1376_v45, %v3151_v40  ;;  %v1766_v42 = vmul.f32 %v3527_v5, %v1729_v25  ;;  %v1829_v48 = vadd.f32 %v1697_v11, %v1508_v10  ;;  %1283 = vrot.lane.b32.xlu0 %v3656_v30, %s2847_s1  ;;  %v2613_v2 = vsel %vm219_vm13, 1.0, %v5238_v55 }
  0xcf   :  { %v1895_v8 = vmul.f32 0.25, %v1831_v23  ;;  %v1258_v6 = vpop.permute.xlu1 %1257  ;;  %v1832_v16 = vadd.f32 %v1768_v38, %v1511_v36  ;;  %v2614_v51 = vsel %vm220_vm1, 1.0, %v5238_v55  ;;  %v412_v28 = vsub.f32 1.0, %v156_v15 }
  0xd0   :  { %v1893_v7 = vmul.f32 0.25, %v1829_v48  ;;  %v1256_v0 = vpop.permute.xlu0 %1255  ;;  %v1830_v40 = vadd.f32 %v1766_v42, %v1509_v27  ;;  %v473_v45 = vadd.f32 %v2611_v39, %v409_v62  ;;  %v3891_v44 = vmul.f32 %v474_v35, %v90_v50  ;;  %v89_v39 = vld [vmem:[#allocation2 + $0x180] sm:$0xff]  ;;  %v3902_v62 = vld [vmem:[#allocation5 + $0x1b0] sm:$0xff]  ;;  %v158_v35 = vld [vmem:[#allocation5 + $0x1a8] sm:$0xff] }
  0xd1   :  { %1349 = vrot.lane.b32.xlu1 %v3771_v31, %s2847_s1  ;;  %v1896_v63 = vmul.f32 0.25, %v1832_v16  ;;  %v838_v21 = vrot.slane %v3775_v61, 7  ;;  %v840_v10 = vrot.slane %v3817_v43, 7  ;;  %v1033_v36 = vrot.slane %v3817_v43, 1  ;;  %v3907_v50 = vld [vmem:[#allocation5 + $0x1a0] sm:$0xff] }
  0xd2   :  { %1347 = vrot.lane.b32.xlu0 %v3658_v57, %s2847_s1  ;;  %v1894_v15 = vmul.f32 0.25, %v1830_v40  ;;  %v2275_v3 = vpack.c.bf16 %v1895_v8, %v1893_v7  ;;  %v3900_v38 = vadd.f32 %v2613_v2, %v411_v12  ;;  %v5212_v23 = vrot.slane %v3891_v44, 1 }
  0xd3   :  { %v1322_v11 = vpop.permute.xlu1 %1321  ;;  %v3905_v25 = vadd.f32 %v2614_v51, %v412_v28  ;;  %v875_v27 = vsel %vm5224_vm2, %v838_v21, %v840_v10  ;;  %v877_v12 = vsel %vm5224_vm2, %v836_v29, %v838_v21  ;;  %v5262_v42 = vrot.slane %v3775_v61, 1 }
  0xd4   :  { %v1411_v2 = vsel %vm1371_vm0, %v1322_v11, %v1258_v6  ;;  %v1320_v8 = vpop.permute.xlu0 %1319  ;;  %v2276_v16 = vpack.c.bf16 %v1896_v63, %v1894_v15  ;;  %v1066_v51 = vsel %vm5225_vm3, %v1033_v36, %v5212_v23  ;;  %v837_v28 = vrot.slane %v3789_v18, 7 }
  0xd5   :  { %v1068_v48 = vsel %vm5225_vm3, %v5262_v42, %v1033_v36  ;;  %v1410_v29 = vsel %vm1371_vm0, %v1320_v8, %v1256_v0  ;;  %1606 = vrot.lane.b32.xlu1 %v3650_v22, %s2848_s6  ;;  %v3932_v7 = vmul.f32 %v473_v45, %v89_v39  ;;  %vm223_vm4 = vcmp.gt.f32.partialorder %v3902_v62, 0.0 }
  0xd6   :  { %vm222_vm6 = vcmp.gt.f32.partialorder %v158_v35, 0.0  ;;  %1604 = vrot.lane.b32.xlu0 %v3656_v30, %s2848_s6  ;;  %2307 = vmatprep.subr.bf16.mxu0 %v2276_v16  ;;  %vm221_vm7 = vcmp.gt.f32.partialorder %v3907_v50, 0.0  ;;  %v414_v40 = vsub.f32 1.0, %v158_v35  ;;  %v3938_v63 = vadd.f32 %v1066_v51, %v875_v27 }
  0xd7   :  { %v839_v21 = vrot.slane %v3784_v24, 7  ;;  %v1450_v36 = vmul.f32 %v3358_v59, %v1411_v2  ;;  %2308 = vmatpush1.bf16.msra.mxu0 %v2275_v3  ;;  %v1579_v15 = vpop.permute.xlu1 %1578  ;;  %v3942_v45 = vadd.f32 %v1068_v48, %v877_v12  ;;  %v1032_v39 = vrot.slane %v3784_v24, 1 }
  0xd8   :  { %v5213_v42 = vrot.slane %v3932_v7, 1  ;;  %v1448_v30 = vmul.f32 %v3358_v59, %v1410_v29  ;;  %v1577_v16 = vpop.permute.xlu0 %1576  ;;  %v2616_v23 = vsel %vm222_vm6, 1.0, %v5238_v55  ;;  %v876_v3 = vsel %vm5224_vm2, %v835_v49, %v837_v28 }
  0xd9   :  { %v874_v35 = vsel %vm5224_vm2, %v837_v28, %v839_v21  ;;  %v1379_v27 = vsel %vm1371_vm0, %v1258_v6, %v1322_v11  ;;  %1670 = vrot.lane.b32.xlu1 %v3771_v31, %s2848_s6  ;;  %v415_v12 = vsub.f32 1.0, %v3902_v62  ;;  %v5263_v2 = vrot.slane %v3789_v18, 1 }
  0xda   :  { %v1065_v48 = vsel %vm5225_vm3, %v1032_v39, %v5213_v42  ;;  %1668 = vrot.lane.b32.xlu0 %v3658_v57, %s2848_s6  ;;  %v2617_v49 = vsel %vm223_vm4, 1.0, %v5238_v55  ;;  %v2615_v31 = vsel %vm221_vm7, 1.0, %v5238_v55  ;;  %v1378_v51 = vsel %vm1371_vm0, %v1256_v0, %v1320_v8 }
  0xdb   :  { %v1067_v22 = vsel %vm5225_vm3, %v5263_v2, %v1032_v39  ;;  %v3977_v6 = vadd.f32 %v1065_v48, %v874_v35  ;;  %v1514_v28 = vadd.f32 %v1450_v36, %v3227_v9  ;;  %v1643_v29 = vpop.permute.xlu1 %1642  ;;  %v91_v39 = vld [vmem:[#allocation2 + $0x190] sm:$0xff]  ;;  %v413_v57 = vsub.f32 1.0, %v3907_v50 }
  0xdc   :  { %v3979_v11 = vadd.f32 %v1067_v22, %v876_v3  ;;  %v478_v2 = vadd.f32 %v2616_v23, %v414_v40  ;;  %v1515_v62 = vadd.f32 %v1379_v27, %v3204_v52  ;;  %v1700_v42 = vsel %vm1692_vm5, %v1579_v15, %v1643_v29  ;;  %v1641_v48 = vpop.permute.xlu0 %1640  ;;  %v92_v22 = vld [vmem:[#allocation2 + $0x198] sm:$0xff]  ;;  %v94_v52 = vld [vmem:[#allocation2 + $0x1a8] sm:$0xff] }
  0xdd   :  { %v1732_v35 = vsel %vm1692_vm5, %v1643_v29, %v1579_v15  ;;  %v1512_v3 = vadd.f32 %v1448_v30, %v3229_v37  ;;  %v1835_v9 = vadd.f32 %v1700_v42, %v1514_v28  ;;  %v1699_v8 = vsel %vm1692_vm5, %v1577_v16, %v1641_v48  ;;  %1289 = vrot.lane.b32.xlu1 %v3784_v24, %s2847_s1  ;;  %v160_v28 = vld [vmem:[#allocation5 + $0x1b8] sm:$0xff] }
  0xde   :  { %v1772_v0 = vmul.f32 %v3527_v5, %v1732_v35  ;;  %v1731_v23 = vsel %vm1692_vm5, %v1641_v48, %v1577_v16  ;;  %v1513_v50 = vadd.f32 %v1378_v51, %v3206_v56  ;;  %1287 = vrot.lane.b32.xlu0 %v3789_v18, %s2847_s1  ;;  %v4003_v36 = vmul.f32 %v3900_v38, %v91_v39 }
  0xdf   :  { %v1770_v40 = vmul.f32 %v3527_v5, %v1731_v23  ;;  %v1833_v37 = vadd.f32 %v1699_v8, %v1512_v3  ;;  %v1899_v42 = vmul.f32 0.25, %v1835_v9  ;;  %v1262_v30 = vpop.permute.xlu1 %1261  ;;  %v4006_v16 = vmul.f32 %v3905_v25, %v92_v22 }
  0xe0   :  { %v1836_v15 = vadd.f32 %v1772_v0, %v1515_v62  ;;  %v479_v27 = vadd.f32 %v2617_v49, %v415_v12  ;;  %v1260_v56 = vpop.permute.xlu0 %1259  ;;  %v477_v51 = vadd.f32 %v2615_v31, %v413_v57  ;;  %v4008_v48 = vmul.f32 %v478_v2, %v94_v52  ;;  %v93_v49 = vld [vmem:[#allocation2 + $0x1a0] sm:$0xff]  ;;  %v162_v31 = vld [vmem:[#allocation5 + $0x1c8] sm:$0xff] }
  0xe1   :  { %v1834_v29 = vadd.f32 %v1770_v40, %v1513_v50  ;;  %v1897_v35 = vmul.f32 0.25, %v1833_v37  ;;  %1353 = vrot.lane.b32.xlu1 %v3817_v43, %s2847_s1  ;;  %v842_v38 = vrot.slane %v3891_v44, 7  ;;  %v5215_v39 = vrot.slane %v4006_v16, 7  ;;  %v4018_v0 = vld [vmem:[#allocation5 + $0x1c0] sm:$0xff] }
  0xe2   :  { %v1900_v3 = vmul.f32 0.25, %v1836_v15  ;;  %v1037_v62 = vrot.slane %v4006_v16, 1  ;;  %1351 = vrot.lane.b32.xlu0 %v3775_v61, %s2847_s1  ;;  %vm224_vm8 = vcmp.gt.f32.partialorder %v160_v28, 0.0  ;;  %v5214_v57 = vrot.slane %v4008_v48, 1 }
  0xe3   :  { %v1898_v25 = vmul.f32 0.25, %v1834_v29  ;;  %v2277_v12 = vpack.c.bf16 %v1899_v42, %v1897_v35  ;;  %v1326_v2 = vpop.permute.xlu1 %1325  ;;  %v416_v22 = vsub.f32 1.0, %v160_v28  ;;  %v871_v9 = vsel %vm5224_vm2, %v842_v38, %v5215_v39 }
  0xe4   :  { %v873_v8 = vsel %vm5224_vm2, %v840_v10, %v842_v38  ;;  %v5264_v23 = vrot.slane %v3891_v44, 1  ;;  %v1413_v50 = vsel %vm1371_vm0, %v1326_v2, %v1262_v30  ;;  %v1324_v40 = vpop.permute.xlu0 %1323  ;;  %v1062_v15 = vsel %vm5225_vm3, %v1037_v62, %v5214_v57 }
  0xe5   :  { %v2278_v37 = vpack.c.bf16 %v1900_v3, %v1898_v25  ;;  %v841_v42 = vrot.slane %v3932_v7, 7  ;;  %v1412_v10 = vsel %vm1371_vm0, %v1324_v40, %v1260_v56  ;;  %1610 = vrot.lane.b32.xlu1 %v3784_v24, %s2848_s6  ;;  %v4043_v29 = vmul.f32 %v477_v51, %v93_v49  ;;  %v95_v3 = vld [vmem:[#allocation2 + $0x1b0] sm:$0xff] }
  0xe6   :  { %v1064_v52 = vsel %vm5225_vm3, %v5264_v23, %v1037_v62  ;;  %v2618_v35 = vsel %vm224_vm8, 1.0, %v5238_v55  ;;  %vm226_vm9 = vcmp.gt.f32.partialorder %v162_v31, 0.0  ;;  %1608 = vrot.lane.b32.xlu0 %v3789_v18, %s2848_s6  ;;  %vm225_vm10 = vcmp.gt.f32.partialorder %v4018_v0, 0.0 }
  0xe7   :  { %2309 = vmatprep.subr.bf16.mxu0 %v2278_v37  ;;  %v418_v38 = vsub.f32 1.0, %v162_v31  ;;  %v4050_v62 = vadd.f32 %v1062_v15, %v871_v9  ;;  %v843_v25 = vrot.slane %v4003_v36, 7  ;;  %v1454_v23 = vmul.f32 %v3358_v59, %v1413_v50  ;;  %v1583_v51 = vpop.permute.xlu1 %1582 }
  0xe8   :  { %2310 = vmatpush1.bf16.msra.mxu0 %v2277_v12  ;;  %v4054_v49 = vadd.f32 %v1064_v52, %v873_v8  ;;  %v1036_v28 = vrot.slane %v4003_v36, 1  ;;  %v1038_v57 = vrot.slane %v4043_v29, 1  ;;  %v1452_v18 = vmul.f32 %v3358_v59, %v1412_v10  ;;  %v1581_v37 = vpop.permute.xlu0 %1580  ;;  %v96_v10 = vld [vmem:[#allocation2 + $0x1b8] sm:$0xff] }
  0xe9   :  { %v2620_v39 = vsel %vm226_vm9, 1.0, %v5238_v55  ;;  %v870_v9 = vsel %vm5224_vm2, %v841_v42, %v843_v25  ;;  %v872_v12 = vsel %vm5224_vm2, %v839_v21, %v841_v42  ;;  %v1381_v8 = vsel %vm1371_vm0, %v1262_v30, %v1326_v2  ;;  %1674 = vrot.lane.b32.xlu1 %v3817_v43, %s2848_s6 }
  0xea   :  { %v4073_v52 = vmul.f32 %v479_v27, %v95_v3  ;;  %v1061_v31 = vsel %vm5225_vm3, %v1036_v28, %v1038_v57  ;;  %v5265_v50 = vrot.slane %v3932_v7, 1  ;;  %1672 = vrot.lane.b32.xlu0 %v3775_v61, %s2848_s6  ;;  %v480_v21 = vadd.f32 %v2618_v35, %v416_v22 }
  0xeb   :  { %v2619_v43 = vsel %vm225_vm10, 1.0, %v5238_v55  ;;  %v4088_v30 = vadd.f32 %v1061_v31, %v870_v9  ;;  %v1380_v2 = vsel %vm1371_vm0, %v1260_v56, %v1324_v40  ;;  %v1518_v15 = vadd.f32 %v1454_v23, %v3297_v13  ;;  %v1647_v42 = vpop.permute.xlu1 %1646  ;;  %v4102_v31 = vld [vmem:[#allocation5 + $0x1d0] sm:$0xff] }
  0xec   :  { %v1063_v24 = vsel %vm5225_vm3, %v5265_v50, %v1036_v28  ;;  %v417_v3 = vsub.f32 1.0, %v4018_v0  ;;  %v482_v28 = vadd.f32 %v2620_v39, %v418_v38  ;;  %v1519_v61 = vadd.f32 %v1381_v8, %v3267_v54  ;;  %v98_v39 = vld [vmem:[#allocation2 + $0x1c8] sm:$0xff]  ;;  %v164_v50 = vld [vmem:[#allocation5 + $0x1d8] sm:$0xff] }
  0xed   :  { %v4090_v27 = vadd.f32 %v1063_v24, %v872_v12  ;;  %v1702_v22 = vsel %vm1692_vm5, %v1583_v51, %v1647_v42  ;;  %v1734_v35 = vsel %vm1692_vm5, %v1647_v42, %v1583_v51  ;;  %v1516_v9 = vadd.f32 %v1452_v18, %v3299_v33  ;;  %v1645_v12 = vpop.permute.xlu0 %1644  ;;  %1293 = vrot.lane.b32.xlu1 %v4003_v36, %s2847_s1 }
  0xee   :  { %v1776_v13 = vmul.f32 %v3527_v5, %v1734_v35  ;;  %v1839_v56 = vadd.f32 %v1702_v22, %v1518_v15  ;;  %v1701_v0 = vsel %vm1692_vm5, %v1581_v37, %v1645_v12  ;;  %v1733_v54 = vsel %vm1692_vm5, %v1645_v12, %v1581_v37  ;;  %1291 = vrot.lane.b32.xlu0 %v3932_v7, %s2847_s1  ;;  %v97_v12 = vld [vmem:[#allocation2 + $0x1c0] sm:$0xff] }
  0xef   :  { %v1517_v40 = vadd.f32 %v1380_v2, %v3269_v1  ;;  %v1774_v33 = vmul.f32 %v3527_v5, %v1733_v54  ;;  %v1837_v38 = vadd.f32 %v1701_v0, %v1516_v9  ;;  %v4115_v23 = vmul.f32 %v480_v21, %v96_v10  ;;  %v1266_v8 = vpop.permute.xlu1 %1265 }
  0xf0   :  { %v1840_v51 = vadd.f32 %v1776_v13, %v1519_v61  ;;  %v1903_v18 = vmul.f32 0.25, %v1839_v56  ;;  %vm227_vm11 = vcmp.gt.f32.partialorder %v4102_v31, 0.0  ;;  %v481_v1 = vadd.f32 %v2619_v43, %v417_v3  ;;  %v166_v43 = vld [vmem:[#allocation5 + $0x1e8] sm:$0xff]  ;;  %v4129_v56 = vld [vmem:[#allocation5 + $0x1e0] sm:$0xff] }
  0xf1   :  { %v1838_v24 = vadd.f32 %v1774_v33, %v1517_v40  ;;  %v1901_v15 = vmul.f32 0.25, %v1837_v38  ;;  %v1264_v42 = vpop.permute.xlu0 %1263  ;;  %v4119_v2 = vmul.f32 %v482_v28, %v98_v39  ;;  %1357 = vrot.lane.b32.xlu1 %v4006_v16, %s2847_s1  ;;  %v846_v21 = vrot.slane %v4008_v48, 7 }
  0xf2   :  { %v1904_v22 = vmul.f32 0.25, %v1840_v51  ;;  %v5217_v10 = vrot.slane %v4115_v23, 7  ;;  %v1041_v61 = vrot.slane %v4115_v23, 1  ;;  %1355 = vrot.lane.b32.xlu0 %v3891_v44, %s2847_s1  ;;  %vm228_vm12 = vcmp.gt.f32.partialorder %v164_v50, 0.0 }
  0xf3   :  { %v1902_v35 = vmul.f32 0.25, %v1838_v24  ;;  %v2279_v9 = vpack.c.bf16 %v1903_v18, %v1901_v15  ;;  %v5216_v3 = vrot.slane %v4119_v2, 1  ;;  %v1330_v28 = vpop.permute.xlu1 %1329  ;;  %v420_v13 = vsub.f32 1.0, %v164_v50 }
  0xf4   :  { %v867_v0 = vsel %vm5224_vm2, %v846_v21, %v5217_v10  ;;  %v5266_v54 = vrot.slane %v4006_v16, 7  ;;  %v5267_v40 = vrot.slane %v4008_v48, 1  ;;  %v1415_v38 = vsel %vm1371_vm0, %v1330_v28, %v1266_v8 }
  0xf5   :  { %v1328_v51 = vpop.permute.xlu0 %1327  ;;  %v2280_v18 = vpack.c.bf16 %v1904_v22, %v1902_v35  ;;  %v1058_v24 = vsel %vm5225_vm3, %v1041_v61, %v5216_v3  ;;  %v845_v15 = vrot.slane %v4043_v29, 7  ;;  %1614 = vrot.lane.b32.xlu1 %v4003_v36, %s2848_s6  ;;  %vm230_vm13 = vcmp.gt.f32.partialorder %v166_v43, 0.0 }
  0xf6   :  { %v869_v39 = vsel %vm5224_vm2, %v5266_v54, %v846_v21  ;;  %v1060_v33 = vsel %vm5225_vm3, %v5267_v40, %v1041_v61  ;;  %v1414_v21 = vsel %vm1371_vm0, %v1328_v51, %v1264_v42  ;;  %v4154_v54 = vmul.f32 %v481_v1, %v97_v12  ;;  %1612 = vrot.lane.b32.xlu0 %v3932_v7, %s2848_s6 }
  0xf7   :  { %v2622_v40 = vsel %vm228_vm12, 1.0, %v5238_v55  ;;  %2311 = vmatprep.subr.bf16.mxu0 %v2280_v18  ;;  %vm229_vm14 = vcmp.gt.f32.partialorder %v4129_v56, 0.0  ;;  %v422_v22 = vsub.f32 1.0, %v166_v43  ;;  %v4161_v61 = vadd.f32 %v1058_v24, %v867_v0  ;;  %v1587_v1 = vpop.permute.xlu1 %1586 }
  0xf8   :  { %v5219_v35 = vrot.slane %v4073_v52, 7  ;;  %v1458_v3 = vmul.f32 %v3358_v59, %v1415_v38  ;;  %2312 = vmatpush1.bf16.msra.mxu0 %v2279_v9  ;;  %v4165_v12 = vadd.f32 %v1060_v33, %v869_v39  ;;  %v1040_v50 = vrot.slane %v4073_v52, 1 }
  0xf9   :  { %v5218_v10 = vrot.slane %v4154_v54, 1  ;;  %v1456_v7 = vmul.f32 %v3358_v59, %v1414_v21  ;;  %v1585_v18 = vpop.permute.xlu0 %1584  ;;  %v2624_v37 = vsel %vm230_vm13, 1.0, %v5238_v55  ;;  %v868_v9 = vsel %vm5224_vm2, %v843_v25, %v845_v15  ;;  %1678 = vrot.lane.b32.xlu1 %v4006_v16, %s2848_s6 }
  0xfa   :  { %v866_v43 = vsel %vm5224_vm2, %v845_v15, %v5219_v35  ;;  %v1383_v0 = vsel %vm1371_vm0, %v1266_v8, %v1330_v28  ;;  %v2621_v39 = vsel %vm227_vm11, 1.0, %v5238_v55  ;;  %v1059_v36 = vsel %vm5225_vm3, %v1038_v57, %v1040_v50  ;;  %1676 = vrot.lane.b32.xlu0 %v3891_v44, %s2848_s6 }
  0xfb   :  { %v1057_v33 = vsel %vm5225_vm3, %v1040_v50, %v5218_v10  ;;  %v484_v25 = vadd.f32 %v2622_v40, %v420_v13  ;;  %v421_v16 = vsub.f32 1.0, %v4129_v56  ;;  %v4199_v28 = vadd.f32 %v1059_v36, %v868_v9  ;;  %v1651_v15 = vpop.permute.xlu1 %1650  ;;  %v5268_v50 = vld [vmem:[#allocation15_spill] sm:$0xff]  ;;  %v99_v10 = vld [vmem:[#allocation2 + $0x1d0] sm:$0xff] }
  0xfc   :  { %v4197_v8 = vadd.f32 %v1057_v33, %v866_v43  ;;  %v1382_v38 = vsel %vm1371_vm0, %v1264_v42, %v1328_v51  ;;  %v1522_v24 = vadd.f32 %v1458_v3, %v3371_v58  ;;  %v2623_v57 = vsel %vm229_vm14, 1.0, %v5238_v55  ;;  %v5269_v43 = vld [vmem:[#allocation17_spill] sm:$0xff]  ;;  %v100_v42 = vld [vmem:[#allocation2 + $0x1d8] sm:$0xff]  ;;  %v102_v51 = vld [vmem:[#allocation2 + $0x1e8] sm:$0xff] }
  0xfd   :  { %v486_v21 = vadd.f32 %v2624_v37, %v422_v22  ;;  %v1523_v44 = vadd.f32 %v1383_v0, %v5268_v50  ;;  %v1704_v13 = vsel %vm1692_vm5, %v1587_v1, %v1651_v15  ;;  %v1736_v40 = vsel %vm1692_vm5, %v1651_v15, %v1587_v1  ;;  %v1649_v33 = vpop.permute.xlu0 %1648  ;;  %1297 = vrot.lane.b32.xlu1 %v4073_v52, %s2847_s1  ;;  %v5270_v22 = vld [vmem:[#allocation16_spill] sm:$0xff] }
  0xfe   :  { %v1520_v9 = vadd.f32 %v1456_v7, %v5269_v43  ;;  %v1780_v58 = vmul.f32 %v3527_v5, %v1736_v40  ;;  %v1843_v3 = vadd.f32 %v1704_v13, %v1522_v24  ;;  %v1703_v56 = vsel %vm1692_vm5, %v1585_v18, %v1649_v33  ;;  %1295 = vrot.lane.b32.xlu0 %v4043_v29, %s2847_s1 }
  0xff   :  { %v1735_v37 = vsel %vm1692_vm5, %v1649_v33, %v1585_v18  ;;  %v1521_v0 = vadd.f32 %v1382_v38, %v5270_v22  ;;  %v1270_v15 = vpop.permute.xlu1 %1269  ;;  %v5271_v50 = vsub.f32 1.0, %v4102_v31  ;;  %v4226_v40 = vmul.f32 %v484_v25, %v100_v42  ;;  %v101_v42 = vld [vmem:[#allocation2 + $0x1e0] sm:$0xff] }
 0x100   :  { %v1778_v1 = vmul.f32 %v3527_v5, %v1735_v37  ;;  %v1841_v7 = vadd.f32 %v1703_v56, %v1520_v9  ;;  %v1844_v36 = vadd.f32 %v1780_v58, %v1523_v44  ;;  %v1907_v24 = vmul.f32 0.25, %v1843_v3 }
 0x101   :  { %v483_v13 = vadd.f32 %v2621_v39, %v5271_v50  ;;  %v1268_v33 = vpop.permute.xlu0 %1267  ;;  %v485_v35 = vadd.f32 %v2623_v57, %v421_v16  ;;  %v4228_v38 = vmul.f32 %v486_v21, %v102_v51  ;;  %1361 = vrot.lane.b32.xlu1 %v4115_v23, %s2847_s1  ;;  %v850_v44 = vrot.slane %v4119_v2, 7 }
 0x102   :  { %v1842_v18 = vadd.f32 %v1778_v1, %v1521_v0  ;;  %v1905_v43 = vmul.f32 0.25, %v1841_v7  ;;  %v1908_v37 = vmul.f32 0.25, %v1844_v36  ;;  %v852_v9 = vrot.slane %v4226_v40, 7  ;;  %1359 = vrot.lane.b32.xlu0 %v4008_v48, %s2847_s1 }
 0x103   :  { %v1045_v31 = vrot.slane %v4226_v40, 1  ;;  %v1047_v16 = vrot.slane %v4228_v38, 1  ;;  %v1334_v57 = vpop.permute.xlu1 %1333  ;;  %v4238_v21 = vmul.f32 %v483_v13, %v99_v10  ;;  %v5272_v3 = vrot.slane %v4115_v23, 7 }
 0x104   :  { %v1906_v39 = vmul.f32 0.25, %v1842_v18  ;;  %v2281_v25 = vpack.c.bf16 %v1907_v24, %v1905_v43  ;;  %v863_v58 = vsel %vm5224_vm2, %v850_v44, %v852_v9  ;;  %v5273_v51 = vrot.slane %v4119_v2, 1 }
 0x105   :  { %v865_v56 = vsel %vm5224_vm2, %v5272_v3, %v850_v44  ;;  %v1417_v0 = vsel %vm1371_vm0, %v1334_v57, %v1270_v15  ;;  %v1332_v10 = vpop.permute.xlu0 %1331  ;;  %v1054_v7 = vsel %vm5225_vm3, %v1045_v31, %v1047_v16  ;;  %v849_v36 = vrot.slane %v4154_v54, 7  ;;  %1618 = vrot.lane.b32.xlu1 %v4073_v52, %s2848_s6 }
 0x106   :  { %v1056_v22 = vsel %vm5225_vm3, %v5273_v51, %v1045_v31  ;;  %v2282_v1 = vpack.c.bf16 %v1908_v37, %v1906_v39  ;;  %v1416_v24 = vsel %vm1371_vm0, %v1332_v10, %v1268_v33  ;;  %v4263_v50 = vmul.f32 %v485_v35, %v101_v42  ;;  %1616 = vrot.lane.b32.xlu0 %v4043_v29, %s2848_s6 }
 0x107   :  { %v4267_v13 = vadd.f32 %v1054_v7, %v863_v58  ;;  %v851_v18 = vrot.slane %v4238_v21, 7  ;;  %v1462_v43 = vmul.f32 %v3358_v59, %v1417_v0  ;;  %v1591_v37 = vpop.permute.xlu1 %1590  ;;  %v4271_v44 = vadd.f32 %v1056_v22, %v865_v56  ;;  %v5277_v7 = vld [vmem:[#allocation18_spill] sm:$0xff] }
 0x108   :  { %2313 = vmatprep.subr.bf16.mxu0 %v2282_v1  ;;  %v1044_v31 = vrot.slane %v4238_v21, 1  ;;  %v1046_v39 = vrot.slane %v4263_v50, 1  ;;  %v1460_v35 = vmul.f32 %v3358_v59, %v1416_v24  ;;  %v5274_v58 = vrot.slane %v4073_v52, 7 }
 0x109   :  { %2314 = vmatpush1.bf16.msra.mxu0 %v2281_v25  ;;  %v1589_v42 = vpop.permute.xlu0 %1588  ;;  %v862_v29 = vsel %vm5224_vm2, %v849_v36, %v851_v18  ;;  %v1385_v3 = vsel %vm1371_vm0, %v1270_v15, %v1334_v57  ;;  %1682 = vrot.lane.b32.xlu1 %v4115_v23, %s2848_s6  ;;  %v5275_v51 = vrot.slane %v4154_v54, 1  ;;  %v1384_v15 = vsel %vm1371_vm0, %v1268_v33, %v1332_v10  ;;  %v5276_v57 = vld [vmem:[#allocation21_spill] sm:$0xff] }
 0x10a   :  { %v864_v25 = vsel %vm5224_vm2, %v5274_v58, %v849_v36  ;;  %v1053_v56 = vsel %vm5225_vm3, %v1044_v31, %v1046_v39  ;;  %1680 = vrot.lane.b32.xlu0 %v4008_v48, %s2848_s6  ;;  %v1526_v23 = vadd.f32 %v1462_v43, %v5276_v57  ;;  %v1527_v36 = vadd.f32 %v1385_v3, %v5277_v7  ;;  %v5278_v58 = vld [vmem:[#allocation22_spill] sm:$0xff]  ;;  %v5279_v43 = vld [vmem:[#allocation19_spill] sm:$0xff] }
 0x10b   :  { %v1055_v22 = vsel %vm5225_vm3, %v5275_v51, %v1044_v31  ;;  %v4296_v52 = vadd.f32 %v1053_v56, %v862_v29  ;;  %v1655_v1 = vpop.permute.xlu1 %1654  ;;  %v1524_v48 = vadd.f32 %v1460_v35, %v5278_v58  ;;  %v1525_v3 = vadd.f32 %v1384_v15, %v5279_v43 }
 0x10c   :  { %v4298_v0 = vadd.f32 %v1055_v22, %v864_v25  ;;  %v1706_v24 = vsel %vm1692_vm5, %v1591_v37, %v1655_v1  ;;  %v1738_v31 = vsel %vm1692_vm5, %v1655_v1, %v1591_v37 }
 0x10d   :  { %v1653_v29 = vpop.permute.xlu0 %1652  ;;  %v1784_v25 = vmul.f32 %v3527_v5, %v1738_v31  ;;  %v1847_v56 = vadd.f32 %v1706_v24, %v1526_v23  ;;  %1301 = vrot.lane.b32.xlu1 %v4238_v21, %s2847_s1  ;;  %v5280_v31 = vld [vmem:[#allocation13_spill] sm:$0xff] }
 0x10e   :  { %v1705_v33 = vsel %vm1692_vm5, %v1589_v42, %v1653_v29  ;;  %v1737_v10 = vsel %vm1692_vm5, %v1653_v29, %v1589_v42  ;;  %1299 = vrot.lane.b32.xlu0 %v4154_v54, %s2847_s1  ;;  %v5220_v42 = vrot.slane %v4228_v38, 7  ;;  %v5222_v15 = vrot.slane %v5280_v31, 1 }
 0x10f   :  { %v1782_v51 = vmul.f32 %v3527_v5, %v1737_v10  ;;  %v1845_v37 = vadd.f32 %v1705_v33, %v1524_v48  ;;  %v1848_v35 = vadd.f32 %v1784_v25, %v1527_v36  ;;  %v1911_v22 = vmul.f32 0.25, %v1847_v56  ;;  %v1274_v57 = vpop.permute.xlu1 %1273 }
 0x110   :  { %v861_v36 = vsel %vm5224_vm2, %v852_v9, %v5220_v42  ;;  %v1052_v25 = vsel %vm5225_vm3, %v1047_v16, %v5222_v15  ;;  %v5221_v56 = vrot.slane %v4263_v50, 7  ;;  %v5281_v16 = vld [vmem:[#allocation14_spill] sm:$0xff] }
 0x111   :  { %v1846_v23 = vadd.f32 %v1782_v51, %v1525_v3  ;;  %v1909_v1 = vmul.f32 0.25, %v1845_v37  ;;  %v1272_v7 = vpop.permute.xlu0 %1271  ;;  %v1912_v24 = vmul.f32 0.25, %v1848_v35  ;;  %1365 = vrot.lane.b32.xlu1 %v4226_v40, %s2847_s1  ;;  %v4347_v9 = vadd.f32 %v1052_v25, %v861_v36  ;;  %v5283_v25 = vld [vmem:[#allocation23_spill] sm:$0xff] }
 0x112   :  { %1363 = vrot.lane.b32.xlu0 %v4119_v2, %s2847_s1  ;;  %v5223_v51 = vrot.slane %v5281_v16, 1 }
 0x113   :  { %v1910_v58 = vmul.f32 0.25, %v1846_v23  ;;  %v2283_v48 = vpack.c.bf16 %v1911_v22, %v1909_v1  ;;  %v1338_v29 = vpop.permute.xlu1 %1337  ;;  %v860_v22 = vsel %vm5224_vm2, %v851_v18, %v5221_v56  ;;  %v5282_v18 = vld [vmem:[#allocation25_spill] sm:$0xff] }
 0x114   :  { %v1419_v33 = vsel %vm1371_vm0, %v1338_v29, %v1274_v57 }
 0x115   :  { %v1336_v10 = vpop.permute.xlu0 %1335  ;;  %v2284_v43 = vpack.c.bf16 %v1912_v24, %v1910_v58  ;;  %1622 = vrot.lane.b32.xlu1 %v4238_v21, %s2848_s6  ;;  %v1466_v37 = vmul.f32 %v3358_v59, %v1419_v33  ;;  %v1387_v24 = vsel %vm1371_vm0, %v1274_v57, %v1338_v29 }
 0x116   :  { %v1418_v3 = vsel %vm1371_vm0, %v1336_v10, %v1272_v7  ;;  %1620 = vrot.lane.b32.xlu0 %v4154_v54, %s2848_s6  ;;  %v1051_v54 = vsel %vm5225_vm3, %v1046_v39, %v5223_v51  ;;  %v1386_v21 = vsel %vm1371_vm0, %v1272_v7, %v1336_v10  ;;  %v1531_v33 = vadd.f32 %v1387_v24, %v5283_v25 }
 0x117   :  { %2315 = vmatprep.subr.bf16.mxu0 %v2284_v43  ;;  %v1595_v35 = vpop.permute.xlu1 %1594  ;;  %v1464_v23 = vmul.f32 %v3358_v59, %v1418_v3  ;;  %v4366_v58 = vadd.f32 %v1051_v54, %v860_v22 }
 0x118   :  { %2316 = vmatpush1.bf16.msra.mxu0 %v2283_v48  ;;  %v1530_v48 = vadd.f32 %v1466_v37, %v5282_v18  ;;  %v5285_v37 = vld [vmem:[#allocation24_spill] sm:$0xff] }
 0x119   :  { %v1593_v1 = vpop.permute.xlu0 %1592  ;;  %1686 = vrot.lane.b32.xlu1 %v4226_v40, %s2848_s6  ;;  %v5284_v40 = vld [vmem:[#allocation26_spill] sm:$0xff]  ;;  %v1529_v22 = vadd.f32 %v1386_v21, %v5285_v37  ;;  %v5286_v37 = vld [vmem:[#allocation20_spill] sm:$0xff] }
 0x11a   :  { %1684 = vrot.lane.b32.xlu0 %v4119_v2, %s2848_s6  ;;  %v1528_v29 = vadd.f32 %v1464_v23, %v5284_v40  ;;  %v1949_v40 = vmul.u32 2, %v2957_v14 }
 0x11b   :  { %v1659_v36 = vpop.permute.xlu1 %1658 }
 0x11c   :  { %v1708_v39 = vsel %vm1692_vm5, %v1595_v35, %v1659_v36  ;;  %v1740_v57 = vsel %vm1692_vm5, %v1659_v36, %v1595_v35  ;;  %vm1966_vm15 = vcmp.eq.s32.totalorder %v5286_v37, %v1949_v40  ;;  %vm1965_vm8 = vcmp.eq.s32.totalorder %v3240_v26, %v1949_v40 }
 0x11d   :  { %v1657_v43 = vpop.permute.xlu0 %1656  ;;  %v1788_v3 = vmul.f32 %v3527_v5, %v1740_v57  ;;  %v1851_v2 = vadd.f32 %v1708_v39, %v1530_v48  ;;  %1305 = vrot.lane.b32.xlu1 %v5281_v16, %s2847_s1  ;;  %v4391_v39 = vadd.s32 8, %v2957_v14 }
 0x11e   :  { %v1707_v7 = vsel %vm1692_vm5, %v1593_v1, %v1657_v43  ;;  %v1739_v10 = vsel %vm1692_vm5, %v1657_v43, %v1593_v1  ;;  %1303 = vrot.lane.b32.xlu0 %v4263_v50, %s2847_s1 }
 0x11f   :  { %v1786_v54 = vmul.f32 %v3527_v5, %v1739_v10  ;;  %v1849_v35 = vadd.f32 %v1707_v7, %v1528_v29  ;;  %v1852_v23 = vadd.f32 %v1788_v3, %v1531_v33  ;;  %v1915_v24 = vmul.f32 0.25, %v1851_v2  ;;  %v1278_v18 = vpop.permute.xlu1 %1277 }
 0x120   :  { %v1950_v33 = vmul.u32 2, %v4391_v39  ;;  %v1997_v7 = vadd.s32 1, %v1949_v40 }
 0x121   :  { %v1850_v48 = vadd.f32 %v1786_v54, %v1529_v22  ;;  %v1913_v36 = vmul.f32 0.25, %v1849_v35  ;;  %v1276_v25 = vpop.permute.xlu0 %1275  ;;  %v1916_v1 = vmul.f32 0.25, %v1852_v23  ;;  %1369 = vrot.lane.b32.xlu1 %v5280_v31, %s2847_s1 }
 0x122   :  { %1367 = vrot.lane.b32.xlu0 %v4228_v38, %s2847_s1  ;;  %v1998_v22 = vadd.s32 1, %v1950_v33  ;;  %vm1968_vm1 = vcmp.eq.s32.totalorder %v5286_v37, %v1950_v33  ;;  %vm2014_vm4 = vcmp.eq.s32.totalorder %v5286_v37, %v1997_v7  ;;  %vm1967_vm10 = vcmp.eq.s32.totalorder %v3240_v26, %v1950_v33 }
 0x123   :  { %v1914_v21 = vmul.f32 0.25, %v1850_v48  ;;  %v2285_v57 = vpack.c.bf16 %v1915_v24, %v1913_v36  ;;  %v1342_v29 = vpop.permute.xlu1 %1341  ;;  %vm2046_vm7 = vmor %vm1966_vm15, %vm2014_vm4  ;;  %vm2013_vm11 = vcmp.eq.s32.totalorder %v3240_v26, %v1997_v7 }
 0x124   :  { %v1421_v43 = vsel %vm1371_vm0, %v1342_v29, %v1278_v18  ;;  %vm2016_vm6 = vcmp.eq.s32.totalorder %v5286_v37, %v1998_v22  ;;  %v1389_v48 = vsel %vm1371_vm0, %v1278_v18, %v1342_v29  ;;  %vm2015_vm12 = vcmp.eq.s32.totalorder %v3240_v26, %v1998_v22  ;;  %vm4427_vm14 = vmor %vm1965_vm8, %vm2013_vm11 }
 0x125   :  { %v1340_v3 = vpop.permute.xlu0 %1339  ;;  %v2286_v2 = vpack.c.bf16 %v1916_v1, %v1914_v21  ;;  %1626 = vrot.lane.b32.xlu1 %v5281_v16, %s2848_s6  ;;  %v1470_v54 = vmul.f32 %v3358_v59, %v1421_v43  ;;  %vm2048_vm9 = vmor %vm1968_vm1, %vm2016_vm6  ;;  %v2849_v21 = vmov 0.5|0.5   ;;  %v1535_v40 = vadd.f32 %v1389_v48, %v3581_v32 }
 0x126   :  { %v1420_v10 = vsel %vm1371_vm0, %v1340_v3, %v1276_v25  ;;  %1624 = vrot.lane.b32.xlu0 %v4263_v50, %s2848_s6  ;;  %vm2631_vm13 = vmpackc.low %vm2048_vm9, %vm2046_vm7  ;;  %v1388_v36 = vsel %vm1371_vm0, %v1276_v25, %v1340_v3 }
 0x127   :  { %2317 = vmatprep.subr.bf16.mxu0 %v2286_v2  ;;  %v1599_v35 = vpop.permute.xlu1 %1598  ;;  %v1468_v23 = vmul.f32 %v3358_v59, %v1420_v10  ;;  %v1534_v1 = vadd.f32 %v1470_v54, %v3622_v60  ;;  %2632 = vmatprep.mubr.msk.bf16.mxu0 %vm2631_vm13, %v2849_v21  ;;  %vm4439_vm15 = vmor %vm1967_vm10, %vm2015_vm12 }
 0x128   :  { %2318 = vmatpush1.bf16.msra.mxu0 %v2285_v57 }
 0x129   :  { %v1597_v24 = vpop.permute.xlu0 %1596  ;;  %1690 = vrot.lane.b32.xlu1 %v5280_v31, %s2848_s6  ;;  %v1532_v25 = vadd.f32 %v1468_v23, %v3624_v53  ;;  %v5291_v53 = vld [vmem:[#allocation27_spill] sm:$0xff] }
 0x12a   :  { %1688 = vrot.lane.b32.xlu0 %v4228_v38, %s2848_s6  ;;  %v1533_v33 = vadd.f32 %v1388_v36, %v5291_v53 }
 0x12b   :  { %v1663_v18 = vpop.permute.xlu1 %1662 }
 0x12c   :  { %v1710_v29 = vsel %vm1692_vm5, %v1599_v35, %v1663_v18  ;;  %v1742_v43 = vsel %vm1692_vm5, %v1663_v18, %v1599_v35 }
 0x12d   :  { %v1661_v3 = vpop.permute.xlu0 %1660  ;;  %v1792_v2 = vmul.f32 %v3527_v5, %v1742_v43  ;;  %v1855_v7 = vadd.f32 %v1710_v29, %v1534_v1 }
 0x12e   :  { %v1709_v32 = vsel %vm1692_vm5, %v1597_v24, %v1661_v3  ;;  %v1741_v10 = vsel %vm1692_vm5, %v1661_v3, %v1597_v24 }
 0x12f   :  { %v1790_v22 = vmul.f32 %v3527_v5, %v1741_v10  ;;  %v1853_v54 = vadd.f32 %v1709_v32, %v1532_v25  ;;  %v1856_v35 = vadd.f32 %v1792_v2, %v1535_v40  ;;  %v1919_v23 = vmul.f32 0.25, %v1855_v7  ;;  %v1282_v48 = vpop.permute.xlu1 %1281 }
 0x131   :  { %v1854_v1 = vadd.f32 %v1790_v22, %v1533_v33  ;;  %v1917_v18 = vmul.f32 0.25, %v1853_v54  ;;  %v1280_v29 = vpop.permute.xlu0 %1279  ;;  %v1920_v43 = vmul.f32 0.25, %v1856_v35 }
 0x133   :  { %v1918_v42 = vmul.f32 0.25, %v1854_v1  ;;  %v2287_v56 = vpack.c.bf16 %v1919_v23, %v1917_v18  ;;  %v1346_v24 = vpop.permute.xlu1 %1345 }
 0x134   :  { %v1423_v3 = vsel %vm1371_vm0, %v1346_v24, %v1282_v48  ;;  %v1391_v32 = vsel %vm1371_vm0, %v1282_v48, %v1346_v24 }
 0x135   :  { %v1344_v15 = vpop.permute.xlu0 %1343  ;;  %v2288_v51 = vpack.c.bf16 %v1920_v43, %v1918_v42  ;;  %v1474_v40 = vmul.f32 %v3358_v59, %v1423_v3  ;;  %v1539_v33 = vadd.f32 %v1391_v32, %v3704_v4 }
 0x136   :  { %v1422_v36 = vsel %vm1371_vm0, %v1344_v15, %v1280_v29  ;;  %v1390_v10 = vsel %vm1371_vm0, %v1280_v29, %v1344_v15 }
 0x137   :  { %2319 = vmatprep.subr.bf16.mxu0 %v2288_v51  ;;  %v1603_v25 = vpop.permute.xlu1 %1602  ;;  %v1472_v2 = vmul.f32 %v3358_v59, %v1422_v36  ;;  %v1538_v53 = vadd.f32 %v1474_v40, %v3741_v34  ;;  %v1537_v4 = vadd.f32 %v1390_v10, %v3708_v47 }
 0x138   :  { %2320 = vmatpush1.bf16.msra.mxu0 %v2287_v56 }
 0x139   :  { %v1601_v7 = vpop.permute.xlu0 %1600  ;;  %v1536_v22 = vadd.f32 %v1472_v2, %v3743_v41 }
 0x13b   :  { %v1667_v42 = vpop.permute.xlu1 %1666 }
 0x13c   :  { %v1712_v51 = vsel %vm1692_vm5, %v1603_v25, %v1667_v42  ;;  %v1744_v56 = vsel %vm1692_vm5, %v1667_v42, %v1603_v25 }
 0x13d   :  { %v1665_v54 = vpop.permute.xlu0 %1664  ;;  %v1796_v35 = vmul.f32 %v3527_v5, %v1744_v56  ;;  %v1859_v23 = vadd.f32 %v1712_v51, %v1538_v53 }
 0x13e   :  { %v1711_v15 = vsel %vm1692_vm5, %v1601_v7, %v1665_v54  ;;  %v1743_v34 = vsel %vm1692_vm5, %v1665_v54, %v1601_v7 }
 0x13f   :  { %v1794_v48 = vmul.f32 %v3527_v5, %v1743_v34  ;;  %v1857_v1 = vadd.f32 %v1711_v15, %v1536_v22  ;;  %v1860_v18 = vadd.f32 %v1796_v35, %v1539_v33  ;;  %v1923_v29 = vmul.f32 0.25, %v1859_v23  ;;  %v1286_v43 = vpop.permute.xlu1 %1285 }
 0x141   :  { %v1858_v24 = vadd.f32 %v1794_v48, %v1537_v4  ;;  %v1921_v41 = vmul.f32 0.25, %v1857_v1  ;;  %v1284_v3 = vpop.permute.xlu0 %1283  ;;  %v1924_v36 = vmul.f32 0.25, %v1860_v18 }
 0x143   :  { %v1922_v40 = vmul.f32 0.25, %v1858_v24  ;;  %v2289_v25 = vpack.c.bf16 %v1923_v29, %v1921_v41  ;;  %v1350_v2 = vpop.permute.xlu1 %1349 }
 0x144   :  { %v1425_v32 = vsel %vm1371_vm0, %v1350_v2, %v1286_v43  ;;  %v1393_v56 = vsel %vm1371_vm0, %v1286_v43, %v1350_v2 }
 0x145   :  { %v1348_v53 = vpop.permute.xlu0 %1347  ;;  %v2290_v7 = vpack.c.bf16 %v1924_v36, %v1922_v40  ;;  %v1478_v10 = vmul.f32 %v3358_v59, %v1425_v32  ;;  %v1543_v23 = vadd.f32 %v1393_v56, %v3823_v17 }
 0x146   :  { %v1424_v47 = vsel %vm1371_vm0, %v1348_v53, %v1284_v3  ;;  %v1392_v22 = vsel %vm1371_vm0, %v1284_v3, %v1348_v53 }
 0x147   :  { %2321 = vmatprep.subr.bf16.mxu0 %v2290_v7  ;;  %v1607_v42 = vpop.permute.xlu1 %1606  ;;  %v1476_v33 = vmul.f32 %v3358_v59, %v1424_v47  ;;  %v1542_v54 = vadd.f32 %v1478_v10, %v3861_v46  ;;  %v1541_v17 = vadd.f32 %v1392_v22, %v3827_v20 }
 0x148   :  { %2322 = vmatpush1.bf16.msra.mxu0 %v2289_v25 }
 0x149   :  { %v1605_v51 = vpop.permute.xlu0 %1604  ;;  %v1540_v4 = vadd.f32 %v1476_v33, %v3863_v19 }
 0x14b   :  { %v1671_v35 = vpop.permute.xlu1 %1670 }
 0x14c   :  { %v1714_v15 = vsel %vm1692_vm5, %v1607_v42, %v1671_v35  ;;  %v1746_v34 = vsel %vm1692_vm5, %v1671_v35, %v1607_v42 }
 0x14d   :  { %v1669_v48 = vpop.permute.xlu0 %1668  ;;  %v1800_v1 = vmul.f32 %v3527_v5, %v1746_v34  ;;  %v1863_v18 = vadd.f32 %v1714_v15, %v1542_v54 }
 0x14e   :  { %v1713_v29 = vsel %vm1692_vm5, %v1605_v51, %v1669_v48  ;;  %v1745_v46 = vsel %vm1692_vm5, %v1669_v48, %v1605_v51 }
 0x14f   :  { %v1798_v43 = vmul.f32 %v3527_v5, %v1745_v46  ;;  %v1861_v24 = vadd.f32 %v1713_v29, %v1540_v4  ;;  %v1864_v41 = vadd.f32 %v1800_v1, %v1543_v23  ;;  %v1927_v3 = vmul.f32 0.25, %v1863_v18  ;;  %v1290_v36 = vpop.permute.xlu1 %1289 }
 0x151   :  { %v1862_v40 = vadd.f32 %v1798_v43, %v1541_v17  ;;  %v1925_v19 = vmul.f32 0.25, %v1861_v24  ;;  %v1288_v25 = vpop.permute.xlu0 %1287  ;;  %v1928_v2 = vmul.f32 0.25, %v1864_v41 }
 0x153   :  { %v1926_v32 = vmul.f32 0.25, %v1862_v40  ;;  %v2291_v53 = vpack.c.bf16 %v1927_v3, %v1925_v19  ;;  %v1354_v7 = vpop.permute.xlu1 %1353 }
 0x154   :  { %v1427_v47 = vsel %vm1371_vm0, %v1354_v7, %v1290_v36  ;;  %v1395_v54 = vsel %vm1371_vm0, %v1290_v36, %v1354_v7  ;;  %v570_v7 = vadd.s32 128, %v2957_v14 }
 0x155   :  { %v1352_v10 = vpop.permute.xlu0 %1351  ;;  %v2292_v42 = vpack.c.bf16 %v1928_v2, %v1926_v32  ;;  %v1482_v33 = vmul.f32 %v3358_v59, %v1427_v47  ;;  %v1547_v34 = vadd.f32 %v1395_v54, %v3938_v63  ;;  %v4528_v47 = vmul.u32 2, %v3240_v26 }
 0x156   :  { %v1426_v20 = vsel %vm1371_vm0, %v1352_v10, %v1288_v25  ;;  %v1394_v35 = vsel %vm1371_vm0, %v1288_v25, %v1352_v10 }
 0x157   :  { %2323 = vmatprep.subr.bf16.mxu0 %v2292_v42  ;;  %v1611_v51 = vpop.permute.xlu1 %1610  ;;  %v1480_v56 = vmul.f32 %v3358_v59, %v1426_v20  ;;  %v1546_v23 = vadd.f32 %v1482_v33, %v3977_v6  ;;  %v1545_v63 = vadd.f32 %v1394_v35, %v3942_v45  ;;  %v571_v20 = vadd.s32 136, %v2957_v14 }
 0x158   :  { %2324 = vmatpush1.bf16.msra.mxu0 %v2291_v53  ;;  %vm2142_vm4 = vcmp.eq.s32.totalorder %v570_v7, %v4528_v47  ;;  %vm2126_vm10 = vcmp.eq.s32.totalorder %v2957_v14, %v4528_v47  ;;  %vm2127_vm13 = vcmp.eq.s32.totalorder %v4391_v39, %v4528_v47 }
 0x159   :  { %v1609_v22 = vpop.permute.xlu0 %1608  ;;  %v1544_v1 = vadd.f32 %v1480_v56, %v3979_v11  ;;  %vm2143_vm6 = vcmp.eq.s32.totalorder %v571_v20, %v4528_v47 }
 0x15b   :  { %v1675_v15 = vpop.permute.xlu1 %1674 }
 0x15c   :  { %v1716_v4 = vsel %vm1692_vm5, %v1611_v51, %v1675_v15  ;;  %v1748_v48 = vsel %vm1692_vm5, %v1675_v15, %v1611_v51 }
 0x15d   :  { %v1673_v18 = vpop.permute.xlu0 %1672  ;;  %v1804_v29 = vmul.f32 %v3527_v5, %v1748_v48  ;;  %v1867_v46 = vadd.f32 %v1716_v4, %v1546_v23  ;;  %v4543_v23 = vadd.s32 1, %v4528_v47  ;;  %v572_v4 = vadd.s32 144, %v2957_v14 }
 0x15e   :  { %v1715_v17 = vsel %vm1692_vm5, %v1609_v22, %v1673_v18  ;;  %v1747_v6 = vsel %vm1692_vm5, %v1673_v18, %v1609_v22  ;;  %v4551_v48 = vadd.s32 24, %v2957_v14 }
 0x15f   :  { %v1802_v43 = vmul.f32 %v3527_v5, %v1747_v6  ;;  %v1865_v24 = vadd.f32 %v1715_v17, %v1544_v1  ;;  %v1868_v41 = vadd.f32 %v1804_v29, %v1547_v34  ;;  %v1931_v3 = vmul.f32 0.25, %v1867_v46  ;;  %v1294_v36 = vpop.permute.xlu1 %1293 }
 0x160   :  { %v4546_v34 = vadd.s32 16, %v2957_v14  ;;  %vm2175_vm7 = vcmp.eq.s32.totalorder %v570_v7, %v4543_v23  ;;  %vm2176_vm8 = vcmp.eq.s32.totalorder %v571_v20, %v4543_v23  ;;  %v573_v1 = vadd.s32 152, %v2957_v14 }
 0x161   :  { %v1866_v40 = vadd.f32 %v1802_v43, %v1545_v63  ;;  %v1929_v11 = vmul.f32 0.25, %v1865_v24  ;;  %v1292_v19 = vpop.permute.xlu0 %1291  ;;  %v1932_v25 = vmul.f32 0.25, %v1868_v41  ;;  %vm4558_vm9 = vmor %vm2142_vm4, %vm2175_vm7  ;;  %vm2159_vm11 = vcmp.eq.s32.totalorder %v2957_v14, %v4543_v23 }
 0x162   :  { %vm2208_vm12 = vmor %vm2143_vm6, %vm2176_vm8  ;;  %vm2160_vm4 = vcmp.eq.s32.totalorder %v4391_v39, %v4543_v23  ;;  %vm2144_vm1 = vcmp.eq.s32.totalorder %v572_v4, %v4528_v47  ;;  %vm2177_vm6 = vcmp.eq.s32.totalorder %v572_v4, %v4543_v23  ;;  %v575_v39 = vadd.s32 168, %v2957_v14 }
 0x163   :  { %v1930_v2 = vmul.f32 0.25, %v1866_v40  ;;  %v2293_v32 = vpack.c.bf16 %v1931_v3, %v1929_v11  ;;  %v1358_v53 = vpop.permute.xlu1 %1357  ;;  %vm2679_vm7 = vmpackc.low %vm2208_vm12, %vm4558_vm9  ;;  %vm2145_vm12 = vcmp.eq.s32.totalorder %v573_v1, %v4528_v47  ;;  %v576_v4 = vadd.s32 176, %v2957_v14 }
 0x164   :  { %v1429_v45 = vsel %vm1371_vm0, %v1358_v53, %v1294_v36  ;;  %v1397_v51 = vsel %vm1371_vm0, %v1294_v36, %v1358_v53  ;;  %2695 = vmatprep.subr.msk.bf16.mxu1 %vm2679_vm7, %v2849_v21  ;;  %vm4592_vm8 = vmor %vm2126_vm10, %vm2159_vm11  ;;  %vm2178_vm7 = vcmp.eq.s32.totalorder %v573_v1, %v4543_v23  ;;  %vm2128_vm11 = vcmp.eq.s32.totalorder %v4546_v34, %v4528_v47 }
 0x165   :  { %v1356_v10 = vpop.permute.xlu0 %1355  ;;  %v2294_v42 = vpack.c.bf16 %v1932_v25, %v1930_v2  ;;  %v1486_v56 = vmul.f32 %v3358_v59, %v1429_v45  ;;  %v1551_v18 = vadd.f32 %v1397_v51, %v4050_v62  ;;  %vm2192_vm9 = vmor %vm2127_vm13, %vm2160_vm4  ;;  %v574_v2 = vadd.s32 160, %v2957_v14 }
 0x166   :  { %v1428_v33 = vsel %vm1371_vm0, %v1356_v10, %v1292_v19  ;;  %v1396_v22 = vsel %vm1371_vm0, %v1292_v19, %v1356_v10  ;;  %vm2663_vm10 = vmpackc.low %vm2192_vm9, %vm4592_vm8  ;;  %vm2161_vm4 = vcmp.eq.s32.totalorder %v4546_v34, %v4543_v23  ;;  %vm2129_vm9 = vcmp.eq.s32.totalorder %v4551_v48, %v4528_v47 }
 0x167   :  { %2325 = vmatprep.subr.bf16.mxu0 %v2294_v42  ;;  %v1484_v54 = vmul.f32 %v3358_v59, %v1428_v33  ;;  %v1615_v35 = vpop.permute.xlu1 %1614  ;;  %v1549_v29 = vadd.f32 %v1396_v22, %v4054_v49  ;;  %v1550_v17 = vadd.f32 %v1486_v56, %v4088_v30  ;;  %2696 = vmatpush3.bf16.msk.msra.mxu1 %vm2663_vm10, %v2849_v21  ;;  %vm2209_vm13 = vmor %vm2144_vm1, %vm2177_vm6  ;;  %v4627_v33 = vadd.s32 32, %v2957_v14 }
 0x168   :  { %2326 = vmatpush1.bf16.msra.mxu0 %v2293_v32  ;;  %vm2210_vm8 = vmor %vm2145_vm12, %vm2178_vm7  ;;  %vm2162_vm10 = vcmp.eq.s32.totalorder %v4551_v48, %v4543_v23  ;;  %vm2146_vm12 = vcmp.eq.s32.totalorder %v574_v2, %v4528_v47  ;;  %vm2179_vm7 = vcmp.eq.s32.totalorder %v574_v2, %v4543_v23  ;;  %v4652_v1 = vadd.s32 48, %v2957_v14 }
 0x169   :  { %v1613_v15 = vpop.permute.xlu0 %1612  ;;  %v1548_v63 = vadd.f32 %v1484_v54, %v4090_v27  ;;  %vm2681_vm1 = vmpackc.low %vm2210_vm8, %vm2209_vm13  ;;  %vm2147_vm8 = vcmp.eq.s32.totalorder %v575_v39, %v4528_v47  ;;  %v578_v3 = vadd.s32 192, %v2957_v14 }
 0x16a   :  { %2697 = vmatprep.subr.msk.bf16.mxu1 %vm2681_vm1, %v2849_v21  ;;  %vm4633_vm6 = vmor %vm2128_vm11, %vm2161_vm4  ;;  %vm2180_vm1 = vcmp.eq.s32.totalorder %v575_v39, %v4543_v23 }
 0x16b   :  { %v1679_v6 = vpop.permute.xlu1 %1678  ;;  %vm2194_vm13 = vmor %vm2129_vm9, %vm2162_vm10  ;;  %vm2130_vm9 = vcmp.eq.s32.totalorder %v4627_v33, %v4528_v47  ;;  %vm2163_vm10 = vcmp.eq.s32.totalorder %v4627_v33, %v4543_v23 }
 0x16c   :  { %v1718_v62 = vsel %vm1692_vm5, %v1615_v35, %v1679_v6  ;;  %v1750_v49 = vsel %vm1692_vm5, %v1679_v6, %v1615_v35  ;;  %vm2665_vm11 = vmpackc.low %vm2194_vm13, %vm4633_vm6  ;;  %v4668_v6 = vadd.s32 56, %v2957_v14 }
 0x16d   :  { %v1677_v43 = vpop.permute.xlu0 %1676  ;;  %v1808_v30 = vmul.f32 %v3527_v5, %v1750_v49  ;;  %v1871_v27 = vadd.f32 %v1718_v62, %v1550_v17  ;;  %2698 = vmatpush3.bf16.msk.msra.mxu1 %vm2665_vm11, %v2849_v21  ;;  %vm4657_vm4 = vmor %vm2146_vm12, %vm2179_vm7  ;;  %vm2132_vm11 = vcmp.eq.s32.totalorder %v4652_v1, %v4528_v47 }
 0x16e   :  { %v1717_v24 = vsel %vm1692_vm5, %v1613_v15, %v1677_v43  ;;  %v1749_v41 = vsel %vm1692_vm5, %v1677_v43, %v1613_v15  ;;  %v4646_v15 = vadd.s32 40, %v2957_v14  ;;  %vm2212_vm6 = vmor %vm2147_vm8, %vm2180_vm1  ;;  %vm2148_vm1 = vcmp.eq.s32.totalorder %v576_v4, %v4528_v47 }
 0x16f   :  { %v1806_v36 = vmul.f32 %v3527_v5, %v1749_v41  ;;  %v1869_v40 = vadd.f32 %v1717_v24, %v1548_v63  ;;  %v1872_v11 = vadd.f32 %v1808_v30, %v1551_v18  ;;  %v1935_v19 = vmul.f32 0.25, %v1871_v27  ;;  %v1298_v25 = vpop.permute.xlu1 %1297  ;;  %vm2683_vm13 = vmpackc.low %vm2212_vm6, %vm4657_vm4 }
 0x170   :  { %vm2131_vm12 = vcmp.eq.s32.totalorder %v4646_v15, %v4528_v47  ;;  %vm2164_vm7 = vcmp.eq.s32.totalorder %v4646_v15, %v4543_v23  ;;  %2699 = vmatprep.subr.msk.bf16.mxu1 %vm2683_vm13, %v2849_v21  ;;  %vm4692_vm8 = vmor %vm2130_vm9, %vm2163_vm10  ;;  %vm2181_vm4 = vcmp.eq.s32.totalorder %v576_v4, %v4543_v23  ;;  %vm2133_vm6 = vcmp.eq.s32.totalorder %v4668_v6, %v4528_v47 }
 0x171   :  { %v1870_v32 = vadd.f32 %v1806_v36, %v1549_v29  ;;  %v1933_v53 = vmul.f32 0.25, %v1869_v40  ;;  %v1296_v7 = vpop.permute.xlu0 %1295  ;;  %v1936_v45 = vmul.f32 0.25, %v1872_v11  ;;  %v577_v29 = vadd.s32 184, %v2957_v14  ;;  %vm4700_vm2 = vmor %vm2131_vm12, %vm2164_vm7 }
 0x172   :  { %vm2165_vm9 = vcmp.eq.s32.totalorder %v4652_v1, %v4543_v23  ;;  %vm2166_vm10 = vcmp.eq.s32.totalorder %v4668_v6, %v4543_v23  ;;  %vm2667_vm12 = vmpackc.low %vm4700_vm2, %vm4692_vm8  ;;  %v579_v36 = vadd.s32 200, %v2957_v14  ;;  %v580_v4 = vadd.s32 208, %v2957_v14 }
 0x173   :  { %v1934_v10 = vmul.f32 0.25, %v1870_v32  ;;  %v2295_v42 = vpack.c.bf16 %v1935_v19, %v1933_v53  ;;  %v1362_v20 = vpop.permute.xlu1 %1361  ;;  %vm2149_vm13 = vcmp.eq.s32.totalorder %v577_v29, %v4528_v47  ;;  %vm2182_vm3 = vcmp.eq.s32.totalorder %v577_v29, %v4543_v23  ;;  %2700 = vmatpush3.bf16.msk.msra.mxu1 %vm2667_vm12, %v2849_v21  ;;  %vm2213_vm2 = vmor %vm2148_vm1, %vm2181_vm4 }
 0x174   :  { %v1431_v56 = vsel %vm1371_vm0, %v1362_v20, %v1298_v25  ;;  %v1399_v49 = vsel %vm1371_vm0, %v1298_v25, %v1362_v20  ;;  %vm2214_vm7 = vmor %vm2149_vm13, %vm2182_vm3  ;;  %vm2150_vm1 = vcmp.eq.s32.totalorder %v578_v3, %v4528_v47  ;;  %vm2183_vm4 = vcmp.eq.s32.totalorder %v578_v3, %v4543_v23 }
 0x175   :  { %v1360_v22 = vpop.permute.xlu0 %1359  ;;  %v2296_v54 = vpack.c.bf16 %v1936_v45, %v1934_v10  ;;  %v1490_v46 = vmul.f32 %v3358_v59, %v1431_v56  ;;  %v1555_v40 = vadd.f32 %v1399_v49, %v4161_v61  ;;  %v4742_v45 = vadd.s32 64, %v2957_v14  ;;  %vm2685_vm8 = vmpackc.low %vm2214_vm7, %vm2213_vm2 }
 0x176   :  { %v1430_v35 = vsel %vm1371_vm0, %v1360_v22, %v1296_v7  ;;  %v1398_v27 = vsel %vm1371_vm0, %v1296_v7, %v1360_v22  ;;  %2701 = vmatprep.subr.msk.bf16.mxu1 %vm2685_vm8, %v2849_v21  ;;  %vm4751_vm3 = vmor %vm2132_vm11, %vm2165_vm9  ;;  %vm2151_vm12 = vcmp.eq.s32.totalorder %v579_v36, %v4528_v47  ;;  %vm2184_vm11 = vcmp.eq.s32.totalorder %v579_v36, %v4543_v23 }
 0x177   :  { %2327 = vmatprep.subr.bf16.mxu0 %v2296_v54  ;;  %v1619_v17 = vpop.permute.xlu1 %1618  ;;  %v1488_v63 = vmul.f32 %v3358_v59, %v1430_v35  ;;  %v1554_v24 = vadd.f32 %v1490_v46, %v4197_v8  ;;  %vm2198_vm13 = vmor %vm2133_vm6, %vm2166_vm10  ;;  %v4766_v35 = vadd.s32 72, %v2957_v14  ;;  %vm2134_vm2 = vcmp.eq.s32.totalorder %v4742_v45, %v4528_v47 }
 0x178   :  { %2328 = vmatpush1.bf16.msra.mxu0 %v2295_v42  ;;  %vm2669_vm9 = vmpackc.low %vm2198_vm13, %vm4751_vm3  ;;  %vm2167_vm10 = vcmp.eq.s32.totalorder %v4742_v45, %v4543_v23  ;;  %v581_v46 = vadd.s32 216, %v2957_v14  ;;  %v4790_v30 = vadd.s32 80, %v2957_v14 }
 0x179   :  { %v1617_v62 = vpop.permute.xlu0 %1616  ;;  %v1552_v8 = vadd.f32 %v1488_v63, %v4199_v28  ;;  %v1553_v28 = vadd.f32 %v1398_v27, %v4165_v12  ;;  %2702 = vmatpush3.bf16.msk.msra.mxu1 %vm2669_vm9, %v2849_v21  ;;  %vm2215_vm6 = vmor %vm2150_vm1, %vm2183_vm4  ;;  %vm2135_vm8 = vcmp.eq.s32.totalorder %v4766_v35, %v4528_v47  ;;  %vm2168_vm3 = vcmp.eq.s32.totalorder %v4766_v35, %v4543_v23  ;;  %v5314_v27 = vld [vmem:[#allocation11_spill] sm:$0xff] }
 0x17a   :  { %vm2216_vm7 = vmor %vm2151_vm12, %vm2184_vm11  ;;  %vm2152_vm4 = vcmp.eq.s32.totalorder %v580_v4, %v4528_v47  ;;  %vm2185_vm12 = vcmp.eq.s32.totalorder %v580_v4, %v4543_v23  ;;  %vm2153_vm9 = vcmp.eq.s32.totalorder %v581_v46, %v4528_v47 }
 0x17b   :  { %v1683_v41 = vpop.permute.xlu1 %1682  ;;  %vm2687_vm13 = vmpackc.low %vm2216_vm7, %vm2215_vm6  ;;  %vm2186_vm6 = vcmp.eq.s32.totalorder %v581_v46, %v4543_v23  ;;  %vm2136_vm7 = vcmp.eq.s32.totalorder %v4790_v30, %v4528_v47  ;;  %v5310_v46 = vld [vmem:[#allocation12_spill] sm:$0xff] }
 0x17c   :  { %v1720_v11 = vsel %vm1692_vm5, %v1619_v17, %v1683_v41  ;;  %v1752_v19 = vsel %vm1692_vm5, %v1683_v41, %v1619_v17  ;;  %2703 = vmatprep.subr.msk.bf16.mxu1 %vm2687_vm13, %v2849_v21  ;;  %vm4796_vm1 = vmor %vm2134_vm2, %vm2167_vm10  ;;  %v583_v41 = vadd.s32 232, %v2957_v14 }
 0x17d   :  { %v1681_v25 = vpop.permute.xlu0 %1680  ;;  %v1812_v2 = vmul.f32 %v3527_v5, %v1752_v19  ;;  %v1875_v32 = vadd.f32 %v1720_v11, %v1554_v24  ;;  %vm2200_vm11 = vmor %vm2135_vm8, %vm2168_vm3  ;;  %v582_v24 = vadd.s32 224, %v2957_v14  ;;  %vm2169_vm8 = vcmp.eq.s32.totalorder %v4790_v30, %v4543_v23 }
 0x17e   :  { %v1719_v61 = vsel %vm1692_vm5, %v1617_v62, %v1681_v25  ;;  %v1751_v53 = vsel %vm1692_vm5, %v1681_v25, %v1617_v62  ;;  %vm2671_vm2 = vmpackc.low %vm2200_vm11, %vm4796_vm1  ;;  %v4833_v25 = vadd.s32 248, %v2957_v14  ;;  %vm2155_vm11 = vcmp.eq.s32.totalorder %v583_v41, %v4528_v47 }
 0x17f   :  { %v1810_v7 = vmul.f32 %v3527_v5, %v1751_v53  ;;  %v1873_v39 = vadd.f32 %v1719_v61, %v1552_v8  ;;  %v1876_v10 = vadd.f32 %v1812_v2, %v1555_v40  ;;  %v1939_v42 = vmul.f32 0.25, %v1875_v32  ;;  %v1302_v20 = vpop.permute.xlu1 %1301  ;;  %2704 = vmatpush3.bf16.msk.msra.mxu1 %vm2671_vm2, %v2849_v21  ;;  %vm2217_vm10 = vmor %vm2152_vm4, %vm2185_vm12 }
 0x180   :  { %v4808_v40 = vadd.s32 88, %v2957_v14  ;;  %vm2218_vm3 = vmor %vm2153_vm9, %vm2186_vm6  ;;  %vm2154_vm12 = vcmp.eq.s32.totalorder %v582_v24, %v4528_v47  ;;  %vm2187_vm6 = vcmp.eq.s32.totalorder %v582_v24, %v4543_v23  ;;  %vm2188_vm2 = vcmp.eq.s32.totalorder %v583_v41, %v4543_v23 }
 0x181   :  { %v1874_v51 = vadd.f32 %v1810_v7, %v1553_v28  ;;  %v1937_v56 = vmul.f32 0.25, %v1873_v39  ;;  %v1300_v22 = vpop.permute.xlu0 %1299  ;;  %v1940_v54 = vmul.f32 0.25, %v1876_v10  ;;  %vm2689_vm4 = vmpackc.low %vm2218_vm3, %vm2217_vm10  ;;  %v5315_v24 = vrot.slane %v5314_v27, 1 }
 0x182   :  { %vm2137_vm13 = vcmp.eq.s32.totalorder %v4808_v40, %v4528_v47  ;;  %vm2170_vm1 = vcmp.eq.s32.totalorder %v4808_v40, %v4543_v23  ;;  %2705 = vmatprep.subr.msk.bf16.mxu1 %vm2689_vm4, %v2849_v21  ;;  %vm4841_vm9 = vmor %vm2136_vm7, %vm2169_vm8  ;;  %vm716_vm8 = vcmp.ne.s32.totalorder %v4833_v25, 255 }
 0x183   :  { %v1938_v18 = vmul.f32 0.25, %v1874_v51  ;;  %v2297_v29 = vpack.c.bf16 %v1939_v42, %v1937_v56  ;;  %v1366_v17 = vpop.permute.xlu1 %1365  ;;  %vm2202_vm10 = vmor %vm2137_vm13, %vm2170_vm1  ;;  %vm5313_vm1 = vcmp.lt.s32.totalorder %v2957_v14, 7 }
 0x184   :  { %v1433_v63 = vsel %vm1371_vm0, %v1366_v17, %v1302_v20  ;;  %v1401_v8 = vsel %vm1371_vm0, %v1302_v20, %v1366_v17  ;;  %vm2673_vm7 = vmpackc.low %vm2202_vm10, %vm4841_vm9  ;;  %v5311_v17 = vrot.slane %v5310_v46, 1 }
 0x185   :  { %v1364_v62 = vpop.permute.xlu0 %1363  ;;  %v2298_v49 = vpack.c.bf16 %v1940_v54, %v1938_v18  ;;  %v1494_v3 = vmul.f32 %v3358_v59, %v1433_v63  ;;  %v1559_v28 = vadd.f32 %v1401_v8, %v4267_v13  ;;  %2706 = vmatpush3.bf16.msk.msra.mxu1 %vm2673_vm7, %v2849_v21  ;;  %vm2219_vm3 = vmor %vm2154_vm12, %vm2187_vm6  ;;  %v5312_v63 = vrot.slane %v5281_v16, 1 }
 0x186   :  { %v1432_v43 = vsel %vm1371_vm0, %v1364_v62, %v1300_v22  ;;  %v1400_v2 = vsel %vm1371_vm0, %v1300_v22, %v1364_v62  ;;  %vm2220_vm13 = vmor %vm2155_vm11, %vm2188_vm2  ;;  %vm5320_vm11 = vcmp.lt.s32.totalorder %v2957_v14, 1 }
 0x187   :  { %2329 = vmatprep.subr.bf16.mxu0 %v2298_v49  ;;  %v1623_v36 = vpop.permute.xlu1 %1622  ;;  %v1492_v11 = vmul.f32 %v3358_v59, %v1432_v43  ;;  %v1558_v32 = vadd.f32 %v1494_v3, %v4296_v52  ;;  %v1113_v62 = vsel %vm5313_vm1, %v5312_v63, %v5311_v17  ;;  %vm2691_vm4 = vmpackc.low %vm2220_vm13, %vm2219_vm3  ;;  %v2628_v43 = vsel %vm716_vm8, 1.0, %v5238_v55 }
 0x188   :  { %2330 = vmatpush1.bf16.msra.mxu0 %v2297_v29  ;;  %v5316_v3 = vrot.slane %v5280_v31, 1  ;;  %vm5317_vm12 = vmmov %vm5313_vm1  ;;  %2707 = vmatprep.subr.msk.bf16.mxu1 %vm2691_vm4, %v2849_v21  ;;  %v1177_v8 = vmul.f32 %v2628_v43, %v1113_v62  ;;  %v5318_v55 = vrot.slane %v5281_v16, 7 }
 0x189   :  { %v1621_v19 = vpop.permute.xlu0 %1620  ;;  %v1556_v52 = vadd.f32 %v1492_v11, %v4298_v0  ;;  %v1557_v0 = vadd.f32 %v1400_v2, %v4271_v44  ;;  %vm5323_vm9 = vmmov %vm5320_vm11 }
 0x18a   :  { %v1114_v41 = vsel %vm5317_vm12, %v5316_v3, %v5315_v24 }
 0x18b   :  { %v1687_v61 = vpop.permute.xlu1 %1686  ;;  %v1178_v2 = vmul.f32 %v2628_v43, %v1114_v41 }
 0x18c   :  { %v1722_v7 = vsel %vm1692_vm5, %v1623_v36, %v1687_v61  ;;  %v1754_v39 = vsel %vm1692_vm5, %v1687_v61, %v1623_v36 }
 0x18d   :  { %v1685_v10 = vpop.permute.xlu0 %1684  ;;  %v1816_v42 = vmul.f32 %v3527_v5, %v1754_v39  ;;  %v1879_v20 = vadd.f32 %v1722_v7, %v1558_v32  ;;  %v5321_v39 = vrot.slane %v5280_v31, 7 }
 0x18e   :  { %v1721_v13 = vsel %vm1692_vm5, %v1621_v19, %v1685_v10  ;;  %v1753_v12 = vsel %vm1692_vm5, %v1685_v10, %v1621_v19 }
 0x18f   :  { %v1814_v51 = vmul.f32 %v3527_v5, %v1753_v12  ;;  %v1877_v56 = vadd.f32 %v1721_v13, %v1556_v52  ;;  %v1880_v22 = vadd.f32 %v1816_v42, %v1559_v28  ;;  %v1943_v54 = vmul.f32 0.25, %v1879_v20  ;;  %v1306_v4 = vpop.permute.xlu1 %1305 }
 0x190   :  { %v5319_v28 = vrot.slane %v4263_v50, 7  ;;  %v5322_v52 = vrot.slane %v4228_v38, 7  ;;  %v1951_v50 = vmul.u32 2, %v4546_v34 }
 0x191   :  { %v1878_v44 = vadd.f32 %v1814_v51, %v1557_v0  ;;  %v1941_v18 = vmul.f32 0.25, %v1877_v56  ;;  %v1304_v29 = vpop.permute.xlu0 %1303  ;;  %v1944_v49 = vmul.f32 0.25, %v1880_v22  ;;  %v1952_v51 = vmul.u32 2, %v4551_v48 }
 0x192   :  { %v858_v7 = vsel %vm5320_vm11, %v5319_v28, %v5318_v55  ;;  %v859_v10 = vsel %vm5323_vm9, %v5322_v52, %v5321_v39  ;;  %vm1969_vm8 = vcmp.eq.s32.totalorder %v3240_v26, %v1951_v50  ;;  %vm5328_vm9 = vmpackc.low %vm4439_vm15, %vm4427_vm14  ;;  %v1956_v55 = vmul.u32 2, %v4668_v6 }
 0x193   :  { %v1942_v36 = vmul.f32 0.25, %v1878_v44  ;;  %v2299_v11 = vpack.c.bf16 %v1943_v54, %v1941_v18  ;;  %v1370_v19 = vpop.permute.xlu1 %1369  ;;  %v1241_v13 = vadd.f32 %v1177_v8, %v858_v7  ;;  %v1242_v12 = vadd.f32 %v1178_v2, %v859_v10 }
 0x194   :  { %v1435_v32 = vsel %vm1371_vm0, %v1370_v19, %v1306_v4  ;;  %v1403_v38 = vsel %vm1371_vm0, %v1306_v4, %v1370_v19  ;;  %v1999_v44 = vadd.s32 1, %v1951_v50  ;;  %v2000_v27 = vadd.s32 1, %v1952_v51 }
 0x195   :  { %v1368_v61 = vpop.permute.xlu0 %1367  ;;  %v2300_v53 = vpack.c.bf16 %v1944_v49, %v1942_v36  ;;  %v1498_v20 = vmul.f32 %v3358_v59, %v1435_v32  ;;  %v1563_v18 = vadd.f32 %v1403_v38, %v1242_v12  ;;  %vm1972_vm6 = vcmp.eq.s32.totalorder %v5286_v37, %v1952_v51 }
 0x196   :  { %v1434_v42 = vsel %vm1371_vm0, %v1368_v61, %v1304_v29  ;;  %v1402_v56 = vsel %vm1371_vm0, %v1304_v29, %v1368_v61  ;;  %vm1970_vm0 = vcmp.eq.s32.totalorder %v5286_v37, %v1951_v50  ;;  %vm2018_vm2 = vcmp.eq.s32.totalorder %v5286_v37, %v1999_v44 }
 0x197   :  { %2331 = vmatprep.subr.bf16.mxu0 %v2300_v53  ;;  %v1627_v16 = vpop.permute.xlu1 %1626  ;;  %v1496_v0 = vmul.f32 %v3358_v59, %v1434_v42  ;;  %v1562_v54 = vadd.f32 %v1498_v20, %v1241_v13  ;;  %v1561_v62 = vadd.f32 %v1402_v56, %v4347_v9  ;;  %vm4934_vm10 = vmor %vm1970_vm0, %vm2018_vm2  ;;  %vm2017_vm3 = vcmp.eq.s32.totalorder %v3240_v26, %v1999_v44 }
 0x198   :  { %2332 = vmatpush1.bf16.msra.mxu0 %v2299_v11  ;;  %v1953_v11 = vmul.u32 2, %v4627_v33  ;;  %vm1971_vm1 = vcmp.eq.s32.totalorder %v3240_v26, %v1952_v51  ;;  %vm2019_vm4 = vcmp.eq.s32.totalorder %v3240_v26, %v2000_v27  ;;  %v1955_v33 = vmul.u32 2, %v4652_v1  ;;  %vm4959_vm0 = vmor %vm1969_vm8, %vm2017_vm3 }
 0x199   :  { %v1625_v31 = vpop.permute.xlu0 %1624  ;;  %v1560_v59 = vadd.f32 %v1496_v0, %v4366_v58  ;;  %v2004_v28 = vadd.s32 1, %v1956_v55  ;;  %v1957_v6 = vmul.u32 2, %v4742_v45  ;;  %v1958_v39 = vmul.u32 2, %v4766_v35 }
 0x19a   :  { %v2001_v61 = vadd.s32 1, %v1953_v11  ;;  %vm1974_vm12 = vcmp.eq.s32.totalorder %v5286_v37, %v1953_v11  ;;  %v2003_v60 = vadd.s32 1, %v1955_v33  ;;  %vm1973_vm15 = vcmp.eq.s32.totalorder %v3240_v26, %v1953_v11 }
 0x19b   :  { %v1691_v22 = vpop.permute.xlu1 %1690  ;;  %v2005_v10 = vadd.s32 1, %v1957_v6  ;;  %v2006_v42 = vadd.s32 1, %v1958_v39  ;;  %v1959_v35 = vmul.u32 2, %v4790_v30  ;;  %v5040_v0 = vadd.s32 96, %v2957_v14 }
 0x19c   :  { %v1724_v46 = vsel %vm1692_vm5, %v1627_v16, %v1691_v22  ;;  %v1756_v34 = vsel %vm1692_vm5, %v1691_v22, %v1627_v16  ;;  %vm2022_vm11 = vcmp.eq.s32.totalorder %v5286_v37, %v2001_v61  ;;  %vm2021_vm8 = vcmp.eq.s32.totalorder %v3240_v26, %v2001_v61 }
 0x19d   :  { %v1689_v17 = vpop.permute.xlu0 %1688  ;;  %v1820_v4 = vmul.f32 %v3527_v5, %v1756_v34  ;;  %v1883_v63 = vadd.f32 %v1724_v46, %v1562_v54  ;;  %v1960_v16 = vmul.u32 2, %v4808_v40  ;;  %v2007_v12 = vadd.s32 1, %v1959_v35 }
 0x19e   :  { %v1723_v48 = vsel %vm1692_vm5, %v1625_v31, %v1689_v17  ;;  %v1755_v29 = vsel %vm1692_vm5, %v1689_v17, %v1625_v31  ;;  %vm2020_vm5 = vcmp.eq.s32.totalorder %v5286_v37, %v2000_v27  ;;  %v5043_v40 = vadd.s32 104, %v2957_v14 }
 0x19f   :  { %v1818_v49 = vmul.f32 %v3527_v5, %v1755_v29  ;;  %v1881_v43 = vadd.f32 %v1723_v48, %v1560_v59  ;;  %v1884_v24 = vadd.f32 %v1820_v4, %v1563_v18  ;;  %v1947_v3 = vmul.f32 0.25, %v1883_v63  ;;  %vm4938_vm7 = vmor %vm1972_vm6, %vm2020_vm5 }
 0x1a0   :  { %v1954_v5 = vmul.u32 2, %v4646_v15  ;;  %vm2635_vm13 = vmpackc.low %vm4938_vm7, %vm4934_vm10  ;;  %v2008_v31 = vadd.s32 1, %v1960_v16  ;;  %v1961_v38 = vmul.u32 2, %v5040_v0  ;;  %v5082_v46 = vadd.s32 112, %v2957_v14 }
 0x1a1   :  { %v1882_v41 = vadd.f32 %v1818_v49, %v1561_v62  ;;  %v1945_v58 = vmul.f32 0.25, %v1881_v43  ;;  %v1948_v36 = vmul.f32 0.25, %v1884_v24  ;;  %vm2051_vm5 = vmor %vm1971_vm1, %vm2019_vm4  ;;  %vm1978_vm4 = vcmp.eq.s32.totalorder %v5286_v37, %v1955_v33 }
 0x1a2   :  { %v2002_v53 = vadd.s32 1, %v1954_v5  ;;  %vm1976_vm6 = vcmp.eq.s32.totalorder %v5286_v37, %v1954_v5  ;;  %vm4967_vm10 = vmor %vm1974_vm12, %vm2022_vm11  ;;  %vm2026_vm12 = vcmp.eq.s32.totalorder %v5286_v37, %v2003_v60  ;;  %v1962_v56 = vmul.u32 2, %v5043_v40 }
 0x1a3   :  { %v1946_v19 = vmul.f32 0.25, %v1882_v41  ;;  %v2301_v8 = vpack.c.bf16 %v1947_v3, %v1945_v58  ;;  %vm2637_vm14 = vmpackc.low %vm2051_vm5, %vm4959_vm0  ;;  %vm2028_vm0 = vcmp.eq.s32.totalorder %v5286_v37, %v2004_v28  ;;  %v2009_v18 = vadd.s32 1, %v1961_v38 }
 0x1a4   :  { %vm2024_vm2 = vcmp.eq.s32.totalorder %v5286_v37, %v2002_v53  ;;  %vm2023_vm1 = vcmp.eq.s32.totalorder %v3240_v26, %v2002_v53  ;;  %vm4989_vm11 = vmor %vm1973_vm15, %vm2021_vm8  ;;  %vm1979_vm8 = vcmp.eq.s32.totalorder %v3240_v26, %v1956_v55  ;;  %v2010_v34 = vadd.s32 1, %v1962_v56 }
 0x1a5   :  { %v2302_v9 = vpack.c.bf16 %v1948_v36, %v1946_v19  ;;  %vm4971_vm7 = vmor %vm1976_vm6, %vm2024_vm2  ;;  %v5085_v59 = vadd.s32 120, %v2957_v14  ;;  %v1963_v17 = vmul.u32 2, %v5082_v46 }
 0x1a6   :  { %vm2639_vm3 = vmpackc.low %vm4971_vm7, %vm4967_vm10  ;;  %vm1977_vm7 = vcmp.eq.s32.totalorder %v3240_v26, %v1955_v33 }
 0x1a7   :  { %2333 = vmatprep.subr.bf16.mxu0 %v2302_v9  ;;  %vm4997_vm2 = vmor %vm1978_vm4, %vm2026_vm12  ;;  %vm1984_vm12 = vcmp.eq.s32.totalorder %v5286_v37, %v1958_v39  ;;  %v1964_v63 = vmul.u32 2, %v5085_v59  ;;  %v2011_v62 = vadd.s32 1, %v1963_v17 }
 0x1a8   :  { %2334 = vmatpush1.bf16.msra.mxu0 %v2301_v8 }
 0x1a9   :  { %v2012_v49 = vadd.s32 1, %v1964_v63 }
 0x1ab   :  { %2634 = vmatmul.mubr.msk.bf16.vlgmr.msra.gmra.mrb[0].mxu0 %vm5328_vm9, %v2849_v21  ;;  %vm1980_vm9 = vcmp.eq.s32.totalorder %v5286_v37, %v1956_v55 }
 0x1ac   :  { %2636 = vmatprep.mubr.msk.bf16.mxu0 %vm2635_vm13, %v2849_v21  ;;  %vm1975_vm13 = vcmp.eq.s32.totalorder %v3240_v26, %v1954_v5  ;;  %vm5001_vm5 = vmor %vm1980_vm9, %vm2028_vm0 }
 0x1ad   :  { %vm2055_vm6 = vmor %vm1975_vm13, %vm2023_vm1  ;;  %vm1982_vm13 = vcmp.eq.s32.totalorder %v5286_v37, %v1957_v6  ;;  %vm2030_vm1 = vcmp.eq.s32.totalorder %v5286_v37, %v2005_v10 }
 0x1ae   :  { %vm2641_vm10 = vmpackc.low %vm2055_vm6, %vm4989_vm11  ;;  %vm2032_vm11 = vcmp.eq.s32.totalorder %v5286_v37, %v2006_v42 }
 0x1af   :  { %vm2643_vm15 = vmpackc.low %vm5001_vm5, %vm4997_vm2  ;;  %vm1981_vm5 = vcmp.eq.s32.totalorder %v3240_v26, %v1957_v6 }
 0x1b0   :  { %vm5031_vm0 = vmor %vm1982_vm13, %vm2030_vm1  ;;  %vm1988_vm1 = vcmp.eq.s32.totalorder %v5286_v37, %v1960_v16 }
 0x1b1   :  { %vm5035_vm6 = vmor %vm1984_vm12, %vm2032_vm11 }
 0x1b3   :  { %2638 = vmatmul.mubr.msk.bf16.gmra.mrb[4].mxu0 %vm2637_vm14, %v2849_v21  ;;  %vm2025_vm14 = vcmp.eq.s32.totalorder %v3240_v26, %v2003_v60 }
 0x1b4   :  { %2640 = vmatprep.mubr.msk.bf16.mxu0 %vm2639_vm3, %v2849_v21  ;;  %vm2027_vm3 = vcmp.eq.s32.totalorder %v3240_v26, %v2004_v28  ;;  %vm5019_vm4 = vmor %vm1977_vm7, %vm2025_vm14  ;;  %vm1983_vm14 = vcmp.eq.s32.totalorder %v3240_v26, %v1958_v39 }
 0x1b5   :  { %vm5027_vm9 = vmor %vm1979_vm8, %vm2027_vm3  ;;  %vm1986_vm8 = vcmp.eq.s32.totalorder %v5286_v37, %v1959_v35  ;;  %vm2034_vm3 = vcmp.eq.s32.totalorder %v5286_v37, %v2007_v12 }
 0x1b6   :  { %vm2645_vm2 = vmpackc.low %vm5027_vm9, %vm5019_vm4  ;;  %vm2036_vm4 = vcmp.eq.s32.totalorder %v5286_v37, %v2008_v31 }
 0x1b7   :  { %vm2647_vm7 = vmpackc.low %vm5035_vm6, %vm5031_vm0  ;;  %vm1985_vm6 = vcmp.eq.s32.totalorder %v3240_v26, %v1959_v35 }
 0x1b8   :  { %vm5073_vm11 = vmor %vm1986_vm8, %vm2034_vm3  ;;  %vm1992_vm3 = vcmp.eq.s32.totalorder %v5286_v37, %v1962_v56 }
 0x1b9   :  { %vm5077_vm9 = vmor %vm1988_vm1, %vm2036_vm4 }
 0x1bb   :  { %2642 = vmatmul.mubr.msk.bf16.gmra.mrb[8].mxu0 %vm2641_vm10, %v2849_v21  ;;  %vm2029_vm10 = vcmp.eq.s32.totalorder %v3240_v26, %v2005_v10 }
 0x1bc   :  { %2644 = vmatprep.mubr.msk.bf16.mxu0 %vm2643_vm15, %v2849_v21  ;;  %vm2031_vm15 = vcmp.eq.s32.totalorder %v3240_v26, %v2006_v42  ;;  %vm5061_vm13 = vmor %vm1981_vm5, %vm2029_vm10  ;;  %vm1987_vm10 = vcmp.eq.s32.totalorder %v3240_v26, %v1960_v16 }
 0x1bd   :  { %vm5069_vm12 = vmor %vm1983_vm14, %vm2031_vm15  ;;  %vm1990_vm14 = vcmp.eq.s32.totalorder %v5286_v37, %v1961_v38  ;;  %vm2038_vm15 = vcmp.eq.s32.totalorder %v5286_v37, %v2009_v18 }
 0x1be   :  { %vm2649_vm0 = vmpackc.low %vm5069_vm12, %vm5061_vm13  ;;  %vm2040_vm13 = vcmp.eq.s32.totalorder %v5286_v37, %v2010_v34 }
 0x1bf   :  { %vm2651_vm5 = vmpackc.low %vm5077_vm9, %vm5073_vm11  ;;  %vm1989_vm9 = vcmp.eq.s32.totalorder %v3240_v26, %v1961_v38 }
 0x1c0   :  { %vm5111_vm4 = vmor %vm1990_vm14, %vm2038_vm15  ;;  %vm1996_vm15 = vcmp.eq.s32.totalorder %v5286_v37, %v1964_v63 }
 0x1c1   :  { %vm5115_vm12 = vmor %vm1992_vm3, %vm2040_vm13 }
 0x1c3   :  { %2646 = vmatmul.mubr.msk.bf16.gmra.mrb[12].mxu0 %vm2645_vm2, %v2849_v21  ;;  %vm2033_vm2 = vcmp.eq.s32.totalorder %v3240_v26, %v2007_v12 }
 0x1c4   :  { %2648 = vmatprep.mubr.msk.bf16.mxu0 %vm2647_vm7, %v2849_v21  ;;  %vm2035_vm7 = vcmp.eq.s32.totalorder %v3240_v26, %v2008_v31  ;;  %vm5103_vm8 = vmor %vm1985_vm6, %vm2033_vm2  ;;  %vm1991_vm2 = vcmp.eq.s32.totalorder %v3240_v26, %v1962_v56 }
 0x1c5   :  { %vm2067_vm1 = vmor %vm1987_vm10, %vm2035_vm7  ;;  %vm1994_vm10 = vcmp.eq.s32.totalorder %v5286_v37, %v1963_v17  ;;  %vm2042_vm7 = vcmp.eq.s32.totalorder %v5286_v37, %v2011_v62 }
 0x1c6   :  { %vm2653_vm11 = vmpackc.low %vm2067_vm1, %vm5103_vm8  ;;  %vm2044_vm8 = vcmp.eq.s32.totalorder %v5286_v37, %v2012_v49 }
 0x1c7   :  { %vm2655_vm6 = vmpackc.low %vm5115_vm12, %vm5111_vm4 }
 0x1c8   :  { %vm2074_vm13 = vmor %vm1994_vm10, %vm2042_vm7  ;;  %vm2138_vm10 = vcmp.eq.s32.totalorder %v5040_v0, %v4528_v47 }
 0x1c9   :  { %vm2076_vm1 = vmor %vm1996_vm15, %vm2044_vm8  ;;  %vm2171_vm15 = vcmp.eq.s32.totalorder %v5040_v0, %v4543_v23  ;;  %vm2172_vm8 = vcmp.eq.s32.totalorder %v5043_v40, %v4543_v23 }
 0x1ca   :  { %vm2659_vm12 = vmpackc.low %vm2076_vm1, %vm2074_vm13 }
 0x1cb   :  { %2650 = vmatmul.mubr.msk.bf16.gmra.mrb[16].mxu0 %vm2649_vm0, %v2849_v21  ;;  %vm2037_vm0 = vcmp.eq.s32.totalorder %v3240_v26, %v2009_v18 }
 0x1cc   :  { %2652 = vmatprep.mubr.msk.bf16.mxu0 %vm2651_vm5, %v2849_v21  ;;  %vm2039_vm5 = vcmp.eq.s32.totalorder %v3240_v26, %v2010_v34  ;;  %vm2069_vm14 = vmor %vm1989_vm9, %vm2037_vm0  ;;  %vm2041_vm0 = vcmp.eq.s32.totalorder %v3240_v26, %v2011_v62  ;;  %vm1995_vm9 = vcmp.eq.s32.totalorder %v3240_v26, %v1964_v63 }
 0x1cd   :  { %vm2071_vm3 = vmor %vm1991_vm2, %vm2039_vm5 }
 0x1ce   :  { %vm2657_vm4 = vmpackc.low %vm2071_vm3, %vm2069_vm14  ;;  %vm2139_vm14 = vcmp.eq.s32.totalorder %v5043_v40, %v4528_v47 }
 0x1cf   :  { %vm2203_vm3 = vmor %vm2138_vm10, %vm2171_vm15  ;;  %vm2174_vm10 = vcmp.eq.s32.totalorder %v5085_v59, %v4543_v23 }
 0x1d0   :  { %vm2204_vm13 = vmor %vm2139_vm14, %vm2172_vm8 }
 0x1d1   :  { %vm2675_vm1 = vmpackc.low %vm2204_vm13, %vm2203_vm3 }
 0x1d2   :  { %2708 = vmatpush3.bf16.msk.msra.mxu1 %vm2675_vm1, %v2849_v21 }
 0x1d3   :  { %2654 = vmatmul.mubr.msk.bf16.gmra.mrb[20].mxu0 %vm2653_vm11, %v2849_v21  ;;  %vm1993_vm11 = vcmp.eq.s32.totalorder %v3240_v26, %v1963_v17 }
 0x1d4   :  { %2656 = vmatprep.mubr.msk.bf16.mxu0 %vm2655_vm6, %v2849_v21  ;;  %vm2043_vm6 = vcmp.eq.s32.totalorder %v3240_v26, %v2012_v49  ;;  %vm2073_vm2 = vmor %vm1993_vm11, %vm2041_vm0  ;;  %v584_v26 = vadd.s32 240, %v2957_v14  ;;  %vm2190_vm0 = vcmp.eq.s32.totalorder %v4833_v25, %v4543_v23 }
 0x1d5   :  { %vm2075_vm5 = vmor %vm1995_vm9, %vm2043_vm6  ;;  %vm2140_vm6 = vcmp.eq.s32.totalorder %v5082_v46, %v4528_v47 }
 0x1d6   :  { %vm2661_vm7 = vmpackc.low %vm2075_vm5, %vm2073_vm2  ;;  %vm2189_vm11 = vcmp.eq.s32.totalorder %v584_v26, %v4543_v23  ;;  %vm2173_vm2 = vcmp.eq.s32.totalorder %v5082_v46, %v4543_v23 }
 0x1d7   :  { %vm2205_vm15 = vmor %vm2140_vm6, %vm2173_vm2 }
 0x1db   :  { %2658 = vmatmul.mubr.msk.bf16.gmra.mrb[24].mxu0 %vm2657_vm4, %v2849_v21  ;;  %vm2156_vm4 = vcmp.eq.s32.totalorder %v584_v26, %v4528_v47 }
 0x1dc   :  { %2660 = vmatprep.mubr.msk.bf16.mxu0 %vm2659_vm12, %v2849_v21  ;;  %vm2157_vm12 = vcmp.eq.s32.totalorder %v4833_v25, %v4528_v47  ;;  %vm2221_vm9 = vmor %vm2156_vm4, %vm2189_vm11 }
 0x1dd   :  { %vm2222_vm5 = vmor %vm2157_vm12, %vm2190_vm0 }
 0x1de   :  { %vm2693_vm14 = vmpackc.low %vm2222_vm5, %vm2221_vm9 }
 0x1df   :  { %2709 = vmatprep.subr.msk.bf16.mxu1 %vm2693_vm14, %v2849_v21 }
 0x1e3   :  { %2662 = vmatmul.mubr.msk.bf16.gmra.mrb[28].mxu0 %vm2661_vm7, %v2849_v21  ;;  %vm2141_vm7 = vcmp.eq.s32.totalorder %v5085_v59, %v4528_v47 }
 0x1e4   :  { %vm2206_vm8 = vmor %vm2141_vm7, %vm2174_vm10 }
 0x1e5   :  { %vm2677_vm3 = vmpackc.low %vm2206_vm8, %vm2205_vm15 }
 0x1e6   :  { %2710 = vmatpush3.bf16.msk.msra.mxu1 %vm2677_vm3, %v2849_v21 }
 0x27e   :  { %v2337_v14 = vpop.f32.mrb[0].mxu0 }
 0x27f   :  { %v2339_v37 = vpop.f32.mrb[1].mxu0 }
 0x280   :  { %v2341_v25 = vpop.f32.mrb[2].mxu0 }
 0x281   :  { %v2416_v43 = vpack.c.bf16 %v2341_v25, %v2337_v14  ;;  %v2343_v27 = vpop.f32.mrb[3].mxu0 }
 0x282   :  { %v2417_v24 = vpack.c.bf16 %v2343_v27, %v2339_v37 }
 0x284   :  { %2464 = vmatprep.mubr.bf16.mxu1 %v2417_v24 }
 0x285   :  { %2465 = vmatmul.mubr.bf16.vlgmr.msra.gmra.mrb[0].mxu1 %v2416_v43 }
 0x286   :  { %v2347_v47 = vpop.f32.mrb[4].mxu0 }
 0x287   :  { %v2349_v3 = vpop.f32.mrb[5].mxu0 }
 0x288   :  { %v2351_v41 = vpop.f32.mrb[6].mxu0 }
 0x289   :  { %v2418_v23 = vpack.c.bf16 %v2351_v41, %v2347_v47  ;;  %v2353_v58 = vpop.f32.mrb[7].mxu0 }
 0x28a   :  { %v2419_v36 = vpack.c.bf16 %v2353_v58, %v2349_v3 }
 0x28c   :  { %2472 = vmatprep.mubr.bf16.mxu1 %v2419_v36 }
 0x28d   :  { %2473 = vmatmul.mubr.bf16.gmra.mrb[4].mxu1 %v2418_v23 }
 0x28e   :  { %v2357_v11 = vpop.f32.mrb[8].mxu0 }
 0x28f   :  { %v2359_v19 = vpop.f32.mrb[9].mxu0 }
 0x290   :  { %v2361_v8 = vpop.f32.mrb[10].mxu0 }
 0x291   :  { %v2420_v21 = vpack.c.bf16 %v2361_v8, %v2357_v11  ;;  %v2363_v5 = vpop.f32.mrb[11].mxu0 }
 0x292   :  { %v2421_v9 = vpack.c.bf16 %v2363_v5, %v2359_v19 }
 0x294   :  { %2480 = vmatprep.mubr.bf16.mxu1 %v2421_v9 }
 0x295   :  { %2481 = vmatmul.mubr.bf16.gmra.mrb[8].mxu1 %v2420_v21 }
 0x296   :  { %v2367_v2 = vpop.f32.mrb[12].mxu0 }
 0x297   :  { %v2369_v32 = vpop.f32.mrb[13].mxu0 }
 0x298   :  { %v2371_v61 = vpop.f32.mrb[14].mxu0 }
 0x299   :  { %v2422_v53 = vpack.c.bf16 %v2371_v61, %v2367_v2  ;;  %v2373_v33 = vpop.f32.mrb[15].mxu0 }
 0x29a   :  { %v2423_v15 = vpack.c.bf16 %v2373_v33, %v2369_v32 }
 0x29c   :  { %2488 = vmatprep.mubr.bf16.mxu1 %v2423_v15 }
 0x29d   :  { %2489 = vmatmul.mubr.bf16.gmra.mrb[12].mxu1 %v2422_v53 }
 0x29e   :  { %v2377_v55 = vpop.f32.mrb[16].mxu0 }
 0x29f   :  { %v2379_v1 = vpop.f32.mrb[17].mxu0 }
 0x2a0   :  { %v2381_v57 = vpop.f32.mrb[18].mxu0 }
 0x2a1   :  { %v2424_v60 = vpack.c.bf16 %v2381_v57, %v2377_v55  ;;  %v2383_v28 = vpop.f32.mrb[19].mxu0 }
 0x2a2   :  { %v2425_v6 = vpack.c.bf16 %v2383_v28, %v2379_v1 }
 0x2a4   :  { %2496 = vmatprep.mubr.bf16.mxu1 %v2425_v6 }
 0x2a5   :  { %2497 = vmatmul.mubr.bf16.gmra.mrb[16].mxu1 %v2424_v60 }
 0x2a6   :  { %v2387_v7 = vpop.f32.mrb[20].mxu0 }
 0x2a7   :  { %v2389_v39 = vpop.f32.mrb[21].mxu0 }
 0x2a8   :  { %v2391_v52 = vpop.f32.mrb[22].mxu0 }
 0x2a9   :  { %v2426_v45 = vpack.c.bf16 %v2391_v52, %v2387_v7  ;;  %v2393_v10 = vpop.f32.mrb[23].mxu0 }
 0x2aa   :  { %v2427_v42 = vpack.c.bf16 %v2393_v10, %v2389_v39 }
 0x2ac   :  { %2504 = vmatprep.mubr.bf16.mxu1 %v2427_v42 }
 0x2ad   :  { %2505 = vmatmul.mubr.bf16.gmra.mrb[20].mxu1 %v2426_v45 }
 0x2ae   :  { %v2397_v35 = vpop.f32.mrb[24].mxu0 }
 0x2af   :  { %v2399_v20 = vpop.f32.mrb[25].mxu0 }
 0x2b0   :  { %v2401_v16 = vpop.f32.mrb[26].mxu0 }
 0x2b1   :  { %v2428_v13 = vpack.c.bf16 %v2401_v16, %v2397_v35  ;;  %v2403_v30 = vpop.f32.mrb[27].mxu0 }
 0x2b2   :  { %v2429_v50 = vpack.c.bf16 %v2403_v30, %v2399_v20 }
 0x2b4   :  { %2512 = vmatprep.mubr.bf16.mxu1 %v2429_v50 }
 0x2b5   :  { %2513 = vmatmul.mubr.bf16.gmra.mrb[24].mxu1 %v2428_v13 }
 0x2b6   :  { %v2407_v12 = vpop.f32.mrb[28].mxu0 }
 0x2b7   :  { %v2409_v0 = vpop.f32.mrb[29].mxu0 }
 0x2b8   :  { %v2411_v31 = vpop.f32.mrb[30].mxu0 }
 0x2b9   :  { %v2430_v40 = vpack.c.bf16 %v2411_v31, %v2407_v12  ;;  %v2413_v38 = vpop.f32.mrb[31].mxu0 }
 0x2ba   :  { %v2431_v51 = vpack.c.bf16 %v2413_v38, %v2409_v0 }
 0x2bc   :  { %2520 = vmatprep.mubr.bf16.mxu1 %v2431_v51 }
 0x2bd   :  { %2521 = vmatmul.mubr.bf16.gmra.mrb[28].mxu1 %v2430_v40 }
 0x358   :  { %v2711_v56 = vpop.f32.mrb[0].mxu1 }
 0x359   :  { %v2712_v22 = vpop.f32.mrb[1].mxu1 }
 0x35a   :  { %v2713_v54 = vadd.f32 %v2712_v22, %v2711_v56  ;;  %v2714_v44 = vpop.f32.mrb[2].mxu1 }
 0x35b   :  { %v2715_v18 = vpop.f32.mrb[3].mxu1 }
 0x35c   :  { %2529 = vst [vmem:[#allocation7] sm:$0xff] %v2713_v54  ;;  %v2716_v46 = vadd.f32 %v2715_v18, %v2714_v44 }
 0x35e   :  { %2530 = vst [vmem:[#allocation7 + $0x8] sm:$0xff] %v2716_v46 }
 0x360   :  { %v2717_v34 = vpop.f32.mrb[4].mxu1 }
 0x361   :  { %v2718_v59 = vpop.f32.mrb[5].mxu1 }
 0x362   :  { %v2719_v17 = vadd.f32 %v2718_v59, %v2717_v34  ;;  %v2720_v4 = vpop.f32.mrb[6].mxu1 }
 0x363   :  { %v2721_v63 = vpop.f32.mrb[7].mxu1 }
 0x364   :  { %2531 = vst [vmem:[#allocation7 + $0x10] sm:$0xff] %v2719_v17  ;;  %v2722_v48 = vadd.f32 %v2721_v63, %v2720_v4 }
 0x366   :  { %2532 = vst [vmem:[#allocation7 + $0x18] sm:$0xff] %v2722_v48 }
 0x368   :  { %v2723_v29 = vpop.f32.mrb[8].mxu1 }
 0x369   :  { %v2724_v62 = vpop.f32.mrb[9].mxu1 }
 0x36a   :  { %v2725_v49 = vadd.f32 %v2724_v62, %v2723_v29  ;;  %v2726_v26 = vpop.f32.mrb[10].mxu1 }
 0x36b   :  { %v2727_v14 = vpop.f32.mrb[11].mxu1 }
 0x36c   :  { %2533 = vst [vmem:[#allocation7 + $0x20] sm:$0xff] %v2725_v49  ;;  %v2728_v37 = vadd.f32 %v2727_v14, %v2726_v26 }
 0x36e   :  { %2534 = vst [vmem:[#allocation7 + $0x28] sm:$0xff] %v2728_v37 }
 0x370   :  { %v2729_v25 = vpop.f32.mrb[12].mxu1 }
 0x371   :  { %v2730_v43 = vpop.f32.mrb[13].mxu1 }
 0x372   :  { %v2731_v27 = vadd.f32 %v2730_v43, %v2729_v25  ;;  %v2732_v24 = vpop.f32.mrb[14].mxu1 }
 0x373   :  { %v2733_v47 = vpop.f32.mrb[15].mxu1 }
 0x374   :  { %2535 = vst [vmem:[#allocation7 + $0x30] sm:$0xff] %v2731_v27  ;;  %v2734_v3 = vadd.f32 %v2733_v47, %v2732_v24 }
 0x376   :  { %2536 = vst [vmem:[#allocation7 + $0x38] sm:$0xff] %v2734_v3 }
 0x378   :  { %v2735_v41 = vpop.f32.mrb[16].mxu1 }
 0x379   :  { %v2736_v23 = vpop.f32.mrb[17].mxu1 }
 0x37a   :  { %v2737_v58 = vadd.f32 %v2736_v23, %v2735_v41  ;;  %v2738_v36 = vpop.f32.mrb[18].mxu1 }
 0x37b   :  { %v2739_v11 = vpop.f32.mrb[19].mxu1 }
 0x37c   :  { %2537 = vst [vmem:[#allocation7 + $0x40] sm:$0xff] %v2737_v58  ;;  %v2740_v19 = vadd.f32 %v2739_v11, %v2738_v36 }
 0x37e   :  { %2538 = vst [vmem:[#allocation7 + $0x48] sm:$0xff] %v2740_v19 }
 0x380   :  { %v2741_v8 = vpop.f32.mrb[20].mxu1 }
 0x381   :  { %v2742_v21 = vpop.f32.mrb[21].mxu1 }
 0x382   :  { %v2743_v5 = vadd.f32 %v2742_v21, %v2741_v8  ;;  %v2744_v9 = vpop.f32.mrb[22].mxu1 }
 0x383   :  { %v2745_v2 = vpop.f32.mrb[23].mxu1 }
 0x384   :  { %2539 = vst [vmem:[#allocation7 + $0x50] sm:$0xff] %v2743_v5  ;;  %v2746_v32 = vadd.f32 %v2745_v2, %v2744_v9 }
 0x386   :  { %2540 = vst [vmem:[#allocation7 + $0x58] sm:$0xff] %v2746_v32 }
 0x388   :  { %v2747_v61 = vpop.f32.mrb[24].mxu1 }
 0x389   :  { %v2748_v53 = vpop.f32.mrb[25].mxu1 }
 0x38a   :  { %v2749_v33 = vadd.f32 %v2748_v53, %v2747_v61  ;;  %v2750_v15 = vpop.f32.mrb[26].mxu1 }
 0x38b   :  { %v2751_v55 = vpop.f32.mrb[27].mxu1 }
 0x38c   :  { %2541 = vst [vmem:[#allocation7 + $0x60] sm:$0xff] %v2749_v33  ;;  %v2752_v1 = vadd.f32 %v2751_v55, %v2750_v15 }
 0x38e   :  { %2542 = vst [vmem:[#allocation7 + $0x68] sm:$0xff] %v2752_v1 }
 0x390   :  { %v2753_v57 = vpop.f32.mrb[28].mxu1 }
 0x391   :  { %v2754_v60 = vpop.f32.mrb[29].mxu1 }
 0x392   :  { %v2755_v28 = vadd.f32 %v2754_v60, %v2753_v57  ;;  %v2756_v6 = vpop.f32.mrb[30].mxu1 }
 0x393   :  { %v2757_v7 = vpop.f32.mrb[31].mxu1 }
 0x394   :  { %2543 = vst [vmem:[#allocation7 + $0x70] sm:$0xff] %v2755_v28  ;;  %v2758_v39 = vadd.f32 %v2757_v7, %v2756_v6 }
 0x396   :  { %2544 = vst [vmem:[#allocation7 + $0x78] sm:$0xff] %v2758_v39 }
 0x397   :  { %2825 = shalt.err (!%p2822_p6)
}
 0x398   :  { %s2826_s12 = scalar_lea.hbm %s5182_s2, 2048 }
 0x399   :  { %p2827_p7 = scmp.ne.s32.totalorder %s5182_s2, %s2826_s12  ;;  %p2830_p8 = scmp.lt.u32.totalorder %s2826_s12, %s5182_s2 }
 0x39b   :  { %p2832_p9 = pnand %p2830_p8, %p2827_p7 }
 0x39d   :  { %2835 = shalt.err (!%p2832_p9)
}
 0x39e   :  { %s2851_s17 = smov 128   ;;  %s2852_s18 = smov 8  }
 0x39f   :  { %2556 = dma.vmem_to_hbm [thread:$0]  %s2551_s8, 2048, %s5182_s2, [#allocation4], %s2851_s17, %s2851_s17, %s2852_s18  }
 0x3a0   :  { %2840 = dma.done.wait [#allocation4], 2048  }
 0x3a1   :  { %2841 = vsyncadd [#allocation4], 4294965248 }
 0x3a2   :  { %2560 = vsyncpa [#allocation3], 1 }
 0x3a3   :  { %2561 = vsyncpa [#allocation6], 1 }
 0x3a4   :  { %2562 = vsyncpa [#allocation4], 1 }

</bundles_post_ra>
